<compile_context>
chip_gen: v7x
topology: tpu7x:2x2x1
jax: 0.10.0
libtpu: 0.0.40
codegen_flags: <defaults>
</compile_context>

<pallas_src>
import numpy as np
import jax
import jax.numpy as jnp
from jax.experimental import pallas as pl
from jax.experimental.pallas import tpu as pltpu

EPS = 1e-8
LOG_STD_MAX = 2.0
LOG_STD_MIN = -20.0
N_RAYS = 90
N_PAD = 96                      # rays padded 90 -> 96 (edge replicated) for aligned pooling
RAY_FEATS = 6
LIDAR_DIM = N_RAYS * RAY_FEATS  # 540
REST_DIM = 8
STATE_DIM = LIDAR_DIM + REST_DIM  # 548
ACT_DIM = 2
K_MIX = 4
HIDDEN = 128
GMM_W = (2 * ACT_DIM + 1) * K_MIX  # 20
SLAB_W = 256                    # lane width of packed weight/bias slabs
OUT_W = 16                      # packed output columns (9 used)

# weight-slab packing order (row offsets end up multiples of 16 -> bf16 sublane-tile aligned)
WEIGHT_ORDER = ["wc1", "wc2", "wc3",
                "wm1a", "wm1b", "wm2", "wm3", "wm4", "wgmm",
                "wq_cnn", "wq_rest", "wq_act", "wq2", "wq3", "wq4"]

# bias-slab rows: name -> (row, width)
BIAS_ROWS = {"bc1": (0, 64), "bc2": (1, 128), "bc3": (2, 256),
             "bm1": (3, 128), "bm2": (4, 128), "bm3": (5, 128), "bm4": (6, 128),
             "bgmm": (7, GMM_W),
             "bq1": (8, 256), "bq2": (9, 256), "bq3": (10, 256), "bq4": (11, 256),
             "bq5": (12, 2)}
W5_ROW = 13                     # final Q layer weights [q1_5 (128) | q2_5 (128)] as one f32 row
BSLAB_ROWS = 16


def _leaky(x):
    # F.leaky_relu, negative_slope = 0.01
    return jnp.maximum(x, 0.01 * x)


def _dot(x, w):
    return jnp.dot(x, w, preferred_element_type=jnp.float32)


def _make_kernel(batch, w_off):
    """batch here is the per-block batch size BB."""
    def kernel(lidar_ref, rest_ref, eps_ref, u_ref, a_ref, alpha_ref,
               wslab_ref, bslab_ref, out_ref):
        def W(name):
            off, r, c = w_off[name]
            return wslab_ref[off:off + r, 0:c]          # bf16 slice, no cast needed

        def B_(name):
            row, c = BIAS_ROWS[name]
            return bslab_ref[row:row + 1, 0:c]          # f32 [1, c]

        bf = jnp.bfloat16
        lidar = lidar_ref[...]            # [BB*96, 6]
        rest = rest_ref[...]              # [BB, 8]
        eps = eps_ref[...]                # [BB, 2]
        u = u_ref[...]                    # [BB, 1]
        a = a_ref[...]                    # [BB, 2]
        alpha1 = alpha_ref[0]             # SMEM scalar (policy alpha_actv1)
        alpha2 = alpha_ref[1]             # SMEM scalar (critic alpha_actv2)

        # ---- fused CNN (policy CNNNet || critic CNNDense) ----
        left = lidar[:, 0:2]
        col2 = lidar[:, 2:3]
        right = lidar[:, 3:6]
        # new_relu: 1 / max(x + alpha, EPS); exact f32 reciprocal (review correctness concern)
        r1 = 1.0 / jnp.maximum(col2 + alpha1, EPS)
        r2 = 1.0 / jnp.maximum(col2 + alpha2, EPS)
        x12 = jnp.concatenate([left, r1, right, left, r2, right], axis=1).astype(bf)  # [BB*96,12]

        h = _leaky(_dot(x12, W("wc1")) + B_("bc1"))                   # [BB*96, 64]
        h = _leaky(_dot(h.astype(bf), W("wc2")) + B_("bc2"))          # [BB*96, 128]
        h = _leaky(_dot(h.astype(bf), W("wc3")) + B_("bc3"))          # [BB*96, 256]

        # MaxPool1d(90): per-batch max over rays (pad rays replicate ray 89 -> max unchanged).
        pooled = jnp.max(h.reshape(batch, N_PAD, 2 * HIDDEN), axis=1)  # [BB, 256]
        cnn_feat = pooled[:, 0:HIDDEN]            # policy CNNNet features   [BB, 128]
        y_dense = pooled[:, HIDDEN:2 * HIDDEN]    # critic CNNDense features [BB, 128]
        rest_b = rest.astype(bf)

        # ---- policy MLP (output_activation == activation) + GMM head ----
        net = _leaky(_dot(cnn_feat.astype(bf), W("wm1a"))
                     + _dot(rest_b, W("wm1b")) + B_("bm1"))
        net = _leaky(_dot(net.astype(bf), W("wm2")) + B_("bm2"))
        net = _leaky(_dot(net.astype(bf), W("wm3")) + B_("bm3"))
        net = _leaky(_dot(net.astype(bf), W("wm4")) + B_("bm4"))
        gmm = _dot(net.astype(bf), W("wgmm")) + B_("bgmm")            # [BB, 20] f32

        # one tanh + rescale over the whole 20-lane block (only log_sig lanes are consumed)
        gmm_sig = LOG_STD_MIN + 0.5 * (LOG_STD_MAX - LOG_STD_MIN) * (jnp.tanh(gmm) + 1.0)

        # split mixture parameters (view(-1, K, 2*act_dim+1))
        log_ws, mus, logsigs = [], [], []
        for k in range(K_MIX):
            base = (2 * ACT_DIM + 1) * k
            log_ws.append(gmm[:, base:base + 1])                      # [BB, 1]
            mus.append(gmm[:, base + 1:base + 1 + ACT_DIM])           # [BB, act_dim]
            logsigs.append(gmm_sig[:, base + 1 + ACT_DIM:base + 1 + 2 * ACT_DIM])

        # categorical sample over softmax(log_w) via inverse CDF with external uniform u
        m_w = log_ws[0]
        for k in range(1, K_MIX):
            m_w = jnp.maximum(m_w, log_ws[k])
        exps = [jnp.exp(lw - m_w) for lw in log_ws]
        cums = [exps[0]]
        for k in range(1, K_MIX):
            cums.append(cums[-1] + exps[k])
        z_total = cums[-1]
        t = u * z_total

        sel_mu = jnp.zeros((batch, ACT_DIM), jnp.float32)
        sel_sig = jnp.zeros((batch, ACT_DIM), jnp.float32)
        prev = jnp.zeros_like(z_total)
        for k in range(K_MIX):
            if k < K_MIX - 1:
                sel = ((t >= prev) & (t < cums[k])).astype(jnp.float32)
            else:
                sel = (t >= prev).astype(jnp.float32)
            sel_mu = sel_mu + sel * mus[k]
            sel_sig = sel_sig + sel * jnp.exp(logsigs[k])
            prev = cums[k]

        # reparameterized sample
        x_t = sel_mu + sel_sig * eps                                  # [BB, act_dim]

        # create_log_gaussian + logsumexp over mixture
        half_log2pi = 0.5 * float(ACT_DIM) * float(np.log(2.0 * np.pi))
        comp = []
        for k in range(K_MIX):
            nd = (x_t - mus[k]) * jnp.exp(-logsigs[k])
            quad = -0.5 * jnp.sum(nd * nd, axis=1, keepdims=True)
            log_z = jnp.sum(logsigs[k], axis=1, keepdims=True) + half_log2pi
            comp.append(quad - log_z + log_ws[k])
        m1 = comp[0]
        for k in range(1, K_MIX):
            m1 = jnp.maximum(m1, comp[k])
        ssum = jnp.zeros_like(m1)
        for ck in comp:
            ssum = ssum + jnp.exp(ck - m1)
        logp_pi = (jnp.log(ssum) + m1) - (jnp.log(z_total) + m_w)     # [BB, 1]

        # apply_squashing_func
        mu_sq = jnp.tanh(sel_mu)
        pi_sq = jnp.tanh(x_t)
        one_minus = jnp.clip(1.0 - pi_sq * pi_sq, 0.0, 1.0)
        logp_pi = logp_pi - jnp.sum(jnp.log(one_minus + 1e-6), axis=1, keepdims=True)

        # ---- twin Q nets x both action variants, lane-packed (Q1 lanes 0:128 | Q2 128:256) ----
        shared = (_dot(y_dense.astype(bf), W("wq_cnn"))
                  + _dot(rest_b, W("wq_rest")) + B_("bq1"))                       # [BB, 256]
        wq_act = W("wq_act")                                                      # [2, 256]
        hq = jnp.concatenate([_leaky(shared + _dot(pi_sq.astype(bf), wq_act)),
                              _leaky(shared + _dot(a.astype(bf), wq_act))], axis=0)  # [2BB, 256]
        for i in (2, 3, 4):
            w = W(f"wq{i}")                                                       # [128, 256]
            hqb = hq.astype(bf)
            hq = _leaky(jnp.concatenate(
                [_dot(hqb[:, 0:HIDDEN], w[:, 0:HIDDEN]),
                 _dot(hqb[:, HIDDEN:2 * HIDDEN], w[:, HIDDEN:2 * HIDDEN])],
                axis=1) + B_(f"bq{i}"))

        # final 128 -> 1 per stream: elementwise multiply + lane reduce (weights in bslab row 13)
        w5 = bslab_ref[W5_ROW:W5_ROW + 1, 0:2 * HIDDEN]                           # [1, 256] f32
        prod = hq * w5
        b5 = B_("bq5")                                                            # [1, 2]
        q_1 = jnp.sum(prod[:, 0:HIDDEN], axis=1, keepdims=True) + b5[:, 0:1]      # [2BB, 1]
        q_2 = jnp.sum(prod[:, HIDDEN:2 * HIDDEN], axis=1, keepdims=True) + b5[:, 1:2]

        q1_pi = q_1[0:batch]
        q2_pi = q_2[0:batch]
        q1 = q_1[batch:2 * batch]
        q2 = q_2[batch:2 * batch]

        # packed output: [mu(2), pi(2), logp(1), q1, q2, q1_pi, q2_pi, pad] -> [BB, 16]
        out_ref[...] = jnp.concatenate(
            [mu_sq, pi_sq, logp_pi, q1, q2, q1_pi, q2_pi,
             jnp.zeros((batch, OUT_W - (2 * ACT_DIM + 5)), jnp.float32)], axis=1)

    return kernel


def make_params(key):
    """Deterministic synthetic params, PyTorch-style U(-1/sqrt(fan_in), 1/sqrt(fan_in)) init.
    Weights are stored [in, out] (transposed vs torch) since the kernel computes x @ W."""
    keys = iter(jax.random.split(key, 64))

    def lin(fan_in, fan_out):
        bound = 1.0 / np.sqrt(fan_in)
        w = jax.random.uniform(next(keys), (fan_in, fan_out), jnp.float32, -bound, bound)
        b = jax.random.uniform(next(keys), (fan_out,), jnp.float32, -bound, bound)
        return w, b

    p = {"alpha1": jnp.float32(0.0), "alpha2": jnp.float32(0.0)}
    # policy CNNNet convs (kernel_size=1 -> [in, out] matrices)
    for i, (fi, fo) in enumerate([(6, 32), (32, 64), (64, 128)], start=1):
        p[f"pc{i}_w"], p[f"pc{i}_b"] = lin(fi, fo)
    # policy MLP: 136 -> 128 x4
    dims = [HIDDEN + REST_DIM] + [HIDDEN] * 4
    for i in range(4):
        p[f"m{i + 1}_w"], p[f"m{i + 1}_b"] = lin(dims[i], dims[i + 1])
    # GMM head
    p["gmm_w"], p["gmm_b"] = lin(HIDDEN, GMM_W)
    # critic CNNDense convs
    for i, (fi, fo) in enumerate([(6, 32), (32, 64), (64, 128)], start=1):
        p[f"dc{i}_w"], p[f"dc{i}_b"] = lin(fi, fo)
    # Q1, Q2: 138 -> 128 x4 -> 1
    qdims = [HIDDEN + REST_DIM + ACT_DIM] + [HIDDEN] * 4 + [1]
    for q in (1, 2):
        for i in range(5):
            p[f"q{q}_{i + 1}_w"], p[f"q{q}_{i + 1}_b"] = lin(qdims[i], qdims[i + 1])
    return p


def pack_params(p):
    """Fuse policy/critic CNN branches + twin Q nets and pack everything into one bf16 weight
    slab, one f32 bias slab (biases + final Q weight row) and an SMEM scalar pair."""
    def bd(a_, b_):
        ra, ca = a_.shape
        rb, cb = b_.shape
        top = jnp.concatenate([a_, jnp.zeros((ra, cb), jnp.float32)], axis=1)
        bot = jnp.concatenate([jnp.zeros((rb, ca), jnp.float32), b_], axis=1)
        return jnp.concatenate([top, bot], axis=0)

    Wd, Bd = {}, {}
    # fused conv stack (policy block first, critic block second)
    Wd["wc1"] = bd(p["pc1_w"], p["dc1_w"]); Bd["bc1"] = jnp.concatenate([p["pc1_b"], p["dc1_b"]])
    Wd["wc2"] = bd(p["pc2_w"], p["dc2_w"]); Bd["bc2"] = jnp.concatenate([p["pc2_b"], p["dc2_b"]])
    Wd["wc3"] = bd(p["pc3_w"], p["dc3_w"]); Bd["bc3"] = jnp.concatenate([p["pc3_b"], p["dc3_b"]])
    # policy MLP (first layer split [cnn 128 | rest 8])
    Wd["wm1a"] = p["m1_w"][:HIDDEN]
    Wd["wm1b"] = p["m1_w"][HIDDEN:]
    Bd["bm1"] = p["m1_b"]
    for i in (2, 3, 4):
        Wd[f"wm{i}"] = p[f"m{i}_w"]; Bd[f"bm{i}"] = p[f"m{i}_b"]
    Wd["wgmm"] = p["gmm_w"]; Bd["bgmm"] = p["gmm_b"]
    # fused twin Q nets: first layer split [cnn | rest | action], Q1/Q2 lane-packed (no zeros)
    Wd["wq_cnn"] = jnp.concatenate([p["q1_1_w"][:128], p["q2_1_w"][:128]], axis=1)
    Wd["wq_rest"] = jnp.concatenate([p["q1_1_w"][128:136], p["q2_1_w"][128:136]], axis=1)
    Wd["wq_act"] = jnp.concatenate([p["q1_1_w"][136:138], p["q2_1_w"][136:138]], axis=1)
    Bd["bq1"] = jnp.concatenate([p["q1_1_b"], p["q2_1_b"]])
    for i in (2, 3, 4):
        Wd[f"wq{i}"] = jnp.concatenate([p[f"q1_{i}_w"], p[f"q2_{i}_w"]], axis=1)  # [128, 256]
        Bd[f"bq{i}"] = jnp.concatenate([p[f"q1_{i}_b"], p[f"q2_{i}_b"]])
    # final Q layer (128 -> 1 each): one 256-lane f32 row in the bias slab, no zero padding
    w5_row = jnp.concatenate([p["q1_5_w"][:, 0], p["q2_5_w"][:, 0]])              # [256]
    Bd["bq5"] = jnp.concatenate([p["q1_5_b"], p["q2_5_b"]])                       # [2]

    # weight slab: rows padded to multiples of 16 (bf16 sublane tile), cols padded to SLAB_W
    w_off = {}
    chunks = []
    row = 0
    for name in WEIGHT_ORDER:
        w = Wd[name]
        r, c = w.shape
        rp = ((r + 15) // 16) * 16
        w_off[name] = (row, r, c)
        chunks.append(jnp.pad(w, ((0, rp - r), (0, SLAB_W - c))))
        row += rp
    wslab = jnp.concatenate(chunks, axis=0).astype(jnp.bfloat16)   # bf16 in HBM (half the DMA)
    # TODO(synk): optional fp8 slab (with per-tensor scales) for v7x MXU — opt-in, needs
    # accuracy validation against the PyTorch reference.

    bslab = jnp.zeros((BSLAB_ROWS, SLAB_W), jnp.float32)
    for name, (ridx, c) in BIAS_ROWS.items():
        bslab = bslab.at[ridx, :c].set(Bd[name])
    bslab = bslab.at[W5_ROW, :2 * HIDDEN].set(w5_row)

    alphas = jnp.stack([p["alpha1"], p["alpha2"]]).astype(jnp.float32)
    return wslab, bslab, alphas, w_off


def mlp_actor_critic_forward(x, a, eps, u, packed):
    """Returns (mu, pi, logp_pi, q1, q2, q1_pi, q2_pi) matching MLPActorCritic.forward(x, a)."""
    wslab, bslab, alphas, w_off = packed
    batch = x.shape[0]

    # batch grid: BB rows per block; pad batch (replicating the last row) to a block multiple
    bb = batch if batch <= 8 else 8
    n_blocks = (batch + bb - 1) // bb
    b_pad = n_blocks * bb
    if b_pad != batch:
        def pad_rows(t):
            rep = jnp.broadcast_to(t[-1:], (b_pad - batch,) + t.shape[1:])
            return jnp.concatenate([t, rep], axis=0)
        x, a, eps, u = (pad_rows(t) for t in (x, a, eps, u))

    # PyTorch views the flat lidar block as [B, 90, 6]; edge-pad rays 90 -> 96 (max unchanged).
    lidar = x[:, :LIDAR_DIM].reshape(b_pad, N_RAYS, RAY_FEATS)
    pad = jnp.broadcast_to(lidar[:, N_RAYS - 1:N_RAYS, :],
                           (b_pad, N_PAD - N_RAYS, RAY_FEATS))
    lidar_p = jnp.concatenate([lidar, pad], axis=1).reshape(b_pad * N_PAD, RAY_FEATS)
    rest = x[:, LIDAR_DIM:]

    rows = b_pad * N_PAD
    flops = (2 * rows * (12 * 64 + 64 * 128 + 128 * 256)
             + 2 * b_pad * ((HIDDEN + REST_DIM) * HIDDEN + 3 * HIDDEN * HIDDEN + HIDDEN * GMM_W)
             + 2 * b_pad * ((HIDDEN + REST_DIM) * 2 * HIDDEN)
             + 2 * (2 * b_pad) * (ACT_DIM * 2 * HIDDEN + 3 * 2 * HIDDEN * HIDDEN + 2 * HIDDEN))
    transcendentals = 2 * rows + 40 * b_pad
    bytes_accessed = (4 * (lidar_p.size + rest.size + eps.size + u.size + a.size
                           + bslab.size + alphas.size + b_pad * OUT_W)
                      + 2 * wslab.size)

    smem = pltpu.MemorySpace.SMEM
    in_specs = [
        pl.BlockSpec((bb * N_PAD, RAY_FEATS), lambda b: (b, 0)),   # lidar (channels-last)
        pl.BlockSpec((bb, REST_DIM), lambda b: (b, 0)),            # rest
        pl.BlockSpec((bb, ACT_DIM), lambda b: (b, 0)),             # eps (normal noise)
        pl.BlockSpec((bb, 1), lambda b: (b, 0)),                   # u (uniform noise)
        pl.BlockSpec((bb, ACT_DIM), lambda b: (b, 0)),             # action a
        pl.BlockSpec(memory_space=smem),                           # alpha scalars
        pl.BlockSpec(wslab.shape, lambda b: (0, 0)),               # weight slab, VMEM-resident
        pl.BlockSpec(bslab.shape, lambda b: (0, 0)),               # bias slab, VMEM-resident
    ]
    out_specs = pl.BlockSpec((bb, OUT_W), lambda b: (b, 0))

    out = pl.pallas_call(
        _make_kernel(bb, w_off),
        out_shape=jax.ShapeDtypeStruct((b_pad, OUT_W), jnp.float32),
        grid=(n_blocks,),
        in_specs=in_specs,
        out_specs=out_specs,
        compiler_params=pltpu.CompilerParams(dimension_semantics=("parallel",)),
        cost_estimate=pl.CostEstimate(flops=int(flops),
                                      transcendentals=int(transcendentals),
                                      bytes_accessed=int(bytes_accessed)),
    )(lidar_p, rest, eps, u, a, alphas, wslab, bslab)
    # TODO(synk): if weight DMA still dominates at tiny batches, split the slab into a
    # conv-stage and an MLP/Q-stage input on a 2-step "arbitrary" grid so stage-2 weights
    # stream while the conv matmuls run.

    out = out[:batch]
    mu = out[:, 0:ACT_DIM]
    pi = out[:, ACT_DIM:2 * ACT_DIM]
    logp_pi = out[:, 2 * ACT_DIM]
    q1 = out[:, 2 * ACT_DIM + 1]
    q2 = out[:, 2 * ACT_DIM + 2]
    q1_pi = out[:, 2 * ACT_DIM + 3]
    q2_pi = out[:, 2 * ACT_DIM + 4]
    return (mu, pi, logp_pi, q1, q2, q1_pi, q2_pi)


if __name__ == "__main__":
    B = 4
    key = jax.random.PRNGKey(0)
    k_x, k_a, k_eps, k_u, k_p = jax.random.split(key, 5)
    # lidar-like positive state (channel 2 feeds a reciprocal activation)
    x = jax.random.uniform(k_x, (B, STATE_DIM), jnp.float32, 0.1, 1.0)
    a = jax.random.uniform(k_a, (B, ACT_DIM), jnp.float32, -1.0, 1.0)
    eps = jax.random.normal(k_eps, (B, ACT_DIM), dtype=jnp.float32)      # torch.randn analogue
    u = jax.random.uniform(k_u, (B, 1), jnp.float32)                     # torch.multinomial analogue
    params = make_params(k_p)
    packed = pack_params(params)

    outs = mlp_actor_critic_forward(x, a, eps, u, packed)
    outs = jax.block_until_ready(outs)
    mu, pi, logp_pi, q1, q2, q1_pi, q2_pi = outs
    assert mu.shape == (B, ACT_DIM) and pi.shape == (B, ACT_DIM)
    assert logp_pi.shape == (B,) and q1.shape == (B,) and q2_pi.shape == (B,)
    assert all(bool(jnp.all(jnp.isfinite(o))) for o in outs)
    print("KERNEL_OK")
</pallas_src>

<mosaic_0001>
module attributes {stable_mosaic.version = 11 : i64} {
  func.func @kernel(%arg0: i32, %arg1: memref<384x6xf32, #tpu.memory_space<vmem>>, %arg2: memref<4x8xf32, #tpu.memory_space<vmem>>, %arg3: memref<4x2xf32, #tpu.memory_space<vmem>>, %arg4: memref<4x1xf32, #tpu.memory_space<vmem>>, %arg5: memref<4x2xf32, #tpu.memory_space<vmem>>, %arg6: memref<2xf32, #tpu.memory_space<smem>>, %arg7: memref<1408x256xbf16, #tpu.memory_space<vmem>>, %arg8: memref<16x256xf32, #tpu.memory_space<vmem>>, %arg9: memref<4x16xf32, #tpu.memory_space<vmem>>) attributes {dimension_semantics = [#tpu.dimension_semantics<parallel>], iteration_bounds = array<i64: 1>, scalar_prefetch = 0 : i64, scratch_operands = 0 : i64, tpu.core_type = #tpu.core_type<tc>, window_params = [{transform_indices = @transform_0, window_bounds = array<i64: 384, 6>}, {transform_indices = @transform_1, window_bounds = array<i64: 4, 8>}, {transform_indices = @transform_2, window_bounds = array<i64: 4, 2>}, {transform_indices = @transform_3, window_bounds = array<i64: 4, 1>}, {transform_indices = @transform_4, window_bounds = array<i64: 4, 2>}, {transform_indices = @transform_5, window_bounds = array<i64: 2>}, {pipeline_mode = #tpu.pipeline_mode<synchronous>, transform_indices = @transform_6, window_bounds = array<i64: 1408, 256>}, {pipeline_mode = #tpu.pipeline_mode<synchronous>, transform_indices = @transform_7, window_bounds = array<i64: 16, 256>}, {transform_indices = @transform_8, window_bounds = array<i64: 4, 16>}]} {
    %c0 = arith.constant 0 : index
    %c0_0 = arith.constant 0 : index
    %0 = vector.load %arg1[%c0, %c0_0] : memref<384x6xf32, #tpu.memory_space<vmem>>, vector<384x6xf32>
    %c0_1 = arith.constant 0 : index
    %c0_2 = arith.constant 0 : index
    %1 = vector.load %arg2[%c0_1, %c0_2] : memref<4x8xf32, #tpu.memory_space<vmem>>, vector<4x8xf32>
    %c0_3 = arith.constant 0 : index
    %c0_4 = arith.constant 0 : index
    %2 = vector.load %arg3[%c0_3, %c0_4] : memref<4x2xf32, #tpu.memory_space<vmem>>, vector<4x2xf32>
    %c0_5 = arith.constant 0 : index
    %c0_6 = arith.constant 0 : index
    %3 = vector.load %arg4[%c0_5, %c0_6] : memref<4x1xf32, #tpu.memory_space<vmem>>, vector<4x1xf32>
    %c0_7 = arith.constant 0 : index
    %c0_8 = arith.constant 0 : index
    %4 = vector.load %arg5[%c0_7, %c0_8] : memref<4x2xf32, #tpu.memory_space<vmem>>, vector<4x2xf32>
    %c0_9 = arith.constant 0 : index
    %5 = memref.load %arg6[%c0_9] : memref<2xf32, #tpu.memory_space<smem>>
    %c1 = arith.constant 1 : index
    %6 = memref.load %arg6[%c1] : memref<2xf32, #tpu.memory_space<smem>>
    %7 = vector.extract_strided_slice %0 {offsets = [0, 0], sizes = [384, 2], strides = [1, 1]} : vector<384x6xf32> to vector<384x2xf32>
    %8 = vector.extract_strided_slice %0 {offsets = [0, 2], sizes = [384, 1], strides = [1, 1]} : vector<384x6xf32> to vector<384x1xf32>
    %9 = vector.extract_strided_slice %0 {offsets = [0, 3], sizes = [384, 3], strides = [1, 1]} : vector<384x6xf32> to vector<384x3xf32>
    %10 = vector.broadcast %5 : f32 to vector<384x1xf32>
    %11 = arith.addf %8, %10 : vector<384x1xf32>
    %cst = arith.constant 9.99999993E-9 : f32
    %12 = vector.broadcast %cst : f32 to vector<384x1xf32>
    %13 = arith.maximumf %11, %12 : vector<384x1xf32>
    %cst_10 = arith.constant 1.000000e+00 : f32
    %14 = vector.broadcast %cst_10 : f32 to vector<384x1xf32>
    %15 = arith.divf %14, %13 : vector<384x1xf32>
    %16 = vector.broadcast %6 : f32 to vector<384x1xf32>
    %17 = arith.addf %8, %16 : vector<384x1xf32>
    %cst_11 = arith.constant 9.99999993E-9 : f32
    %18 = vector.broadcast %cst_11 : f32 to vector<384x1xf32>
    %19 = arith.maximumf %17, %18 : vector<384x1xf32>
    %cst_12 = arith.constant 1.000000e+00 : f32
    %20 = vector.broadcast %cst_12 : f32 to vector<384x1xf32>
    %21 = arith.divf %20, %19 : vector<384x1xf32>
    %22 = tpu.concatenate %7, %15, %9, %7, %21, %9 in 1 : vector<384x2xf32>, vector<384x1xf32>, vector<384x3xf32>, vector<384x2xf32>, vector<384x1xf32>, vector<384x3xf32> -> vector<384x12xf32>
    %23 = arith.truncf %22 : vector<384x12xf32> to vector<384x12xbf16>
    %c0_13 = arith.constant 0 : index
    %c0_14 = arith.constant 0 : index
    %24 = vector.load %arg7[%c0_13, %c0_14] : memref<1408x256xbf16, #tpu.memory_space<vmem>>, vector<12x64xbf16>
    %cst_15 = arith.constant dense<0.000000e+00> : vector<384x64xf32>
    %25 = tpu.matmul %23, %24, %cst_15 {dimension_numbers = #tpu.dot_dimension_numbers<[1], [0], [0], [1], [0, 0, 1, 1], [], []>} : vector<384x12xbf16>, vector<12x64xbf16>, vector<384x64xf32> -> vector<384x64xf32>
    %c0_16 = arith.constant 0 : index
    %c0_17 = arith.constant 0 : index
    %26 = vector.load %arg8[%c0_16, %c0_17] : memref<16x256xf32, #tpu.memory_space<vmem>>, vector<1x64xf32>
    %27 = vector.broadcast %26 : vector<1x64xf32> to vector<384x64xf32>
    %28 = arith.addf %25, %27 : vector<384x64xf32>
    %cst_18 = arith.constant 0.00999999977 : f32
    %29 = vector.broadcast %cst_18 : f32 to vector<384x64xf32>
    %30 = arith.mulf %29, %28 : vector<384x64xf32>
    %31 = arith.maximumf %28, %30 : vector<384x64xf32>
    %32 = arith.truncf %31 : vector<384x64xf32> to vector<384x64xbf16>
    %c16 = arith.constant 16 : index
    %c0_19 = arith.constant 0 : index
    %33 = vector.load %arg7[%c16, %c0_19] : memref<1408x256xbf16, #tpu.memory_space<vmem>>, vector<64x128xbf16>
    %cst_20 = arith.constant dense<0.000000e+00> : vector<384x128xf32>
    %34 = tpu.matmul %32, %33, %cst_20 {dimension_numbers = #tpu.dot_dimension_numbers<[1], [0], [0], [1], [0, 0, 1, 1], [], []>} : vector<384x64xbf16>, vector<64x128xbf16>, vector<384x128xf32> -> vector<384x128xf32>
    %c1_21 = arith.constant 1 : index
    %c0_22 = arith.constant 0 : index
    %35 = vector.load %arg8[%c1_21, %c0_22] : memref<16x256xf32, #tpu.memory_space<vmem>>, vector<1x128xf32>
    %36 = vector.broadcast %35 : vector<1x128xf32> to vector<384x128xf32>
    %37 = arith.addf %34, %36 : vector<384x128xf32>
    %cst_23 = arith.constant 0.00999999977 : f32
    %38 = vector.broadcast %cst_23 : f32 to vector<384x128xf32>
    %39 = arith.mulf %38, %37 : vector<384x128xf32>
    %40 = arith.maximumf %37, %39 : vector<384x128xf32>
    %41 = arith.truncf %40 : vector<384x128xf32> to vector<384x128xbf16>
    %c80 = arith.constant 80 : index
    %c0_24 = arith.constant 0 : index
    %42 = vector.load %arg7[%c80, %c0_24] : memref<1408x256xbf16, #tpu.memory_space<vmem>>, vector<128x256xbf16>
    %cst_25 = arith.constant dense<0.000000e+00> : vector<384x256xf32>
    %43 = tpu.matmul %41, %42, %cst_25 {dimension_numbers = #tpu.dot_dimension_numbers<[1], [0], [0], [1], [0, 0, 1, 1], [], []>} : vector<384x128xbf16>, vector<128x256xbf16>, vector<384x256xf32> -> vector<384x256xf32>
    %c2 = arith.constant 2 : index
    %c0_26 = arith.constant 0 : index
    %44 = vector.load %arg8[%c2, %c0_26] : memref<16x256xf32, #tpu.memory_space<vmem>>, vector<1x256xf32>
    %45 = vector.broadcast %44 : vector<1x256xf32> to vector<384x256xf32>
    %46 = arith.addf %43, %45 : vector<384x256xf32>
    %cst_27 = arith.constant 0.00999999977 : f32
    %47 = vector.broadcast %cst_27 : f32 to vector<384x256xf32>
    %48 = arith.mulf %47, %46 : vector<384x256xf32>
    %49 = arith.maximumf %46, %48 : vector<384x256xf32>
    %50 = vector.shape_cast %49 : vector<384x256xf32> to vector<4x96x256xf32>
    %cst_28 = arith.constant dense<0xFF800000> : vector<4x256xf32>
    %51 = vector.multi_reduction <maximumf>, %50, %cst_28 [1] : vector<4x96x256xf32> to vector<4x256xf32>
    %52 = vector.extract_strided_slice %51 {offsets = [0, 0], sizes = [4, 128], strides = [1, 1]} : vector<4x256xf32> to vector<4x128xf32>
    %53 = vector.extract_strided_slice %51 {offsets = [0, 128], sizes = [4, 128], strides = [1, 1]} : vector<4x256xf32> to vector<4x128xf32>
    %54 = arith.truncf %1 : vector<4x8xf32> to vector<4x8xbf16>
    %55 = arith.truncf %52 : vector<4x128xf32> to vector<4x128xbf16>
    %c208 = arith.constant 208 : index
    %c0_29 = arith.constant 0 : index
    %56 = vector.load %arg7[%c208, %c0_29] : memref<1408x256xbf16, #tpu.memory_space<vmem>>, vector<128x128xbf16>
    %cst_30 = arith.constant dense<0.000000e+00> : vector<4x128xf32>
    %57 = tpu.matmul %55, %56, %cst_30 {dimension_numbers = #tpu.dot_dimension_numbers<[1], [0], [0], [1], [0, 0, 1, 1], [], []>} : vector<4x128xbf16>, vector<128x128xbf16>, vector<4x128xf32> -> vector<4x128xf32>
    %c336 = arith.constant 336 : index
    %c0_31 = arith.constant 0 : index
    %58 = vector.load %arg7[%c336, %c0_31] : memref<1408x256xbf16, #tpu.memory_space<vmem>>, vector<8x128xbf16>
    %cst_32 = arith.constant dense<0.000000e+00> : vector<4x128xf32>
    %59 = tpu.matmul %54, %58, %cst_32 {dimension_numbers = #tpu.dot_dimension_numbers<[1], [0], [0], [1], [0, 0, 1, 1], [], []>} : vector<4x8xbf16>, vector<8x128xbf16>, vector<4x128xf32> -> vector<4x128xf32>
    %60 = arith.addf %57, %59 : vector<4x128xf32>
    %c3 = arith.constant 3 : index
    %c0_33 = arith.constant 0 : index
    %61 = vector.load %arg8[%c3, %c0_33] : memref<16x256xf32, #tpu.memory_space<vmem>>, vector<1x128xf32>
    %62 = vector.broadcast %61 : vector<1x128xf32> to vector<4x128xf32>
    %63 = arith.addf %60, %62 : vector<4x128xf32>
    %cst_34 = arith.constant 0.00999999977 : f32
    %64 = vector.broadcast %cst_34 : f32 to vector<4x128xf32>
    %65 = arith.mulf %64, %63 : vector<4x128xf32>
    %66 = arith.maximumf %63, %65 : vector<4x128xf32>
    %67 = arith.truncf %66 : vector<4x128xf32> to vector<4x128xbf16>
    %c352 = arith.constant 352 : index
    %c0_35 = arith.constant 0 : index
    %68 = vector.load %arg7[%c352, %c0_35] : memref<1408x256xbf16, #tpu.memory_space<vmem>>, vector<128x128xbf16>
    %cst_36 = arith.constant dense<0.000000e+00> : vector<4x128xf32>
    %69 = tpu.matmul %67, %68, %cst_36 {dimension_numbers = #tpu.dot_dimension_numbers<[1], [0], [0], [1], [0, 0, 1, 1], [], []>} : vector<4x128xbf16>, vector<128x128xbf16>, vector<4x128xf32> -> vector<4x128xf32>
    %c4 = arith.constant 4 : index
    %c0_37 = arith.constant 0 : index
    %70 = vector.load %arg8[%c4, %c0_37] : memref<16x256xf32, #tpu.memory_space<vmem>>, vector<1x128xf32>
    %71 = vector.broadcast %70 : vector<1x128xf32> to vector<4x128xf32>
    %72 = arith.addf %69, %71 : vector<4x128xf32>
    %cst_38 = arith.constant 0.00999999977 : f32
    %73 = vector.broadcast %cst_38 : f32 to vector<4x128xf32>
    %74 = arith.mulf %73, %72 : vector<4x128xf32>
    %75 = arith.maximumf %72, %74 : vector<4x128xf32>
    %76 = arith.truncf %75 : vector<4x128xf32> to vector<4x128xbf16>
    %c480 = arith.constant 480 : index
    %c0_39 = arith.constant 0 : index
    %77 = vector.load %arg7[%c480, %c0_39] : memref<1408x256xbf16, #tpu.memory_space<vmem>>, vector<128x128xbf16>
    %cst_40 = arith.constant dense<0.000000e+00> : vector<4x128xf32>
    %78 = tpu.matmul %76, %77, %cst_40 {dimension_numbers = #tpu.dot_dimension_numbers<[1], [0], [0], [1], [0, 0, 1, 1], [], []>} : vector<4x128xbf16>, vector<128x128xbf16>, vector<4x128xf32> -> vector<4x128xf32>
    %c5 = arith.constant 5 : index
    %c0_41 = arith.constant 0 : index
    %79 = vector.load %arg8[%c5, %c0_41] : memref<16x256xf32, #tpu.memory_space<vmem>>, vector<1x128xf32>
    %80 = vector.broadcast %79 : vector<1x128xf32> to vector<4x128xf32>
    %81 = arith.addf %78, %80 : vector<4x128xf32>
    %cst_42 = arith.constant 0.00999999977 : f32
    %82 = vector.broadcast %cst_42 : f32 to vector<4x128xf32>
    %83 = arith.mulf %82, %81 : vector<4x128xf32>
    %84 = arith.maximumf %81, %83 : vector<4x128xf32>
    %85 = arith.truncf %84 : vector<4x128xf32> to vector<4x128xbf16>
    %c608 = arith.constant 608 : index
    %c0_43 = arith.constant 0 : index
    %86 = vector.load %arg7[%c608, %c0_43] : memref<1408x256xbf16, #tpu.memory_space<vmem>>, vector<128x128xbf16>
    %cst_44 = arith.constant dense<0.000000e+00> : vector<4x128xf32>
    %87 = tpu.matmul %85, %86, %cst_44 {dimension_numbers = #tpu.dot_dimension_numbers<[1], [0], [0], [1], [0, 0, 1, 1], [], []>} : vector<4x128xbf16>, vector<128x128xbf16>, vector<4x128xf32> -> vector<4x128xf32>
    %c6 = arith.constant 6 : index
    %c0_45 = arith.constant 0 : index
    %88 = vector.load %arg8[%c6, %c0_45] : memref<16x256xf32, #tpu.memory_space<vmem>>, vector<1x128xf32>
    %89 = vector.broadcast %88 : vector<1x128xf32> to vector<4x128xf32>
    %90 = arith.addf %87, %89 : vector<4x128xf32>
    %cst_46 = arith.constant 0.00999999977 : f32
    %91 = vector.broadcast %cst_46 : f32 to vector<4x128xf32>
    %92 = arith.mulf %91, %90 : vector<4x128xf32>
    %93 = arith.maximumf %90, %92 : vector<4x128xf32>
    %94 = arith.truncf %93 : vector<4x128xf32> to vector<4x128xbf16>
    %c736 = arith.constant 736 : index
    %c0_47 = arith.constant 0 : index
    %95 = vector.load %arg7[%c736, %c0_47] : memref<1408x256xbf16, #tpu.memory_space<vmem>>, vector<128x20xbf16>
    %cst_48 = arith.constant dense<0.000000e+00> : vector<4x20xf32>
    %96 = tpu.matmul %94, %95, %cst_48 {dimension_numbers = #tpu.dot_dimension_numbers<[1], [0], [0], [1], [0, 0, 1, 1], [], []>} : vector<4x128xbf16>, vector<128x20xbf16>, vector<4x20xf32> -> vector<4x20xf32>
    %c7 = arith.constant 7 : index
    %c0_49 = arith.constant 0 : index
    %97 = vector.load %arg8[%c7, %c0_49] : memref<16x256xf32, #tpu.memory_space<vmem>>, vector<1x20xf32>
    %98 = vector.broadcast %97 : vector<1x20xf32> to vector<4x20xf32>
    %99 = arith.addf %96, %98 : vector<4x20xf32>
    %100 = math.tanh %99 : vector<4x20xf32>
    %cst_50 = arith.constant 1.000000e+00 : f32
    %101 = vector.broadcast %cst_50 : f32 to vector<4x20xf32>
    %102 = arith.addf %100, %101 : vector<4x20xf32>
    %cst_51 = arith.constant 1.100000e+01 : f32
    %103 = vector.broadcast %cst_51 : f32 to vector<4x20xf32>
    %104 = arith.mulf %103, %102 : vector<4x20xf32>
    %cst_52 = arith.constant -2.000000e+01 : f32
    %105 = vector.broadcast %cst_52 : f32 to vector<4x20xf32>
    %106 = arith.addf %105, %104 : vector<4x20xf32>
    %107 = vector.extract_strided_slice %99 {offsets = [0, 0], sizes = [4, 1], strides = [1, 1]} : vector<4x20xf32> to vector<4x1xf32>
    %108 = vector.extract_strided_slice %99 {offsets = [0, 1], sizes = [4, 2], strides = [1, 1]} : vector<4x20xf32> to vector<4x2xf32>
    %109 = vector.extract_strided_slice %106 {offsets = [0, 3], sizes = [4, 2], strides = [1, 1]} : vector<4x20xf32> to vector<4x2xf32>
    %110 = vector.extract_strided_slice %99 {offsets = [0, 5], sizes = [4, 1], strides = [1, 1]} : vector<4x20xf32> to vector<4x1xf32>
    %111 = vector.extract_strided_slice %99 {offsets = [0, 6], sizes = [4, 2], strides = [1, 1]} : vector<4x20xf32> to vector<4x2xf32>
    %112 = vector.extract_strided_slice %106 {offsets = [0, 8], sizes = [4, 2], strides = [1, 1]} : vector<4x20xf32> to vector<4x2xf32>
    %113 = vector.extract_strided_slice %99 {offsets = [0, 10], sizes = [4, 1], strides = [1, 1]} : vector<4x20xf32> to vector<4x1xf32>
    %114 = vector.extract_strided_slice %99 {offsets = [0, 11], sizes = [4, 2], strides = [1, 1]} : vector<4x20xf32> to vector<4x2xf32>
    %115 = vector.extract_strided_slice %106 {offsets = [0, 13], sizes = [4, 2], strides = [1, 1]} : vector<4x20xf32> to vector<4x2xf32>
    %116 = vector.extract_strided_slice %99 {offsets = [0, 15], sizes = [4, 1], strides = [1, 1]} : vector<4x20xf32> to vector<4x1xf32>
    %117 = vector.extract_strided_slice %99 {offsets = [0, 16], sizes = [4, 2], strides = [1, 1]} : vector<4x20xf32> to vector<4x2xf32>
    %118 = vector.extract_strided_slice %106 {offsets = [0, 18], sizes = [4, 2], strides = [1, 1]} : vector<4x20xf32> to vector<4x2xf32>
    %119 = arith.maximumf %107, %110 : vector<4x1xf32>
    %120 = arith.maximumf %119, %113 : vector<4x1xf32>
    %121 = arith.maximumf %120, %116 : vector<4x1xf32>
    %122 = arith.subf %107, %121 : vector<4x1xf32>
    %123 = math.exp %122 : vector<4x1xf32>
    %124 = arith.subf %110, %121 : vector<4x1xf32>
    %125 = math.exp %124 : vector<4x1xf32>
    %126 = arith.subf %113, %121 : vector<4x1xf32>
    %127 = math.exp %126 : vector<4x1xf32>
    %128 = arith.subf %116, %121 : vector<4x1xf32>
    %129 = math.exp %128 : vector<4x1xf32>
    %130 = arith.addf %123, %125 : vector<4x1xf32>
    %131 = arith.addf %130, %127 : vector<4x1xf32>
    %132 = arith.addf %131, %129 : vector<4x1xf32>
    %133 = arith.mulf %3, %132 : vector<4x1xf32>
    %cst_53 = arith.constant 0.000000e+00 : f32
    %134 = vector.broadcast %cst_53 : f32 to vector<4x2xf32>
    %cst_54 = arith.constant 0.000000e+00 : f32
    %135 = vector.broadcast %cst_54 : f32 to vector<4x2xf32>
    %cst_55 = arith.constant 0.000000e+00 : f32
    %136 = vector.broadcast %cst_55 : f32 to vector<4x1xf32>
    %137 = arith.cmpf oge, %133, %136 : vector<4x1xf32>
    %138 = arith.cmpf olt, %133, %123 : vector<4x1xf32>
    %139 = arith.andi %137, %138 : vector<4x1xi1>
    %140 = arith.extui %139 : vector<4x1xi1> to vector<4x1xi32>
    %141 = arith.sitofp %140 : vector<4x1xi32> to vector<4x1xf32>
    %142 = vector.broadcast %141 : vector<4x1xf32> to vector<4x2xf32>
    %143 = arith.mulf %142, %108 : vector<4x2xf32>
    %144 = arith.addf %134, %143 : vector<4x2xf32>
    %145 = math.exp %109 : vector<4x2xf32>
    %146 = vector.broadcast %141 : vector<4x1xf32> to vector<4x2xf32>
    %147 = arith.mulf %146, %145 : vector<4x2xf32>
    %148 = arith.addf %135, %147 : vector<4x2xf32>
    %149 = arith.cmpf oge, %133, %123 : vector<4x1xf32>
    %150 = arith.cmpf olt, %133, %130 : vector<4x1xf32>
    %151 = arith.andi %149, %150 : vector<4x1xi1>
    %152 = arith.extui %151 : vector<4x1xi1> to vector<4x1xi32>
    %153 = arith.sitofp %152 : vector<4x1xi32> to vector<4x1xf32>
    %154 = vector.broadcast %153 : vector<4x1xf32> to vector<4x2xf32>
    %155 = arith.mulf %154, %111 : vector<4x2xf32>
    %156 = arith.addf %144, %155 : vector<4x2xf32>
    %157 = math.exp %112 : vector<4x2xf32>
    %158 = vector.broadcast %153 : vector<4x1xf32> to vector<4x2xf32>
    %159 = arith.mulf %158, %157 : vector<4x2xf32>
    %160 = arith.addf %148, %159 : vector<4x2xf32>
    %161 = arith.cmpf oge, %133, %130 : vector<4x1xf32>
    %162 = arith.cmpf olt, %133, %131 : vector<4x1xf32>
    %163 = arith.andi %161, %162 : vector<4x1xi1>
    %164 = arith.extui %163 : vector<4x1xi1> to vector<4x1xi32>
    %165 = arith.sitofp %164 : vector<4x1xi32> to vector<4x1xf32>
    %166 = vector.broadcast %165 : vector<4x1xf32> to vector<4x2xf32>
    %167 = arith.mulf %166, %114 : vector<4x2xf32>
    %168 = arith.addf %156, %167 : vector<4x2xf32>
    %169 = math.exp %115 : vector<4x2xf32>
    %170 = vector.broadcast %165 : vector<4x1xf32> to vector<4x2xf32>
    %171 = arith.mulf %170, %169 : vector<4x2xf32>
    %172 = arith.addf %160, %171 : vector<4x2xf32>
    %173 = arith.cmpf oge, %133, %131 : vector<4x1xf32>
    %174 = arith.extui %173 : vector<4x1xi1> to vector<4x1xi32>
    %175 = arith.sitofp %174 : vector<4x1xi32> to vector<4x1xf32>
    %176 = vector.broadcast %175 : vector<4x1xf32> to vector<4x2xf32>
    %177 = arith.mulf %176, %117 : vector<4x2xf32>
    %178 = arith.addf %168, %177 : vector<4x2xf32>
    %179 = math.exp %118 : vector<4x2xf32>
    %180 = vector.broadcast %175 : vector<4x1xf32> to vector<4x2xf32>
    %181 = arith.mulf %180, %179 : vector<4x2xf32>
    %182 = arith.addf %172, %181 : vector<4x2xf32>
    %183 = arith.mulf %182, %2 : vector<4x2xf32>
    %184 = arith.addf %178, %183 : vector<4x2xf32>
    %185 = arith.subf %184, %108 : vector<4x2xf32>
    %cst_56 = arith.constant 0.000000e+00 : f32
    %186 = vector.broadcast %cst_56 : f32 to vector<4x2xf32>
    %187 = arith.subf %186, %109 : vector<4x2xf32>
    %188 = math.exp %187 : vector<4x2xf32>
    %189 = arith.mulf %185, %188 : vector<4x2xf32>
    %190 = arith.mulf %189, %189 : vector<4x2xf32>
    %cst_57 = arith.constant dense<0.000000e+00> : vector<4xf32>
    %191 = vector.multi_reduction <add>, %190, %cst_57 [1] : vector<4x2xf32> to vector<4xf32>
    %192 = vector.shape_cast %191 : vector<4xf32> to vector<4x1xf32>
    %cst_58 = arith.constant -5.000000e-01 : f32
    %193 = vector.broadcast %cst_58 : f32 to vector<4x1xf32>
    %194 = arith.mulf %193, %192 : vector<4x1xf32>
    %cst_59 = arith.constant dense<0.000000e+00> : vector<4xf32>
    %195 = vector.multi_reduction <add>, %109, %cst_59 [1] : vector<4x2xf32> to vector<4xf32>
    %196 = vector.shape_cast %195 : vector<4xf32> to vector<4x1xf32>
    %cst_60 = arith.constant 1.83787704 : f32
    %197 = vector.broadcast %cst_60 : f32 to vector<4x1xf32>
    %198 = arith.addf %196, %197 : vector<4x1xf32>
    %199 = arith.subf %194, %198 : vector<4x1xf32>
    %200 = arith.addf %199, %107 : vector<4x1xf32>
    %201 = arith.subf %184, %111 : vector<4x2xf32>
    %cst_61 = arith.constant 0.000000e+00 : f32
    %202 = vector.broadcast %cst_61 : f32 to vector<4x2xf32>
    %203 = arith.subf %202, %112 : vector<4x2xf32>
    %204 = math.exp %203 : vector<4x2xf32>
    %205 = arith.mulf %201, %204 : vector<4x2xf32>
    %206 = arith.mulf %205, %205 : vector<4x2xf32>
    %cst_62 = arith.constant dense<0.000000e+00> : vector<4xf32>
    %207 = vector.multi_reduction <add>, %206, %cst_62 [1] : vector<4x2xf32> to vector<4xf32>
    %208 = vector.shape_cast %207 : vector<4xf32> to vector<4x1xf32>
    %cst_63 = arith.constant -5.000000e-01 : f32
    %209 = vector.broadcast %cst_63 : f32 to vector<4x1xf32>
    %210 = arith.mulf %209, %208 : vector<4x1xf32>
    %cst_64 = arith.constant dense<0.000000e+00> : vector<4xf32>
    %211 = vector.multi_reduction <add>, %112, %cst_64 [1] : vector<4x2xf32> to vector<4xf32>
    %212 = vector.shape_cast %211 : vector<4xf32> to vector<4x1xf32>
    %cst_65 = arith.constant 1.83787704 : f32
    %213 = vector.broadcast %cst_65 : f32 to vector<4x1xf32>
    %214 = arith.addf %212, %213 : vector<4x1xf32>
    %215 = arith.subf %210, %214 : vector<4x1xf32>
    %216 = arith.addf %215, %110 : vector<4x1xf32>
    %217 = arith.subf %184, %114 : vector<4x2xf32>
    %cst_66 = arith.constant 0.000000e+00 : f32
    %218 = vector.broadcast %cst_66 : f32 to vector<4x2xf32>
    %219 = arith.subf %218, %115 : vector<4x2xf32>
    %220 = math.exp %219 : vector<4x2xf32>
    %221 = arith.mulf %217, %220 : vector<4x2xf32>
    %222 = arith.mulf %221, %221 : vector<4x2xf32>
    %cst_67 = arith.constant dense<0.000000e+00> : vector<4xf32>
    %223 = vector.multi_reduction <add>, %222, %cst_67 [1] : vector<4x2xf32> to vector<4xf32>
    %224 = vector.shape_cast %223 : vector<4xf32> to vector<4x1xf32>
    %cst_68 = arith.constant -5.000000e-01 : f32
    %225 = vector.broadcast %cst_68 : f32 to vector<4x1xf32>
    %226 = arith.mulf %225, %224 : vector<4x1xf32>
    %cst_69 = arith.constant dense<0.000000e+00> : vector<4xf32>
    %227 = vector.multi_reduction <add>, %115, %cst_69 [1] : vector<4x2xf32> to vector<4xf32>
    %228 = vector.shape_cast %227 : vector<4xf32> to vector<4x1xf32>
    %cst_70 = arith.constant 1.83787704 : f32
    %229 = vector.broadcast %cst_70 : f32 to vector<4x1xf32>
    %230 = arith.addf %228, %229 : vector<4x1xf32>
    %231 = arith.subf %226, %230 : vector<4x1xf32>
    %232 = arith.addf %231, %113 : vector<4x1xf32>
    %233 = arith.subf %184, %117 : vector<4x2xf32>
    %cst_71 = arith.constant 0.000000e+00 : f32
    %234 = vector.broadcast %cst_71 : f32 to vector<4x2xf32>
    %235 = arith.subf %234, %118 : vector<4x2xf32>
    %236 = math.exp %235 : vector<4x2xf32>
    %237 = arith.mulf %233, %236 : vector<4x2xf32>
    %238 = arith.mulf %237, %237 : vector<4x2xf32>
    %cst_72 = arith.constant dense<0.000000e+00> : vector<4xf32>
    %239 = vector.multi_reduction <add>, %238, %cst_72 [1] : vector<4x2xf32> to vector<4xf32>
    %240 = vector.shape_cast %239 : vector<4xf32> to vector<4x1xf32>
    %cst_73 = arith.constant -5.000000e-01 : f32
    %241 = vector.broadcast %cst_73 : f32 to vector<4x1xf32>
    %242 = arith.mulf %241, %240 : vector<4x1xf32>
    %cst_74 = arith.constant dense<0.000000e+00> : vector<4xf32>
    %243 = vector.multi_reduction <add>, %118, %cst_74 [1] : vector<4x2xf32> to vector<4xf32>
    %244 = vector.shape_cast %243 : vector<4xf32> to vector<4x1xf32>
    %cst_75 = arith.constant 1.83787704 : f32
    %245 = vector.broadcast %cst_75 : f32 to vector<4x1xf32>
    %246 = arith.addf %244, %245 : vector<4x1xf32>
    %247 = arith.subf %242, %246 : vector<4x1xf32>
    %248 = arith.addf %247, %116 : vector<4x1xf32>
    %249 = arith.maximumf %200, %216 : vector<4x1xf32>
    %250 = arith.maximumf %249, %232 : vector<4x1xf32>
    %251 = arith.maximumf %250, %248 : vector<4x1xf32>
    %cst_76 = arith.constant 0.000000e+00 : f32
    %252 = vector.broadcast %cst_76 : f32 to vector<4x1xf32>
    %253 = arith.subf %200, %251 : vector<4x1xf32>
    %254 = math.exp %253 : vector<4x1xf32>
    %255 = arith.addf %252, %254 : vector<4x1xf32>
    %256 = arith.subf %216, %251 : vector<4x1xf32>
    %257 = math.exp %256 : vector<4x1xf32>
    %258 = arith.addf %255, %257 : vector<4x1xf32>
    %259 = arith.subf %232, %251 : vector<4x1xf32>
    %260 = math.exp %259 : vector<4x1xf32>
    %261 = arith.addf %258, %260 : vector<4x1xf32>
    %262 = arith.subf %248, %251 : vector<4x1xf32>
    %263 = math.exp %262 : vector<4x1xf32>
    %264 = arith.addf %261, %263 : vector<4x1xf32>
    %265 = math.log %264 : vector<4x1xf32>
    %266 = arith.addf %265, %251 : vector<4x1xf32>
    %267 = math.log %132 : vector<4x1xf32>
    %268 = arith.addf %267, %121 : vector<4x1xf32>
    %269 = arith.subf %266, %268 : vector<4x1xf32>
    %270 = math.tanh %178 : vector<4x2xf32>
    %271 = math.tanh %184 : vector<4x2xf32>
    %272 = arith.mulf %271, %271 : vector<4x2xf32>
    %cst_77 = arith.constant 1.000000e+00 : f32
    %273 = vector.broadcast %cst_77 : f32 to vector<4x2xf32>
    %274 = arith.subf %273, %272 : vector<4x2xf32>
    %cst_78 = arith.constant 0.000000e+00 : f32
    %cst_79 = arith.constant 1.000000e+00 : f32
    %275 = vector.broadcast %cst_78 : f32 to vector<4x2xf32>
    %276 = arith.maximumf %275, %274 : vector<4x2xf32>
    %277 = vector.broadcast %cst_79 : f32 to vector<4x2xf32>
    %278 = arith.minimumf %277, %276 : vector<4x2xf32>
    %cst_80 = arith.constant 9.99999997E-7 : f32
    %279 = vector.broadcast %cst_80 : f32 to vector<4x2xf32>
    %280 = arith.addf %278, %279 : vector<4x2xf32>
    %281 = math.log %280 : vector<4x2xf32>
    %cst_81 = arith.constant dense<0.000000e+00> : vector<4xf32>
    %282 = vector.multi_reduction <add>, %281, %cst_81 [1] : vector<4x2xf32> to vector<4xf32>
    %283 = vector.shape_cast %282 : vector<4xf32> to vector<4x1xf32>
    %284 = arith.subf %269, %283 : vector<4x1xf32>
    %285 = arith.truncf %53 : vector<4x128xf32> to vector<4x128xbf16>
    %c864 = arith.constant 864 : index
    %c0_82 = arith.constant 0 : index
    %286 = vector.load %arg7[%c864, %c0_82] : memref<1408x256xbf16, #tpu.memory_space<vmem>>, vector<128x256xbf16>
    %cst_83 = arith.constant dense<0.000000e+00> : vector<4x256xf32>
    %287 = tpu.matmul %285, %286, %cst_83 {dimension_numbers = #tpu.dot_dimension_numbers<[1], [0], [0], [1], [0, 0, 1, 1], [], []>} : vector<4x128xbf16>, vector<128x256xbf16>, vector<4x256xf32> -> vector<4x256xf32>
    %c992 = arith.constant 992 : index
    %c0_84 = arith.constant 0 : index
    %288 = vector.load %arg7[%c992, %c0_84] : memref<1408x256xbf16, #tpu.memory_space<vmem>>, vector<8x256xbf16>
    %cst_85 = arith.constant dense<0.000000e+00> : vector<4x256xf32>
    %289 = tpu.matmul %54, %288, %cst_85 {dimension_numbers = #tpu.dot_dimension_numbers<[1], [0], [0], [1], [0, 0, 1, 1], [], []>} : vector<4x8xbf16>, vector<8x256xbf16>, vector<4x256xf32> -> vector<4x256xf32>
    %290 = arith.addf %287, %289 : vector<4x256xf32>
    %c8 = arith.constant 8 : index
    %c0_86 = arith.constant 0 : index
    %291 = vector.load %arg8[%c8, %c0_86] : memref<16x256xf32, #tpu.memory_space<vmem>>, vector<1x256xf32>
    %292 = vector.broadcast %291 : vector<1x256xf32> to vector<4x256xf32>
    %293 = arith.addf %290, %292 : vector<4x256xf32>
    %c1008 = arith.constant 1008 : index
    %c0_87 = arith.constant 0 : index
    %294 = vector.load %arg7[%c1008, %c0_87] : memref<1408x256xbf16, #tpu.memory_space<vmem>>, vector<2x256xbf16>
    %295 = arith.truncf %271 : vector<4x2xf32> to vector<4x2xbf16>
    %cst_88 = arith.constant dense<0.000000e+00> : vector<4x256xf32>
    %296 = tpu.matmul %295, %294, %cst_88 {dimension_numbers = #tpu.dot_dimension_numbers<[1], [0], [0], [1], [0, 0, 1, 1], [], []>} : vector<4x2xbf16>, vector<2x256xbf16>, vector<4x256xf32> -> vector<4x256xf32>
    %297 = arith.addf %293, %296 : vector<4x256xf32>
    %cst_89 = arith.constant 0.00999999977 : f32
    %298 = vector.broadcast %cst_89 : f32 to vector<4x256xf32>
    %299 = arith.mulf %298, %297 : vector<4x256xf32>
    %300 = arith.maximumf %297, %299 : vector<4x256xf32>
    %301 = arith.truncf %4 : vector<4x2xf32> to vector<4x2xbf16>
    %cst_90 = arith.constant dense<0.000000e+00> : vector<4x256xf32>
    %302 = tpu.matmul %301, %294, %cst_90 {dimension_numbers = #tpu.dot_dimension_numbers<[1], [0], [0], [1], [0, 0, 1, 1], [], []>} : vector<4x2xbf16>, vector<2x256xbf16>, vector<4x256xf32> -> vector<4x256xf32>
    %303 = arith.addf %293, %302 : vector<4x256xf32>
    %cst_91 = arith.constant 0.00999999977 : f32
    %304 = vector.broadcast %cst_91 : f32 to vector<4x256xf32>
    %305 = arith.mulf %304, %303 : vector<4x256xf32>
    %306 = arith.maximumf %303, %305 : vector<4x256xf32>
    %307 = tpu.concatenate %300, %306 in 0 : vector<4x256xf32>, vector<4x256xf32> -> vector<8x256xf32>
    %c1024 = arith.constant 1024 : index
    %c0_92 = arith.constant 0 : index
    %308 = vector.load %arg7[%c1024, %c0_92] : memref<1408x256xbf16, #tpu.memory_space<vmem>>, vector<128x256xbf16>
    %309 = arith.truncf %307 : vector<8x256xf32> to vector<8x256xbf16>
    %310 = vector.extract_strided_slice %309 {offsets = [0, 0], sizes = [8, 128], strides = [1, 1]} : vector<8x256xbf16> to vector<8x128xbf16>
    %311 = vector.extract_strided_slice %308 {offsets = [0, 0], sizes = [128, 128], strides = [1, 1]} : vector<128x256xbf16> to vector<128x128xbf16>
    %cst_93 = arith.constant dense<0.000000e+00> : vector<8x128xf32>
    %312 = tpu.matmul %310, %311, %cst_93 {dimension_numbers = #tpu.dot_dimension_numbers<[1], [0], [0], [1], [0, 0, 1, 1], [], []>} : vector<8x128xbf16>, vector<128x128xbf16>, vector<8x128xf32> -> vector<8x128xf32>
    %313 = vector.extract_strided_slice %309 {offsets = [0, 128], sizes = [8, 128], strides = [1, 1]} : vector<8x256xbf16> to vector<8x128xbf16>
    %314 = vector.extract_strided_slice %308 {offsets = [0, 128], sizes = [128, 128], strides = [1, 1]} : vector<128x256xbf16> to vector<128x128xbf16>
    %cst_94 = arith.constant dense<0.000000e+00> : vector<8x128xf32>
    %315 = tpu.matmul %313, %314, %cst_94 {dimension_numbers = #tpu.dot_dimension_numbers<[1], [0], [0], [1], [0, 0, 1, 1], [], []>} : vector<8x128xbf16>, vector<128x128xbf16>, vector<8x128xf32> -> vector<8x128xf32>
    %316 = tpu.concatenate %312, %315 in 1 : vector<8x128xf32>, vector<8x128xf32> -> vector<8x256xf32>
    %c9 = arith.constant 9 : index
    %c0_95 = arith.constant 0 : index
    %317 = vector.load %arg8[%c9, %c0_95] : memref<16x256xf32, #tpu.memory_space<vmem>>, vector<1x256xf32>
    %318 = vector.broadcast %317 : vector<1x256xf32> to vector<8x256xf32>
    %319 = arith.addf %316, %318 : vector<8x256xf32>
    %cst_96 = arith.constant 0.00999999977 : f32
    %320 = vector.broadcast %cst_96 : f32 to vector<8x256xf32>
    %321 = arith.mulf %320, %319 : vector<8x256xf32>
    %322 = arith.maximumf %319, %321 : vector<8x256xf32>
    %c1152 = arith.constant 1152 : index
    %c0_97 = arith.constant 0 : index
    %323 = vector.load %arg7[%c1152, %c0_97] : memref<1408x256xbf16, #tpu.memory_space<vmem>>, vector<128x256xbf16>
    %324 = arith.truncf %322 : vector<8x256xf32> to vector<8x256xbf16>
    %325 = vector.extract_strided_slice %324 {offsets = [0, 0], sizes = [8, 128], strides = [1, 1]} : vector<8x256xbf16> to vector<8x128xbf16>
    %326 = vector.extract_strided_slice %323 {offsets = [0, 0], sizes = [128, 128], strides = [1, 1]} : vector<128x256xbf16> to vector<128x128xbf16>
    %cst_98 = arith.constant dense<0.000000e+00> : vector<8x128xf32>
    %327 = tpu.matmul %325, %326, %cst_98 {dimension_numbers = #tpu.dot_dimension_numbers<[1], [0], [0], [1], [0, 0, 1, 1], [], []>} : vector<8x128xbf16>, vector<128x128xbf16>, vector<8x128xf32> -> vector<8x128xf32>
    %328 = vector.extract_strided_slice %324 {offsets = [0, 128], sizes = [8, 128], strides = [1, 1]} : vector<8x256xbf16> to vector<8x128xbf16>
    %329 = vector.extract_strided_slice %323 {offsets = [0, 128], sizes = [128, 128], strides = [1, 1]} : vector<128x256xbf16> to vector<128x128xbf16>
    %cst_99 = arith.constant dense<0.000000e+00> : vector<8x128xf32>
    %330 = tpu.matmul %328, %329, %cst_99 {dimension_numbers = #tpu.dot_dimension_numbers<[1], [0], [0], [1], [0, 0, 1, 1], [], []>} : vector<8x128xbf16>, vector<128x128xbf16>, vector<8x128xf32> -> vector<8x128xf32>
    %331 = tpu.concatenate %327, %330 in 1 : vector<8x128xf32>, vector<8x128xf32> -> vector<8x256xf32>
    %c10 = arith.constant 10 : index
    %c0_100 = arith.constant 0 : index
    %332 = vector.load %arg8[%c10, %c0_100] : memref<16x256xf32, #tpu.memory_space<vmem>>, vector<1x256xf32>
    %333 = vector.broadcast %332 : vector<1x256xf32> to vector<8x256xf32>
    %334 = arith.addf %331, %333 : vector<8x256xf32>
    %cst_101 = arith.constant 0.00999999977 : f32
    %335 = vector.broadcast %cst_101 : f32 to vector<8x256xf32>
    %336 = arith.mulf %335, %334 : vector<8x256xf32>
    %337 = arith.maximumf %334, %336 : vector<8x256xf32>
    %c1280 = arith.constant 1280 : index
    %c0_102 = arith.constant 0 : index
    %338 = vector.load %arg7[%c1280, %c0_102] : memref<1408x256xbf16, #tpu.memory_space<vmem>>, vector<128x256xbf16>
    %339 = arith.truncf %337 : vector<8x256xf32> to vector<8x256xbf16>
    %340 = vector.extract_strided_slice %339 {offsets = [0, 0], sizes = [8, 128], strides = [1, 1]} : vector<8x256xbf16> to vector<8x128xbf16>
    %341 = vector.extract_strided_slice %338 {offsets = [0, 0], sizes = [128, 128], strides = [1, 1]} : vector<128x256xbf16> to vector<128x128xbf16>
    %cst_103 = arith.constant dense<0.000000e+00> : vector<8x128xf32>
    %342 = tpu.matmul %340, %341, %cst_103 {dimension_numbers = #tpu.dot_dimension_numbers<[1], [0], [0], [1], [0, 0, 1, 1], [], []>} : vector<8x128xbf16>, vector<128x128xbf16>, vector<8x128xf32> -> vector<8x128xf32>
    %343 = vector.extract_strided_slice %339 {offsets = [0, 128], sizes = [8, 128], strides = [1, 1]} : vector<8x256xbf16> to vector<8x128xbf16>
    %344 = vector.extract_strided_slice %338 {offsets = [0, 128], sizes = [128, 128], strides = [1, 1]} : vector<128x256xbf16> to vector<128x128xbf16>
    %cst_104 = arith.constant dense<0.000000e+00> : vector<8x128xf32>
    %345 = tpu.matmul %343, %344, %cst_104 {dimension_numbers = #tpu.dot_dimension_numbers<[1], [0], [0], [1], [0, 0, 1, 1], [], []>} : vector<8x128xbf16>, vector<128x128xbf16>, vector<8x128xf32> -> vector<8x128xf32>
    %346 = tpu.concatenate %342, %345 in 1 : vector<8x128xf32>, vector<8x128xf32> -> vector<8x256xf32>
    %c11 = arith.constant 11 : index
    %c0_105 = arith.constant 0 : index
    %347 = vector.load %arg8[%c11, %c0_105] : memref<16x256xf32, #tpu.memory_space<vmem>>, vector<1x256xf32>
    %348 = vector.broadcast %347 : vector<1x256xf32> to vector<8x256xf32>
    %349 = arith.addf %346, %348 : vector<8x256xf32>
    %cst_106 = arith.constant 0.00999999977 : f32
    %350 = vector.broadcast %cst_106 : f32 to vector<8x256xf32>
    %351 = arith.mulf %350, %349 : vector<8x256xf32>
    %352 = arith.maximumf %349, %351 : vector<8x256xf32>
    %c13 = arith.constant 13 : index
    %c0_107 = arith.constant 0 : index
    %353 = vector.load %arg8[%c13, %c0_107] : memref<16x256xf32, #tpu.memory_space<vmem>>, vector<1x256xf32>
    %354 = vector.broadcast %353 : vector<1x256xf32> to vector<8x256xf32>
    %355 = arith.mulf %352, %354 : vector<8x256xf32>
    %c12 = arith.constant 12 : index
    %c0_108 = arith.constant 0 : index
    %356 = vector.load %arg8[%c12, %c0_108] : memref<16x256xf32, #tpu.memory_space<vmem>>, vector<1x2xf32>
    %357 = vector.extract_strided_slice %355 {offsets = [0, 0], sizes = [8, 128], strides = [1, 1]} : vector<8x256xf32> to vector<8x128xf32>
    %cst_109 = arith.constant dense<0.000000e+00> : vector<8xf32>
    %358 = vector.multi_reduction <add>, %357, %cst_109 [1] : vector<8x128xf32> to vector<8xf32>
    %359 = vector.shape_cast %358 : vector<8xf32> to vector<8x1xf32>
    %360 = vector.extract_strided_slice %356 {offsets = [0, 0], sizes = [1, 1], strides = [1, 1]} : vector<1x2xf32> to vector<1x1xf32>
    %361 = vector.broadcast %360 : vector<1x1xf32> to vector<8x1xf32>
    %362 = arith.addf %359, %361 : vector<8x1xf32>
    %363 = vector.extract_strided_slice %355 {offsets = [0, 128], sizes = [8, 128], strides = [1, 1]} : vector<8x256xf32> to vector<8x128xf32>
    %cst_110 = arith.constant dense<0.000000e+00> : vector<8xf32>
    %364 = vector.multi_reduction <add>, %363, %cst_110 [1] : vector<8x128xf32> to vector<8xf32>
    %365 = vector.shape_cast %364 : vector<8xf32> to vector<8x1xf32>
    %366 = vector.extract_strided_slice %356 {offsets = [0, 1], sizes = [1, 1], strides = [1, 1]} : vector<1x2xf32> to vector<1x1xf32>
    %367 = vector.broadcast %366 : vector<1x1xf32> to vector<8x1xf32>
    %368 = arith.addf %365, %367 : vector<8x1xf32>
    %369 = vector.extract_strided_slice %362 {offsets = [0, 0], sizes = [4, 1], strides = [1, 1]} : vector<8x1xf32> to vector<4x1xf32>
    %370 = vector.extract_strided_slice %368 {offsets = [0, 0], sizes = [4, 1], strides = [1, 1]} : vector<8x1xf32> to vector<4x1xf32>
    %371 = vector.extract_strided_slice %362 {offsets = [4, 0], sizes = [4, 1], strides = [1, 1]} : vector<8x1xf32> to vector<4x1xf32>
    %372 = vector.extract_strided_slice %368 {offsets = [4, 0], sizes = [4, 1], strides = [1, 1]} : vector<8x1xf32> to vector<4x1xf32>
    %cst_111 = arith.constant 0.000000e+00 : f32
    %373 = vector.broadcast %cst_111 : f32 to vector<4x7xf32>
    %374 = tpu.concatenate %270, %271, %284, %371, %372, %369, %370, %373 in 1 : vector<4x2xf32>, vector<4x2xf32>, vector<4x1xf32>, vector<4x1xf32>, vector<4x1xf32>, vector<4x1xf32>, vector<4x1xf32>, vector<4x7xf32> -> vector<4x16xf32>
    %c0_112 = arith.constant 0 : index
    %c0_113 = arith.constant 0 : index
    %375 = vector.load %arg9[%c0_112, %c0_113] : memref<4x16xf32, #tpu.memory_space<vmem>>, vector<4x16xf32>
    tpu.vector_store %arg9[%c0_112, %c0_113], %374 {strides = array<i32>} : memref<4x16xf32, #tpu.memory_space<vmem>>, vector<4x16xf32>,
    return
  }
  func.func @transform_0(%arg0: i32) -> (i32, i32) {
    %c0_i32 = arith.constant 0 : i32
    %c0_i32_0 = arith.constant 0 : i32
    return %arg0, %c0_i32 : i32, i32
  }
  func.func @transform_1(%arg0: i32) -> (i32, i32) {
    %c0_i32 = arith.constant 0 : i32
    %c0_i32_0 = arith.constant 0 : i32
    return %arg0, %c0_i32 : i32, i32
  }
  func.func @transform_2(%arg0: i32) -> (i32, i32) {
    %c0_i32 = arith.constant 0 : i32
    %c0_i32_0 = arith.constant 0 : i32
    return %arg0, %c0_i32 : i32, i32
  }
  func.func @transform_3(%arg0: i32) -> (i32, i32) {
    %c0_i32 = arith.constant 0 : i32
    %c0_i32_0 = arith.constant 0 : i32
    return %arg0, %c0_i32 : i32, i32
  }
  func.func @transform_4(%arg0: i32) -> (i32, i32) {
    %c0_i32 = arith.constant 0 : i32
    %c0_i32_0 = arith.constant 0 : i32
    return %arg0, %c0_i32 : i32, i32
  }
  func.func @transform_5(%arg0: i32) -> i32 {
    %c0_i32 = arith.constant 0 : i32
    %c0_i32_0 = arith.constant 0 : i32
    return %c0_i32 : i32
  }
  func.func @transform_6(%arg0: i32) -> (i32, i32) {
    %c0_i32 = arith.constant 0 : i32
    %c0_i32_0 = arith.constant 0 : i32
    %c0_i32_1 = arith.constant 0 : i32
    return %c0_i32, %c0_i32_0 : i32, i32
  }
  func.func @transform_7(%arg0: i32) -> (i32, i32) {
    %c0_i32 = arith.constant 0 : i32
    %c0_i32_0 = arith.constant 0 : i32
    %c0_i32_1 = arith.constant 0 : i32
    return %c0_i32, %c0_i32_0 : i32, i32
  }
  func.func @transform_8(%arg0: i32) -> (i32, i32) {
    %c0_i32 = arith.constant 0 : i32
    %c0_i32_0 = arith.constant 0 : i32
    return %arg0, %c0_i32 : i32, i32
  }
}

</mosaic_0001>

<bundles_post_ra>
// kernel: tpu_custom_call.1
= control target key start
LH: loop header
LB: loop body
LE: loop exit
PB: predicated region body
PF: predicated region fallthrough
CT: control target
= control target key end

     0   :  { %13 = vsyncpa [#allocation5], 0  ;;  %s8087_s0 = inlined_call_operand.vmem [shape: f32[384,6], index: 0, kind: input, shape index: {}]   ;;  %s8088_s1 = inlined_call_operand.vmem [shape: f32[4,8], index: 1, kind: input, shape index: {}]   ;;  %s8089_s2 = inlined_call_operand.vmem [shape: f32[4,2], index: 2, kind: input, shape index: {}]   ;;  %s8090_s3 = inlined_call_operand.vmem [shape: f32[4,1], index: 3, kind: input, shape index: {}]   ;;  %s8091_s4 = inlined_call_operand.vmem [shape: f32[4,2], index: 4, kind: input, shape index: {}]   ;;  %s8092_s5 = inlined_call_operand.vmem [shape: f32[2], index: 5, kind: input, shape index: {}]   ;;  %s8093_s6 = inlined_call_operand.hbm [shape: bf16[1408,256], index: 6, kind: input, shape index: {}]   ;;  %s8094_s7 = inlined_call_operand.vmem [shape: f32[16,256], index: 7, kind: input, shape index: {}]   ;;  %s8095_s8 = inlined_call_operand.hbm [shape: f32[4,16], index: 8, kind: output, shape index: {}]  }
   0x1   :  { %14 = vsyncpa [#allocation3], 0 }
   0x2   :  { %15 = vsyncpa [#allocation4], 0  ;;  %s32_s29 = sshll.u32 %s8092_s5, 4  ;;  %s33_s29 = int_to_ptr.vmem [resolvable:$true] %s32_s29 }
   0x3   :  { %s6063_s30 = scalar_lea.vmem %s33_s29, 16  ;;  %p6068_p1 = scmp.lt.s32.totalorder %s33_s29, %s33_s29 }
   0x4   :  { %p6064_p0 = scmp.ne.s32.totalorder %s33_s29, %s6063_s30  ;;  %p6069_p2 = scmp.lt.s32.totalorder %s6063_s30, %s6063_s30 }
   0x6   :  { %p6070_p3 = por %p6069_p2, %p6068_p1 }
   0x8   :  { %p6071_p4 = pnand %p6070_p3, %p6064_p0 }
   0xa   :  { %6074 = shalt.err (!%p6071_p4)
}
   0xb   :  { %s6125_s9 = smov [#allocation2]   ;;  %s6126_s10 = smov [#allocation6]  }
   0xc   :  { %35 = dma.vmem_to_smem %s33_s29, 16, %s6125_s9, [#allocation5]  }
   0xd   :  { %s41_s11 = sshll.u32 %s6126_s10, 4  ;;  %s6075_s14 = scalar_lea.hbm %s8093_s6, 22528  ;;  %s42_s11 = int_to_ptr.vmem [resolvable:$true] %s41_s11 }
   0xe   :  { %p6076_p5 = scmp.ne.s32.totalorder %s8093_s6, %s6075_s14  ;;  %p6079_p6 = scmp.lt.u32.totalorder %s6075_s14, %s8093_s6 }
  0x10   :  { %p6081_p7 = pnand %p6079_p6, %p6076_p5 }
  0x12   :  { %6084 = shalt.err (!%p6081_p7)
}
  0x13   :  { %s6085_s18 = scalar_lea.vmem %s42_s11, 22528  ;;  %p6090_p9 = scmp.lt.s32.totalorder %s42_s11, %s42_s11 }
  0x14   :  { %p6086_p8 = scmp.ne.s32.totalorder %s42_s11, %s6085_s18  ;;  %p6091_p10 = scmp.lt.s32.totalorder %s6085_s18, %s6085_s18 }
  0x16   :  { %p6092_p11 = por %p6091_p10, %p6090_p9 }
  0x18   :  { %p6093_p12 = pnand %p6092_p11, %p6086_p8 }
  0x1a   :  { %6096 = shalt.err (!%p6093_p12)
}
  0x1b   :  { %s6127_s19 = smov 128   ;;  %s6128_s20 = smov 8  }
  0x1c   :  { %47 = dma.hbm_to_vmem [thread:$0]  %s8093_s6, 22528, %s42_s11, [#allocation3], %s6127_s19, %s6127_s19, %s6128_s20  }
  0x1d   :  { %6119 = dma.done.wait [#allocation5], 16  }
  0x1e   :  { %6120 = vsyncadd [#allocation5], 4294967280 }
  0x1f   :  { %6121 = dma.done.wait [#allocation3], 22528  }
  0x20   :  { %6122 = vsyncadd [#allocation3], 4294944768 }
  0x21   :  { %56 = sfence }
  0x22   :  { %v58_v0 = vld [vmem:[%s8087_s0] sm:$0xff]  ;;  %v59_v1 = vld [vmem:[%s8087_s0 + $0x8] sm:$0xff]  ;;  %s4686_s27 = sld [smem:[#allocation2 + $0x1]]  ;;  %v60_v3 = vld [vmem:[%s8087_s0 + $0x10] sm:$0xff]  ;;  %s6129_s9 = smov 6   ;;  %vm1232_vm0 = vcmask 1045504  }
  0x23   :  { %v5396_v2 = vpack.i.bf16 %v59_v1, %v58_v0  ;;  %v61_v4 = vld [vmem:[%s8087_s0 + $0x18] sm:$0xff]  ;;  %v62_v6 = vld [vmem:[%s8087_s0 + $0x20] sm:$0xff]  ;;  %v63_v7 = vld [vmem:[%s8087_s0 + $0x28] sm:$0xff]  ;;  %s6359_s24 = sld [smem:[#allocation2]]  ;;  %vm882_vm1 = vcmask 15360   ;;  %vm931_vm2 = vcmask 23552  }
  0x24   :  { %v5401_v5 = vpack.i.bf16 %v61_v4, %v60_v3  ;;  %v5416_v9 = vpack.i.bf16 %v63_v7, %v62_v6  ;;  %v64_v18 = vld [vmem:[%s8087_s0 + $0x30] sm:$0xff]  ;;  %v65_v19 = vld [vmem:[%s8087_s0 + $0x38] sm:$0xff]  ;;  %v6253_v26 = vld [vmem:[%s8087_s0 + $0x40] sm:$0xff]  ;;  %vm980_vm3 = vcmask 48128   ;;  %vm1029_vm4 = vcmask 64512   ;;  %s6133_s15 = smov 118  }
  0x25   :  { %5397 = vrot.lane.b32.xlu0 %v5396_v2, %s6129_s9  ;;  %v67_v27 = vld [vmem:[%s8087_s0 + $0x48] sm:$0xff]  ;;  %v6261_v30 = vld [vmem:[%s8087_s0 + $0x50] sm:$0xff]  ;;  %v6266_v32 = vld [vmem:[%s8087_s0 + $0x58] sm:$0xff]  ;;  %v5421_v51 = vpack.i.bf16 %v65_v19, %v64_v18  ;;  %vm1078_vm5 = vcmask 72704   ;;  %vm1159_vm6 = vcmask 97280   ;;  %vm1614_vm7 = vcmask 523264  }
  0x26   :  { %v6278_v39 = vld [vmem:[%s8087_s0 + $0x60] sm:$0xff]  ;;  %v6284_v46 = vld [vmem:[%s8087_s0 + $0x68] sm:$0xff]  ;;  %v6289_v48 = vld [vmem:[%s8087_s0 + $0x70] sm:$0xff]  ;;  %vm2767_vm8 = vcmask 1043456   ;;  %vm6132_vm9 = vmmov 0   ;;  %vm2819_vm10 = vcmask 1041409  }
  0x27   :  { %v6294_v49 = vld [vmem:[%s8087_s0 + $0x78] sm:$0xff]  ;;  %v6308_v58 = vld [vmem:[%s8087_s0 + $0x80] sm:$0xff]  ;;  %v6314_v61 = vld [vmem:[%s8087_s0 + $0x88] sm:$0xff]  ;;  %vm2821_vm11 = vcmask 1042434   ;;  %vm2823_vm12 = vcmask 1043459   ;;  %s6134_s16 = smov 123  }
  0x28   :  { %v6232_v8 = vstv %s4686_s27  ;;  %s6135_s5 = smov 113   ;;  %s6136_s17 = smov 10  }
  0x29   :  { %5402 = vrot.lane.b32.xlu0 %v5401_v5, %s6129_s9  ;;  %v306_v10 = vadd.f32 %v6232_v8, %v58_v0  ;;  %v307_v11 = vadd.f32 %v6232_v8, %v59_v1  ;;  %v308_v12 = vadd.f32 %v6232_v8, %v60_v3  ;;  %v309_v15 = vadd.f32 %v6232_v8, %v61_v4  ;;  %v6321_v4 = vld [vmem:[%s8087_s0 + $0x90] sm:$0xff]  ;;  %v6326_v5 = vld [vmem:[%s8087_s0 + $0x98] sm:$0xff]  ;;  %s6137_s18 = smov 5   ;;  %s6138_s19 = smov 15  }
  0x2a   :  { %v310_v20 = vadd.f32 %v6232_v8, %v62_v6  ;;  %v311_v21 = vadd.f32 %v6232_v8, %v63_v7  ;;  %v312_v22 = vadd.f32 %v6232_v8, %v64_v18  ;;  %v313_v23 = vadd.f32 %v6232_v8, %v65_v19  ;;  %s6139_s22 = smov 3   ;;  %s6141_s23 = smov 121  }
  0x2b   :  { %v354_v13 = vmax.f32 %v306_v10, 1e-08  ;;  %v355_v14 = vmax.f32 %v307_v11, 1e-08  ;;  %v356_v16 = vmax.f32 %v308_v12, 1e-08  ;;  %v314_v33 = vadd.f32 %v6232_v8, %v6253_v26 }
  0x2c   :  { %v357_v17 = vmax.f32 %v309_v15, 1e-08  ;;  %v358_v24 = vmax.f32 %v310_v20, 1e-08  ;;  %v359_v25 = vmax.f32 %v311_v21, 1e-08  ;;  %v315_v35 = vadd.f32 %v6232_v8, %v67_v27 }
  0x2d   :  { %5417 = vrot.lane.b32.xlu0 %v5416_v9, %s6129_s9  ;;  %5807 = vrcp.f32 %v354_v13  ;;  %v360_v28 = vmax.f32 %v312_v22, 1e-08  ;;  %v361_v29 = vmax.f32 %v313_v23, 1e-08  ;;  %v316_v37 = vadd.f32 %v6232_v8, %v6261_v30  ;;  %v6352_v23 = vld [vmem:[%s8087_s0 + $0xa8] sm:$0xff]  ;;  %s6143_s25 = smov 127  }
  0x2e   :  { %5809 = vrcp.f32 %v355_v14  ;;  %v317_v38 = vadd.f32 %v6232_v8, %v6266_v32  ;;  %v362_v41 = vmax.f32 %v314_v33, 1e-08  ;;  %v363_v43 = vmax.f32 %v315_v35, 1e-08  ;;  %v6343_v14 = vld [vmem:[%s8087_s0 + $0xa0] sm:$0xff]  ;;  %s6144_s26 = smov 116  }
  0x2f   :  { %5811 = vrcp.f32 %v356_v16  ;;  %v364_v45 = vmax.f32 %v316_v37, 1e-08  ;;  %v318_v50 = vadd.f32 %v6232_v8, %v6278_v39  ;;  %v319_v52 = vadd.f32 %v6232_v8, %v6284_v46  ;;  %s6145_s27 = smov 120   ;;  %s6146_s28 = smov 115  }
  0x30   :  { %5813 = vrcp.f32 %v357_v17  ;;  %v365_v47 = vmax.f32 %v317_v38, 1e-08  ;;  %v320_v54 = vadd.f32 %v6232_v8, %v6289_v48  ;;  %v321_v57 = vadd.f32 %v6232_v8, %v6294_v49  ;;  %s6148_s29 = smov 125   ;;  %s6149_s14 = smov 4  }
  0x31   :  { %5815 = vrcp.f32 %v358_v24  ;;  %v366_v56 = vmax.f32 %v318_v50, 1e-08  ;;  %v367_v63 = vmax.f32 %v319_v52, 1e-08  ;;  %v5436_v1 = vpack.i.bf16 %v67_v27, %v6253_v26  ;;  %v6357_v24 = vld [vmem:[%s8087_s0 + $0xb0] sm:$0xff]  ;;  %v6364_v26 = vld [vmem:[%s8087_s0 + $0xb8] sm:$0xff] }
  0x32   :  { %5817 = vrcp.f32 %v359_v25  ;;  %v368_v2 = vmax.f32 %v320_v54, 1e-08  ;;  %v369_v3 = vmax.f32 %v321_v57, 1e-08  ;;  %v5441_v6 = vpack.i.bf16 %v6266_v32, %v6261_v30  ;;  %v6369_v27 = vld [vmem:[%s8087_s0 + $0xc0] sm:$0xff]  ;;  %v6379_v30 = vld [vmem:[%s8087_s0 + $0xc8] sm:$0xff] }
  0x33   :  { %5819 = vrcp.f32 %v360_v28  ;;  %v322_v7 = vadd.f32 %v6232_v8, %v6308_v58  ;;  %v323_v9 = vadd.f32 %v6232_v8, %v6314_v61  ;;  %v324_v11 = vadd.f32 %v6232_v8, %v6321_v4 }
  0x34   :  { %5821 = vrcp.f32 %v361_v29  ;;  %v325_v13 = vadd.f32 %v6232_v8, %v6326_v5  ;;  %v5456_v21 = vpack.i.bf16 %v6284_v46, %v6278_v39  ;;  %v5461_v28 = vpack.i.bf16 %v6294_v49, %v6289_v48  ;;  %v6406_v39 = vld [vmem:[%s8087_s0 + $0xe8] sm:$0xff] }
  0x35   :  { %5823 = vrcp.f32 %v362_v41  ;;  %v370_v17 = vmax.f32 %v322_v7, 1e-08  ;;  %v371_v19 = vmax.f32 %v323_v9, 1e-08  ;;  %v372_v22 = vmax.f32 %v324_v11, 1e-08 }
  0x36   :  { %5825 = vrcp.f32 %v363_v43  ;;  %v373_v25 = vmax.f32 %v325_v13, 1e-08  ;;  %v326_v29 = vadd.f32 %v6232_v8, %v6343_v14  ;;  %v327_v32 = vadd.f32 %v6232_v8, %v6352_v23 }
  0x37   :  { %v5808_v31 = vpop.eup %5807  ;;  %5827 = vrcp.f32 %v364_v45  ;;  %v328_v33 = vadd.f32 %v6232_v8, %v6357_v24  ;;  %v329_v38 = vadd.f32 %v6232_v8, %v6364_v26  ;;  %v330_v43 = vadd.f32 %v6232_v8, %v6369_v27  ;;  %v6419_v45 = vld [vmem:[%s8087_s0 + $0xf8] sm:$0xff] }
  0x38   :  { %v5810_v34 = vpop.eup %5809  ;;  %5829 = vrcp.f32 %v365_v47  ;;  %v375_v47 = vmax.f32 %v327_v32, 1e-08  ;;  %v331_v49 = vadd.f32 %v6232_v8, %v6379_v30  ;;  %v5476_v52 = vpack.i.bf16 %v6314_v61, %v6308_v58 }
  0x39   :  { %v5406_v36 = vpack.i.bf16 %v5810_v34, %v5808_v31  ;;  %v5812_v40 = vpop.eup %5811  ;;  %5831 = vrcp.f32 %v366_v56  ;;  %v6384_v31 = vld [vmem:[%s8087_s0 + $0xd0] sm:$0xff]  ;;  %v6393_v34 = vld [vmem:[%s8087_s0 + $0xd8] sm:$0xff]  ;;  %v376_v48 = vmax.f32 %v328_v33, 1e-08  ;;  %v6431_v54 = vstv %s6359_s24  ;;  %s6142_s24 = smov 111  }
  0x3a   :  { %v5814_v42 = vpop.eup %5813  ;;  %5833 = vrcp.f32 %v367_v63  ;;  %v332_v50 = vadd.f32 %v6232_v8, %v6384_v31  ;;  %v377_v56 = vmax.f32 %v329_v38, 1e-08  ;;  %v378_v58 = vmax.f32 %v330_v43, 1e-08 }
  0x3b   :  { %5407 = vrot.lane.b32.xlu1 %v5406_v36, %s6129_s9  ;;  %v5411_v44 = vpack.i.bf16 %v5814_v42, %v5812_v40  ;;  %v5816_v53 = vpop.eup %5815  ;;  %5835 = vrcp.f32 %v368_v2  ;;  %v6399_v36 = vld [vmem:[%s8087_s0 + $0xe0] sm:$0xff]  ;;  %v374_v42 = vmax.f32 %v326_v29, 1e-08  ;;  %v5521_v43 = vpack.i.bf16 %v6393_v34, %v6384_v31 }
  0x3c   :  { %v5818_v55 = vpop.eup %5817  ;;  %5837 = vrcp.f32 %v369_v3  ;;  %v334_v57 = vadd.f32 %v6232_v8, %v6399_v36  ;;  %v380_v63 = vmax.f32 %v332_v50, 1e-08 }
  0x3d   :  { %v5820_v59 = vpop.eup %5819  ;;  %v5426_v60 = vpack.i.bf16 %v5818_v55, %v5816_v53  ;;  %5839 = vrcp.f32 %v370_v17  ;;  %v333_v53 = vadd.f32 %v6232_v8, %v6393_v34  ;;  %v5481_v55 = vpack.i.bf16 %v6326_v5, %v6321_v4 }
  0x3e   :  { %v5822_v62 = vpop.eup %5821  ;;  %5841 = vrcp.f32 %v371_v19  ;;  %v382_v5 = vmax.f32 %v334_v57, 1e-08  ;;  %v6471_v19 = vld [vmem:[%s8087_s0 + $0x100] sm:$0xff]  ;;  %v6519_v57 = vld [vmem:[%s8087_s0 + $0x138] sm:$0xff] }
  0x3f   :  { %5412 = vrot.lane.b32.xlu1 %v5411_v44, %s6129_s9  ;;  %5427 = vrot.lane.b32.xlu0 %v5426_v60, %s6129_s9  ;;  %v5431_v0 = vpack.i.bf16 %v5822_v62, %v5820_v59  ;;  %v5824_v10 = vpop.eup %5823  ;;  %5843 = vrcp.f32 %v372_v22  ;;  %v6414_v44 = vld [vmem:[%s8087_s0 + $0xf0] sm:$0xff]  ;;  %v6440_v59 = vld [vmem:[%s8087_s0 + $0x108] sm:$0xff]  ;;  %v335_v60 = vadd.f32 %v6232_v8, %v6406_v39  ;;  %v379_v62 = vmax.f32 %v331_v49, 1e-08 }
  0x40   :  { %v5826_v12 = vpop.eup %5825  ;;  %5845 = vrcp.f32 %v373_v25  ;;  %v6447_v61 = vadd.f32 %v6232_v8, %v6414_v44  ;;  %v381_v2 = vmax.f32 %v333_v53, 1e-08  ;;  %v6456_v3 = vadd.f32 %v6431_v54, %v6440_v59  ;;  %v6484_v25 = vld [vmem:[%s8087_s0 + $0x118] sm:$0xff]  ;;  %v6504_v49 = vld [vmem:[%s8087_s0 + $0x128] sm:$0xff]  ;;  %v6512_v53 = vld [vmem:[%s8087_s0 + $0x120] sm:$0xff] }
  0x41   :  { %v5828_v15 = vpop.eup %5827  ;;  %v5446_v16 = vpack.i.bf16 %v5826_v12, %v5824_v10  ;;  %5847 = vrcp.f32 %v374_v42  ;;  %v383_v10 = vmax.f32 %v335_v60, 1e-08  ;;  %v145_v22 = vadd.f32 %v6431_v54, %v6471_v19 }
  0x42   :  { %v5830_v18 = vpop.eup %5829  ;;  %5849 = vrcp.f32 %v375_v47  ;;  %v384_v11 = vmax.f32 %v6447_v61, 1e-08  ;;  %v194_v17 = vmax.f32 %v6456_v3, 1e-08  ;;  %v148_v33 = vadd.f32 %v6431_v54, %v6484_v25 }
  0x43   :  { %5422 = vrot.lane.b32.xlu1 %v5421_v51, %s6129_s9  ;;  %5437 = vrot.lane.b32.xlu0 %v5436_v1, %s6129_s9  ;;  %v5451_v20 = vpack.i.bf16 %v5830_v18, %v5828_v15  ;;  %v5832_v35 = vpop.eup %5831  ;;  %5851 = vrcp.f32 %v376_v48  ;;  %v5501_v18 = vpack.i.bf16 %v6364_v26, %v6357_v24  ;;  %v193_v42 = vmax.f32 %v145_v22, 1e-08 }
  0x44   :  { %v5834_v37 = vpop.eup %5833  ;;  %5853 = vrcp.f32 %v377_v56  ;;  %v339_v48 = vadd.f32 %v6232_v8, %v6440_v59  ;;  %v341_v56 = vadd.f32 %v6232_v8, %v6484_v25  ;;  %v150_v61 = vadd.f32 %v6431_v54, %v6504_v49 }
  0x45   :  { %v5836_v40 = vpop.eup %5835  ;;  %v5466_v41 = vpack.i.bf16 %v5834_v37, %v5832_v35  ;;  %5855 = vrcp.f32 %v378_v58 }
  0x46   :  { %v5838_v46 = vpop.eup %5837  ;;  %5857 = vrcp.f32 %v379_v62  ;;  %v6527_v62 = vld [vmem:[%s8087_s0 + $0x130] sm:$0xff] }
  0x47   :  { %5432 = vrot.lane.b32.xlu1 %v5431_v0, %s6129_s9  ;;  %5447 = vrot.lane.b32.xlu0 %v5446_v16, %s6129_s9  ;;  %v5471_v51 = vpack.i.bf16 %v5838_v46, %v5836_v40  ;;  %v6451_v0 = vadd.f32 %v6232_v8, %v6419_v45  ;;  %v5840_v1 = vpop.eup %5839  ;;  %v5496_v16 = vpack.i.bf16 %v6352_v23, %v6343_v14  ;;  %5859 = vrcp.f32 %v380_v63  ;;  %v6477_v14 = vld [vmem:[%s8087_s0 + $0x110] sm:$0xff] }
  0x48   :  { %v5842_v4 = vpop.eup %5841  ;;  %5861 = vrcp.f32 %v381_v2  ;;  %v147_v37 = vadd.f32 %v6431_v54, %v6477_v14  ;;  %v5516_v40 = vpack.i.bf16 %v6379_v30, %v6369_v27  ;;  %v196_v46 = vmax.f32 %v148_v33, 1e-08  ;;  %v6571_v33 = vld [vmem:[%s8087_s0 + $0x150] sm:$0xff] }
  0x49   :  { %v5844_v7 = vpop.eup %5843  ;;  %v5486_v9 = vpack.i.bf16 %v5842_v4, %v5840_v1  ;;  %v385_v13 = vmax.f32 %v6451_v0, 1e-08  ;;  %5863 = vrcp.f32 %v382_v5  ;;  %v5536_v0 = vpack.i.bf16 %v6406_v39, %v6399_v36 }
  0x4a   :  { %v5846_v12 = vpop.eup %5845  ;;  %5865 = vrcp.f32 %v383_v10  ;;  %v195_v47 = vmax.f32 %v147_v37, 1e-08  ;;  %v387_v1 = vmax.f32 %v339_v48, 1e-08  ;;  %v149_v2 = vadd.f32 %v6431_v54, %v6512_v53 }
  0x4b   :  { %5442 = vrot.lane.b32.xlu1 %v5441_v6, %s6129_s9  ;;  %5457 = vrot.lane.b32.xlu0 %v5456_v21, %s6129_s9  ;;  %v5638_v6 = vld [vmem:[#allocation6] ss:$8 sps:$4 sm:$0x3f]   ;;  %v5491_v15 = vpack.i.bf16 %v5846_v12, %v5844_v7  ;;  %5867 = vrcp.f32 %v384_v11  ;;  %v152_v5 = vadd.f32 %v6431_v54, %v6519_v57  ;;  %v151_v7 = vadd.f32 %v6431_v54, %v6527_v62 }
  0x4c   :  { %5367 = vmatprep.subr.msk.bf16.mxu0 %vm1232_vm0, %v5638_v6  ;;  %5869 = vrcp.f32 %v385_v13  ;;  %v5541_v36 = vpack.i.bf16 %v6419_v45, %v6414_v44  ;;  %v342_v10 = vadd.f32 %v6232_v8, %v6512_v53  ;;  %v197_v11 = vmax.f32 %v149_v2, 1e-08  ;;  %v6551_v44 = vld [vmem:[%s8087_s0 + $0x140] sm:$0xff]  ;;  %v6556_v45 = vld [vmem:[%s8087_s0 + $0x148] sm:$0xff] }
  0x4d   :  { %5871 = vrcp.f32 %v194_v17  ;;  %v343_v12 = vadd.f32 %v6232_v8, %v6504_v49  ;;  %v5556_v37 = vpack.i.bf16 %v6440_v59, %v6471_v19  ;;  %v348_v2 = vadd.f32 %v6232_v8, %v6571_v33 }
  0x4e   :  { %5873 = vrcp.f32 %v193_v42 }
  0x4f   :  { %5452 = vrot.lane.b32.xlu1 %v5451_v20, %s6129_s9  ;;  %5467 = vrot.lane.b32.xlu0 %v5466_v41, %s6129_s9  ;;  %v5848_v20 = vpop.eup %5847  ;;  %v338_v41 = vadd.f32 %v6232_v8, %v6471_v19  ;;  %5875 = vrcp.f32 %v196_v46 }
  0x50   :  { %v5850_v21 = vpop.eup %5849  ;;  %5877 = vrcp.f32 %v195_v47 }
  0x51   :  { %v5852_v29 = vpop.eup %5851  ;;  %v5506_v32 = vpack.i.bf16 %v5850_v21, %v5848_v20  ;;  %v345_v20 = vadd.f32 %v6232_v8, %v6519_v57  ;;  %v6563_v21 = vld [vmem:[%s8087_s0 + $0x158] sm:$0xff] }
  0x52   :  { %v5854_v35 = vpop.eup %5853  ;;  %v156_v46 = vadd.f32 %v6431_v54, %v6563_v21 }
  0x53   :  { %5462 = vrot.lane.b32.xlu1 %v5461_v28, %s6129_s9  ;;  %5477 = vrot.lane.b32.xlu0 %v5476_v52, %s6129_s9  ;;  %v1234_v28 = vsel %vm1232_vm0, %v5638_v6, 0  ;;  %v5511_v38 = vpack.i.bf16 %v5854_v35, %v5852_v29  ;;  %v5856_v50 = vpop.eup %5855  ;;  %v340_v52 = vadd.f32 %v6232_v8, %v6477_v14  ;;  %v389_v6 = vmax.f32 %v341_v56, 1e-08 }
  0x54   :  { %5036 = vmatpush3.bf16.msra.mxu0 %v1234_v28  ;;  %v390_v29 = vmax.f32 %v342_v10, 1e-08  ;;  %v393_v48 = vmax.f32 %v345_v20, 1e-08  ;;  %v346_v56 = vadd.f32 %v6232_v8, %v6551_v44  ;;  %v396_v20 = vmax.f32 %v348_v2, 1e-08 }
  0x55   :  { %v388_v4 = vmax.f32 %v340_v52, 1e-08  ;;  %v5561_v52 = vpack.i.bf16 %v6484_v25, %v6477_v14  ;;  %v6673_v2 = vld [vmem:[%s8087_s0 + $0x18] sm:$0xff] }
  0x57   :  { %5472 = vrot.lane.b32.xlu1 %v5471_v51, %s6129_s9  ;;  %5487 = vrot.lane.b32.xlu0 %v5486_v9, %s6129_s9  ;;  %v386_v51 = vmax.f32 %v338_v41, 1e-08  ;;  %v198_v9 = vmax.f32 %v150_v61, 1e-08  ;;  %v347_v61 = vadd.f32 %v6232_v8, %v6556_v45 }
  0x59   :  { %5879 = vrcp.f32 %v386_v51 }
  0x5a   :  { %5881 = vrcp.f32 %v387_v1  ;;  %v204_v1 = vmax.f32 %v156_v46, 1e-08  ;;  %v6650_v46 = vld [vmem:[%s8087_s0 + $0x8] sm:$0xff] }
  0x5b   :  { %5482 = vrot.lane.b32.xlu1 %v5481_v55, %s6129_s9  ;;  %5497 = vrot.lane.b32.xlu0 %v5496_v16, %s6129_s9  ;;  %v5858_v55 = vpop.eup %5857  ;;  %5883 = vrcp.f32 %v388_v4  ;;  %v344_v16 = vadd.f32 %v6232_v8, %v6527_v62 }
  0x5c   :  { %v5860_v58 = vpop.eup %5859  ;;  %v5526_v60 = vpack.i.bf16 %v5858_v55, %v5856_v50  ;;  %5885 = vrcp.f32 %v389_v6  ;;  %v155_v50 = vadd.f32 %v6431_v54, %v6571_v33  ;;  %v349_v6 = vadd.f32 %v6232_v8, %v6563_v21 }
  0x5d   :  { %v5862_v63 = vpop.eup %5861  ;;  %5887 = vrcp.f32 %v198_v9  ;;  %v394_v9 = vmax.f32 %v346_v56, 1e-08  ;;  %v6661_v56 = vld [vmem:[%s8087_s0] sm:$0xff] }
  0x5e   :  { %v5531_v3 = vpack.i.bf16 %v5862_v63, %v5860_v58  ;;  %v5864_v13 = vpop.eup %5863  ;;  %5889 = vrcp.f32 %v197_v11  ;;  %v6600_v63 = vld [vmem:[%s8087_s0 + $0x168] sm:$0xff]  ;;  %v6618_v11 = vld [vmem:[%s8087_s0 + $0x178] sm:$0xff] }
  0x5f   :  { %5492 = vrot.lane.b32.xlu1 %v5491_v15, %s6129_s9  ;;  %5507 = vrot.lane.b32.xlu0 %v5506_v32, %s6129_s9  ;;  %v200_v15 = vmax.f32 %v152_v5, 1e-08  ;;  %v5866_v17 = vpop.eup %5865  ;;  %v154_v32 = vadd.f32 %v6431_v54, %v6556_v45  ;;  %v203_v5 = vmax.f32 %v155_v50, 1e-08  ;;  %v158_v10 = vadd.f32 %v6431_v54, %v6600_v63 }
  0x60   :  { %v5868_v22 = vpop.eup %5867  ;;  %v5546_v28 = vpack.i.bf16 %v5866_v17, %v5864_v13  ;;  %v5576_v13 = vpack.i.bf16 %v6504_v49, %v6512_v53 }
  0x61   :  { %v5870_v35 = vpop.eup %5869  ;;  %5891 = vrcp.f32 %v200_v15  ;;  %v202_v55 = vmax.f32 %v154_v32, 1e-08  ;;  %v395_v15 = vmax.f32 %v347_v61, 1e-08  ;;  %v397_v32 = vmax.f32 %v349_v6, 1e-08 }
  0x62   :  { %v6577_v41 = vpop.eup %5871  ;;  %v5551_v42 = vpack.i.bf16 %v5870_v35, %v5868_v22  ;;  %v6630_v22 = vld [vmem:[%s8087_s0 + $0x170] sm:$0xff]  ;;  %v353_v6 = vadd.f32 %v6232_v8, %v6618_v11 }
  0x63   :  { %5502 = vrot.lane.b32.xlu1 %v5501_v18, %s6129_s9  ;;  %5517 = vrot.lane.b32.xlu0 %v5516_v40, %s6129_s9  ;;  %v199_v18 = vmax.f32 %v151_v7, 1e-08  ;;  %v153_v40 = vadd.f32 %v6431_v54, %v6551_v44  ;;  %v6582_v47 = vpop.eup %5873  ;;  %v159_v35 = vadd.f32 %v6431_v54, %v6630_v22 }
  0x64   :  { %v6586_v51 = vpop.eup %5875 }
  0x65   :  { %5893 = vrcp.f32 %v199_v18  ;;  %v6593_v58 = vpop.eup %5877 }
  0x66   :  { %5895 = vrcp.f32 %v390_v29 }
  0x67   :  { %5512 = vrot.lane.b32.xlu1 %v5511_v38, %s6129_s9  ;;  %5527 = vrot.lane.b32.xlu0 %v5526_v60, %s6129_s9  ;;  %v391_v38 = vmax.f32 %v343_v12, 1e-08  ;;  %v201_v60 = vmax.f32 %v153_v40, 1e-08  ;;  %v206_v40 = vmax.f32 %v158_v10, 1e-08 }
  0x69   :  { %5897 = vrcp.f32 %v391_v38  ;;  %v5581_v38 = vpack.i.bf16 %v6519_v57, %v6527_v62 }
  0x6b   :  { %5522 = vrot.lane.b32.xlu1 %v5521_v43, %s6129_s9  ;;  %5537 = vrot.lane.b32.xlu0 %v5536_v0, %s6129_s9  ;;  %v392_v43 = vmax.f32 %v344_v16, 1e-08  ;;  %v5880_v0 = vpop.eup %5879 }
  0x6c   :  { %v5882_v4 = vpop.eup %5881 }
  0x6d   :  { %5899 = vrcp.f32 %v392_v43  ;;  %v5884_v7 = vpop.eup %5883 }
  0x6e   :  { %5901 = vrcp.f32 %v393_v48  ;;  %v5886_v12 = vpop.eup %5885  ;;  %v6654_v48 = vadd.f32 %v6650_v46, %v6431_v54 }
  0x6f   :  { %5532 = vrot.lane.b32.xlu1 %v5531_v3, %s6129_s9  ;;  %5547 = vrot.lane.b32.xlu0 %v5546_v28, %s6129_s9  ;;  %v6608_v3 = vld [vmem:[%s8087_s0 + $0x160] sm:$0xff]  ;;  %5903 = vrcp.f32 %v202_v55  ;;  %v6624_v17 = vpop.eup %5887  ;;  %v5571_v18 = vpack.i.bf16 %v5886_v12, %v5884_v7  ;;  %v160_v28 = vadd.f32 %v6431_v54, %v6618_v11 }
  0x70   :  { %5905 = vrcp.f32 %v201_v60  ;;  %v157_v16 = vadd.f32 %v6431_v54, %v6608_v3  ;;  %v6634_v29 = vpop.eup %5889  ;;  %v6665_v60 = vadd.f32 %v6661_v56, %v6431_v54  ;;  %v162_v12 = vmax.f32 %v6654_v48, 1e-08 }
  0x71   :  { %5907 = vrcp.f32 %v204_v1  ;;  %v208_v61 = vmax.f32 %v160_v28, 1e-08 }
  0x72   :  { %5909 = vrcp.f32 %v203_v5  ;;  %v205_v50 = vmax.f32 %v157_v16, 1e-08  ;;  %v207_v5 = vmax.f32 %v159_v35, 1e-08 }
  0x73   :  { %5542 = vrot.lane.b32.xlu1 %v5541_v36, %s6129_s9  ;;  %5557 = vrot.lane.b32.xlu0 %v5556_v37, %s6129_s9  ;;  %v5566_v36 = vpack.i.bf16 %v5882_v4, %v5880_v0  ;;  %v6638_v37 = vpop.eup %5891  ;;  %5911 = vrcp.f32 %v394_v9  ;;  %v352_v0 = vadd.f32 %v6232_v8, %v6630_v22  ;;  %v6677_v4 = vadd.f32 %v6673_v2, %v6431_v54 }
  0x74   :  { %v6645_v43 = vpop.eup %5893  ;;  %5913 = vrcp.f32 %v395_v15 }
  0x75   :  { %v5896_v55 = vpop.eup %5895  ;;  %5915 = vrcp.f32 %v396_v20  ;;  %v5596_v20 = vpack.i.bf16 %v6556_v45, %v6551_v44  ;;  %v400_v28 = vmax.f32 %v352_v0, 1e-08  ;;  %v5601_v0 = vpack.i.bf16 %v6563_v21, %v6571_v33 }
  0x76   :  { %v5898_v1 = vpop.eup %5897  ;;  %5917 = vrcp.f32 %v397_v32 }
  0x77   :  { %5552 = vrot.lane.b32.xlu1 %v5551_v42, %s6129_s9  ;;  %5567 = vrot.lane.b32.xlu0 %v5566_v36, %s6129_s9  ;;  %v350_v42 = vadd.f32 %v6232_v8, %v6608_v3  ;;  %v5900_v7 = vpop.eup %5899  ;;  %v5586_v36 = vpack.i.bf16 %v5898_v1, %v5896_v55  ;;  %5919 = vrcp.f32 %v206_v40  ;;  %v401_v40 = vmax.f32 %v353_v6, 1e-08  ;;  %v6709_v55 = vld [vmem:[%s8087_s0 + $0x20] sm:$0xff] }
  0x78   :  { %v5902_v10 = vpop.eup %5901  ;;  %5921 = vrcp.f32 %v205_v50  ;;  %v6700_v50 = vld [vmem:[%s8087_s0 + $0x28] sm:$0xff] }
  0x79   :  { %v398_v9 = vmax.f32 %v350_v42, 1e-08  ;;  %v5904_v16 = vpop.eup %5903  ;;  %5923 = vrcp.f32 %v208_v61  ;;  %v6713_v61 = vadd.f32 %v6709_v55, %v6431_v54 }
  0x7a   :  { %v5906_v32 = vpop.eup %5905  ;;  %5925 = vrcp.f32 %v207_v5  ;;  %v6721_v5 = vld [vmem:[%s8087_s0 + $0x38] sm:$0xff] }
  0x7b   :  { %5562 = vrot.lane.b32.xlu1 %v5561_v52, %s6129_s9  ;;  %v351_v52 = vadd.f32 %v6232_v8, %v6600_v63  ;;  %5577 = vrot.lane.b32.xlu0 %v5576_v13, %s6129_s9  ;;  %v6686_v13 = vld [vmem:[%s8087_s0 + $0x10] sm:$0xff]  ;;  %v5908_v42 = vpop.eup %5907  ;;  %5927 = vrcp.f32 %v398_v9  ;;  %v6725_v6 = vadd.f32 %v6721_v5, %v6431_v54  ;;  %v5621_v9 = vpack.i.bf16 %v6618_v11, %v6630_v22 }
  0x7c   :  { %v6690_v15 = vadd.f32 %v6686_v13, %v6431_v54  ;;  %v5910_v1 = vpop.eup %5909  ;;  %v165_v48 = vmax.f32 %v6713_v61, 1e-08 }
  0x7d   :  { %v399_v8 = vmax.f32 %v351_v52, 1e-08  ;;  %v6704_v52 = vadd.f32 %v6700_v50, %v6431_v54 }
  0x7f   :  { %5572 = vrot.lane.b32.xlu1 %v5571_v18, %s6129_s9  ;;  %5587 = vrot.lane.b32.xlu0 %v5586_v36, %s6129_s9  ;;  %v5591_v18 = vpack.i.bf16 %v5902_v10, %v5900_v7  ;;  %5929 = vrcp.f32 %v399_v8  ;;  %v5912_v7 = vpop.eup %5911  ;;  %v5616_v36 = vpack.i.bf16 %v6600_v63, %v6608_v3  ;;  %v915_v10 = vsel %vm882_vm1, %v6471_v19, %v6582_v47 }
  0x80   :  { %5931 = vrcp.f32 %v400_v28  ;;  %v916_v8 = vsel %vm882_vm1, %v6440_v59, %v6577_v41  ;;  %v918_v41 = vsel %vm882_vm1, %v6484_v25, %v6586_v51  ;;  %v921_v51 = vsel %vm882_vm1, %v6527_v62, %v6645_v43 }
  0x81   :  { %5933 = vrcp.f32 %v401_v40  ;;  %v6748_v47 = vsel %vm931_vm2, %v916_v8, %v6440_v59  ;;  %v920_v59 = vsel %vm882_vm1, %v6504_v49, %v6624_v17  ;;  %v922_v17 = vsel %vm882_vm1, %v6519_v57, %v6638_v37 }
  0x82   :  { %v6784_v43 = vsel %vm931_vm2, %v921_v51, %v6527_v62  ;;  %5935 = vrcp.f32 %v162_v12  ;;  %v6865_v12 = vld [vmem:[%s8087_s0 + $0x40] sm:$0xff] }
  0x83   :  { %5582 = vrot.lane.b32.xlu1 %v5581_v38, %s6129_s9  ;;  %5597 = vrot.lane.b32.xlu0 %v5596_v20, %s6129_s9  ;;  %v6740_v20 = vsel %vm931_vm2, %v915_v10, %v6471_v19  ;;  %v917_v38 = vsel %vm882_vm1, %v6477_v14, %v6593_v58  ;;  %v6759_v58 = vsel %vm931_vm2, %v918_v41, %v6484_v25  ;;  %v5639_v41 = vld [vmem:[#allocation6 + $0x10] ss:$8 sps:$4 sm:$0xff]  }
  0x84   :  { %v6755_v19 = vsel %vm931_vm2, %v917_v38, %v6477_v14  ;;  %v6777_v38 = vsel %vm931_vm2, %v920_v59, %v6504_v49  ;;  %8099 = vst [vmem:[#allocation14_spill] sm:$0xff] %v6784_v43  ;;  %v924_v49 = vsel %vm882_vm1, %v6556_v45, %v5904_v16  ;;  %5085 = vmatprep.subr.bf16.mxu1 %v5639_v41 }
  0x85   :  { %8096 = vst [vmem:[#allocation11_spill] sm:$0xff] %v6755_v19  ;;  %8098 = vst [vmem:[#allocation13_spill] sm:$0xff] %v6777_v38  ;;  %v6801_v62 = vsel %vm931_vm2, %v924_v49, %v6556_v45  ;;  %5086 = vmatpush3.bf16.msra.mxu1 %v5639_v41 }
  0x86   :  { %8102 = vst [vmem:[#allocation17_spill] sm:$0xff] %v6801_v62 }
  0x87   :  { %5592 = vrot.lane.b32.xlu1 %v5591_v18, %s6129_s9  ;;  %v5914_v18 = vpop.eup %5913 }
  0x88   :  { %v5916_v35 = vpop.eup %5915  ;;  %v5606_v28 = vpack.i.bf16 %v5914_v18, %v5912_v7 }
  0x89   :  { %v5918_v40 = vpop.eup %5917 }
  0x8a   :  { %v5920_v7 = vpop.eup %5919  ;;  %5607 = vrot.lane.b32.xlu0 %v5606_v28, %s6129_s9  ;;  %v5611_v14 = vpack.i.bf16 %v5918_v40, %v5916_v35  ;;  %v6788_v35 = vsel %vm931_vm2, %v922_v17, %v6519_v57  ;;  %v925_v57 = vsel %vm882_vm1, %v6571_v33, %v5910_v1  ;;  %v8109_v17 = vmax.f32 %v6665_v60, 1e-08  ;;  %v6875_v60 = vld [vmem:[%s8087_s0 + $0x58] sm:$0xff] }
  0x8b   :  { %5602 = vrot.lane.b32.xlu1 %v5601_v0, %s6129_s9  ;;  %v919_v0 = vsel %vm882_vm1, %v6512_v53, %v6634_v29  ;;  %v5922_v29 = vpop.eup %5921  ;;  %8100 = vst [vmem:[#allocation15_spill] sm:$0xff] %v6788_v35  ;;  %v6809_v16 = vsel %vm931_vm2, %v925_v57, %v6571_v33  ;;  %v928_v45 = vsel %vm882_vm1, %v6600_v63, %v5920_v7  ;;  %v6854_v7 = vld [vmem:[%s8087_s0 + $0x48] sm:$0xff] }
  0x8c   :  { %v6773_v25 = vsel %vm931_vm2, %v919_v0, %v6512_v53  ;;  %v923_v53 = vsel %vm882_vm1, %v6551_v44, %v5906_v32  ;;  %v5924_v10 = vpop.eup %5923  ;;  %v926_v32 = vsel %vm882_vm1, %v6563_v21, %v5908_v42  ;;  %8103 = vst [vmem:[#allocation18_spill] sm:$0xff] %v6809_v16  ;;  %v6826_v33 = vsel %vm931_vm2, %v928_v45, %v6600_v63  ;;  %v6890_v57 = vld [vmem:[%s8087_s0 + $0x68] sm:$0xff] }
  0x8d   :  { %8097 = vst [vmem:[#allocation12_spill] sm:$0xff] %v6773_v25  ;;  %v6797_v37 = vsel %vm931_vm2, %v923_v53, %v6551_v44  ;;  %v5926_v18 = vpop.eup %5925  ;;  %v6813_v8 = vsel %vm931_vm2, %v926_v32, %v6563_v21  ;;  %v927_v44 = vsel %vm882_vm1, %v6608_v3, %v5922_v29  ;;  %8106 = vst [vmem:[#allocation21_spill] sm:$0xff] %v6826_v33  ;;  %v163_v0 = vmax.f32 %v6690_v15, 1e-08 }
  0x8e   :  { %8101 = vst [vmem:[#allocation16_spill] sm:$0xff] %v6797_v37  ;;  %8104 = vst [vmem:[#allocation19_spill] sm:$0xff] %v6813_v8  ;;  %v5928_v28 = vpop.eup %5927  ;;  %5617 = vrot.lane.b32.xlu0 %v5616_v36, %s6129_s9  ;;  %v6822_v42 = vsel %vm931_vm2, %v927_v44, %v6608_v3  ;;  %v929_v21 = vsel %vm882_vm1, %v6630_v22, %v5926_v18  ;;  %v930_v1 = vsel %vm882_vm1, %v6618_v11, %v5924_v10  ;;  %v6836_v36 = vld [vmem:[%s8087_s0 + $0x30] sm:$0xff]  ;;  %v6898_v44 = vld [vmem:[%s8087_s0 + $0x60] sm:$0xff] }
  0x8f   :  { %5612 = vrot.lane.b32.xlu1 %v5611_v14, %s6129_s9  ;;  %8105 = vst [vmem:[#allocation20_spill] sm:$0xff] %v6822_v42  ;;  %v5930_v40 = vpop.eup %5929  ;;  %v119_v3 = vadd.f32 %v6836_v36, %v6431_v54  ;;  %v6842_v63 = vsel %vm931_vm2, %v929_v21, %v6630_v22  ;;  %v6846_v59 = vsel %vm931_vm2, %v930_v1, %v6618_v11  ;;  %v166_v15 = vmax.f32 %v6704_v52, 1e-08  ;;  %v6905_v21 = vld [vmem:[%s8087_s0 + $0x78] sm:$0xff] }
  0x90   :  { %8107 = vst [vmem:[#allocation22_spill] sm:$0xff] %v6842_v63  ;;  %8108 = vst [vmem:[#allocation23_spill] sm:$0xff] %v6846_v59  ;;  %v5932_v51 = vpop.eup %5931  ;;  %v122_v14 = vadd.f32 %v6854_v7, %v6431_v54  ;;  %v5626_v22 = vpack.i.bf16 %v5930_v40, %v5928_v28  ;;  %5937 = vrcp.f32 %v8109_v17  ;;  %v121_v52 = vadd.f32 %v6865_v12, %v6431_v54  ;;  %v6912_v40 = vld [vmem:[%s8087_s0 + $0x70] sm:$0xff] }
  0x91   :  { %v5934_v11 = vpop.eup %5933  ;;  %v8110_v29 = vmax.f32 %v6677_v4, 1e-08  ;;  %v124_v61 = vadd.f32 %v6875_v60, %v6431_v54  ;;  %v167_v49 = vmax.f32 %v119_v3, 1e-08  ;;  %v6883_v4 = vld [vmem:[%s8087_s0 + $0x50] sm:$0xff]  ;;  %v126_v32 = vadd.f32 %v6890_v57, %v6431_v54 }
  0x92   :  { %5627 = vrot.lane.b32.xlu0 %v5626_v22, %s6129_s9  ;;  %v5631_v53 = vpack.i.bf16 %v5934_v11, %v5932_v51  ;;  %v170_v10 = vmax.f32 %v122_v14, 1e-08  ;;  %v169_v18 = vmax.f32 %v121_v52, 1e-08  ;;  %v125_v45 = vadd.f32 %v6898_v44, %v6431_v54  ;;  %v6919_v51 = vld [vmem:[%s8087_s0 + $0x88] sm:$0xff]  ;;  %v6926_v22 = vld [vmem:[%s8087_s0 + $0x80] sm:$0xff]  ;;  %v5936_v17 = vpop.eup %5935 }
  0x93   :  { %5622 = vrot.lane.b32.xlu1 %v5621_v9, %s6129_s9  ;;  %5939 = vrcp.f32 %v8110_v29  ;;  %v168_v9 = vmax.f32 %v6725_v6, 1e-08  ;;  %v123_v6 = vadd.f32 %v6883_v4, %v6431_v54  ;;  %v172_v28 = vmax.f32 %v124_v61, 1e-08  ;;  %v6933_v52 = vld [vmem:[%s8087_s0 + $0x98] sm:$0xff] }
  0x94   :  { %5941 = vrcp.f32 %v163_v0  ;;  %v128_v1 = vadd.f32 %v6905_v21, %v6431_v54  ;;  %v127_v0 = vadd.f32 %v6912_v40, %v6431_v54  ;;  %v174_v3 = vmax.f32 %v126_v32, 1e-08 }
  0x95   :  { %5943 = vrcp.f32 %v166_v15  ;;  %v171_v41 = vmax.f32 %v123_v6, 1e-08  ;;  %v130_v15 = vadd.f32 %v6919_v51, %v6431_v54  ;;  %v173_v14 = vmax.f32 %v125_v45, 1e-08 }
  0x96   :  { %5945 = vrcp.f32 %v165_v48  ;;  %v129_v11 = vadd.f32 %v6926_v22, %v6431_v54  ;;  %v176_v48 = vmax.f32 %v128_v1, 1e-08  ;;  %v132_v29 = vadd.f32 %v6933_v52, %v6431_v54 }
  0x97   :  { %5632 = vrot.lane.b32.xlu1 %v5631_v53, %s6129_s9  ;;  %5947 = vrcp.f32 %v168_v9  ;;  %v175_v61 = vmax.f32 %v127_v0, 1e-08  ;;  %v6940_v53 = vld [vmem:[%s8087_s0 + $0x90] sm:$0xff]  ;;  %v134_v32 = vadd.f32 %v6431_v54, %v6352_v23  ;;  %v135_v63 = vadd.f32 %v6431_v54, %v6357_v24 }
  0x98   :  { %5949 = vrcp.f32 %v167_v49  ;;  %v131_v49 = vadd.f32 %v6940_v53, %v6431_v54  ;;  %v177_v1 = vmax.f32 %v129_v11, 1e-08  ;;  %v180_v0 = vmax.f32 %v132_v29, 1e-08 }
  0x99   :  { %5951 = vrcp.f32 %v170_v10  ;;  %v178_v10 = vmax.f32 %v130_v15, 1e-08  ;;  %v138_v59 = vadd.f32 %v6431_v54, %v6379_v30  ;;  %v140_v29 = vadd.f32 %v6431_v54, %v6393_v34 }
  0x9a   :  { %5953 = vrcp.f32 %v169_v18  ;;  %v5938_v9 = vpop.eup %5937  ;;  %v6949_v18 = vld [vmem:[%s8087_s0 + $0xa0] sm:$0xff]  ;;  %v179_v23 = vmax.f32 %v131_v49, 1e-08  ;;  %v6973_v24 = vadd.f32 %v6431_v54, %v6384_v31  ;;  %v884_v34 = vsel %vm882_vm1, %v6650_v46, %v5936_v17 }
  0x9b   :  { %5955 = vrcp.f32 %v172_v28  ;;  %v133_v45 = vadd.f32 %v6949_v18, %v6431_v54  ;;  %v883_v31 = vsel %vm882_vm1, %v6661_v56, %v5938_v9 }
  0x9c   :  { %5957 = vrcp.f32 %v171_v41 }
  0x9d   :  { %v5940_v6 = vpop.eup %5939  ;;  %5959 = vrcp.f32 %v174_v3  ;;  %v136_v3 = vadd.f32 %v6431_v54, %v6364_v26  ;;  %v181_v11 = vmax.f32 %v133_v45, 1e-08  ;;  %v137_v26 = vadd.f32 %v6431_v54, %v6369_v27 }
  0x9e   :  { %v5942_v28 = vpop.eup %5941  ;;  %5961 = vrcp.f32 %v173_v14  ;;  %v182_v14 = vmax.f32 %v134_v32, 1e-08  ;;  %v183_v32 = vmax.f32 %v135_v63, 1e-08  ;;  %v186_v45 = vmax.f32 %v138_v59, 1e-08 }
  0x9f   :  { %v6953_v41 = vpop.eup %5943  ;;  %5963 = vrcp.f32 %v176_v48  ;;  %v184_v49 = vmax.f32 %v136_v3, 1e-08  ;;  %v6985_v27 = vadd.f32 %v6431_v54, %v6406_v39  ;;  %v185_v3 = vmax.f32 %v137_v26, 1e-08 }
  0xa0   :  { %v6957_v15 = vpop.eup %5945  ;;  %5965 = vrcp.f32 %v175_v61  ;;  %v6975_v61 = vpop.permute.xlu0 %5397  ;;  %v187_v63 = vmax.f32 %v6973_v24, 1e-08  ;;  %v885_v9 = vsel %vm882_vm1, %v6686_v13, %v5942_v28  ;;  %v933_v26 = vsel %vm931_vm2, %v884_v34, %v6650_v46  ;;  %v7014_v28 = vld [vmem:[%s8087_s0 + $0xe0] sm:$0xff]  ;;  %v7027_v46 = vld [vmem:[%s8087_s0 + $0xf8] sm:$0xff] }
  0xa1   :  { %v6963_v42 = vpop.eup %5947  ;;  %5967 = vrcp.f32 %v178_v10  ;;  %v5399_v39 = vunpack.i.l.bf16 %v6975_v61 }
  0xa2   :  { %v6965_v48 = vpop.eup %5949  ;;  %5969 = vrcp.f32 %v177_v1 }
  0xa3   :  { %v6977_v30 = vpop.eup %5951  ;;  %5971 = vrcp.f32 %v180_v0 }
  0xa4   :  { %v6979_v10 = vpop.eup %5953  ;;  %5973 = vrcp.f32 %v179_v23  ;;  %v188_v23 = vmax.f32 %v140_v29, 1e-08  ;;  %v7002_v17 = vpop.permute.xlu0 %5402 }
  0xa5   :  { %v6981_v1 = vpop.eup %5955  ;;  %5975 = vrcp.f32 %v182_v14  ;;  %v5400_v14 = vunpack.i.h.bf16 %v6975_v61  ;;  %v7018_v61 = vadd.f32 %v7014_v28, %v6431_v54 }
  0xa6   :  { %v6991_v0 = vpop.eup %5957  ;;  %5977 = vrcp.f32 %v181_v11  ;;  %v932_v11 = vsel %vm931_vm2, %v883_v31, %v6661_v56  ;;  %v886_v56 = vsel %vm882_vm1, %v6673_v2, %v5940_v6  ;;  %v5405_v6 = vunpack.i.h.bf16 %v7002_v17 }
  0xa7   :  { %v6994_v59 = vpop.eup %5959  ;;  %5979 = vrcp.f32 %v184_v49  ;;  %v981_v24 = vsel %vm980_vm3, %v932_v11, %v5399_v39  ;;  %v982_v16 = vsel %vm980_vm3, %v933_v26, %v5400_v14  ;;  %v935_v43 = vsel %vm931_vm2, %v886_v56, %v6673_v2 }
  0xa8   :  { %v7000_v33 = vpop.eup %5961  ;;  %5981 = vrcp.f32 %v183_v32  ;;  %v7031_v32 = vadd.f32 %v7027_v46, %v6431_v54  ;;  %v888_v11 = vsel %vm882_vm1, %v6700_v50, %v6953_v41  ;;  %v5418_v25 = vpop.permute.xlu0 %5417 }
  0xa9   :  { %v7008_v29 = vpop.eup %5963  ;;  %5983 = vrcp.f32 %v186_v45  ;;  %v934_v45 = vsel %vm931_vm2, %v885_v9, %v6686_v13  ;;  %v984_v9 = vsel %vm980_vm3, %v935_v43, %v5405_v6  ;;  %v7077_v43 = vld [vmem:[%s8087_s0 + $0xf0] sm:$0xff] }
  0xaa   :  { %v7022_v49 = vpop.eup %5965  ;;  %5985 = vrcp.f32 %v185_v3  ;;  %v5404_v3 = vunpack.i.l.bf16 %v7002_v17  ;;  %v887_v17 = vsel %vm882_vm1, %v6709_v55, %v6957_v15 }
  0xab   :  { %v7035_v31 = vpop.eup %5967  ;;  %5987 = vrcp.f32 %v188_v23  ;;  %v889_v23 = vsel %vm882_vm1, %v6836_v36, %v6965_v48  ;;  %v890_v48 = vsel %vm882_vm1, %v6721_v5, %v6963_v42 }
  0xac   :  { %v7041_v8 = vpop.eup %5969  ;;  %v983_v15 = vsel %vm980_vm3, %v934_v45, %v5404_v3  ;;  %5989 = vrcp.f32 %v187_v63  ;;  %v5419_v45 = vunpack.i.l.bf16 %v5418_v25  ;;  %v936_v63 = vsel %vm931_vm2, %v887_v17, %v6709_v55 }
  0xad   :  { %v5408_v34 = vpop.permute.xlu1 %5407  ;;  %v7045_v13 = vpop.eup %5971 }
  0xae   :  { %v5410_v37 = vunpack.i.h.bf16 %v5408_v34  ;;  %v5409_v62 = vunpack.i.l.bf16 %v5408_v34  ;;  %v7054_v26 = vpop.eup %5973 }
  0xaf   :  { %v7061_v56 = vpop.eup %5975 }
  0xb0   :  { %v1030_v34 = vsel %vm1029_vm4, %v981_v24, %v5409_v62  ;;  %v1031_v2 = vsel %vm1029_vm4, %v982_v16, %v5410_v37  ;;  %v7067_v62 = vpop.eup %5977 }
  0xb1   :  { %v5413_v35 = vpop.permute.xlu1 %5412  ;;  %v1079_v41 = vsel %vm1078_vm5, %v1030_v34, %v5399_v39  ;;  %v1080_v38 = vsel %vm1078_vm5, %v1031_v2, %v5400_v14  ;;  %v7072_v19 = vpop.eup %5979  ;;  %v7081_v14 = vadd.f32 %v7077_v43, %v6431_v54  ;;  %v5420_v39 = vunpack.i.h.bf16 %v5418_v25 }
  0xb2   :  { %v5415_v37 = vunpack.i.h.bf16 %v5413_v35  ;;  %v5414_v16 = vunpack.i.l.bf16 %v5413_v35  ;;  %v1127_v24 = vpack.c.bf16 %v1080_v38, %v1079_v41  ;;  %v7083_v35 = vpop.eup %5981  ;;  %v937_v34 = vsel %vm931_vm2, %v888_v11, %v6700_v50 }
  0xb3   :  { %v7092_v2 = vpop.eup %5983  ;;  %v938_v54 = vsel %vm931_vm2, %v889_v23, %v6836_v36  ;;  %v939_v25 = vsel %vm931_vm2, %v890_v48, %v6721_v5  ;;  %v891_v11 = vsel %vm882_vm1, %v6865_v12, %v6979_v10  ;;  %v192_v36 = vmax.f32 %v7031_v32, 1e-08  ;;  %v5428_v23 = vpop.permute.xlu0 %5427 }
  0xb4   :  { %v1033_v38 = vsel %vm1029_vm4, %v984_v9, %v5415_v37  ;;  %v1032_v42 = vsel %vm1029_vm4, %v983_v15, %v5414_v16  ;;  %5037 = vmatprep.mubr.msk.bf16.mxu0 %vm1159_vm6, %v1127_v24  ;;  %v7100_v37 = vpop.eup %5985  ;;  %v8111_v16 = vmax.f32 %v6985_v27, 1e-08  ;;  %v986_v5 = vsel %vm980_vm3, %v937_v34, %v5420_v39 }
  0xb5   :  { %v5423_v41 = vpop.permute.xlu1 %5422  ;;  %v1081_v9 = vsel %vm1078_vm5, %v1032_v42, %v5404_v3  ;;  %v1082_v15 = vsel %vm1078_vm5, %v1033_v38, %v5405_v6  ;;  %v985_v3 = vsel %vm980_vm3, %v936_v63, %v5419_v45  ;;  %v5430_v6 = vunpack.i.h.bf16 %v5428_v23  ;;  %v7117_v27 = vpop.eup %5987 }
  0xb6   :  { %v5425_v55 = vunpack.i.h.bf16 %v5423_v41  ;;  %v5424_v17 = vunpack.i.l.bf16 %v5423_v41  ;;  %v1128_v50 = vpack.c.bf16 %v1082_v15, %v1081_v9  ;;  %5991 = vrcp.f32 %v8111_v16 }
  0xb7   :  { %v5429_v24 = vunpack.i.l.bf16 %v5428_v23  ;;  %v892_v48 = vsel %vm882_vm1, %v6854_v7, %v6977_v30  ;;  %v893_v10 = vsel %vm882_vm1, %v6883_v4, %v6991_v0  ;;  %v940_v34 = vsel %vm931_vm2, %v891_v11, %v6865_v12 }
  0xb8   :  { %5038 = vmatmul.mubr.msk.bf16.vlgmr.msra.gmra.mrb[0].mxu0 %vm1159_vm6, %v1128_v50  ;;  %v988_v38 = vsel %vm980_vm3, %v939_v25, %v5425_v55  ;;  %v987_v42 = vsel %vm980_vm3, %v938_v54, %v5424_v17  ;;  %v894_v41 = vsel %vm882_vm1, %v6875_v60, %v6981_v1  ;;  %v1035_v9 = vsel %vm1029_vm4, %v986_v5, %v5430_v6  ;;  %v5438_v25 = vpop.permute.xlu0 %5437  ;;  %v7136_v5 = vpop.eup %5989 }
  0xb9   :  { %v5433_v63 = vpop.permute.xlu1 %5432  ;;  %v1034_v30 = vsel %vm1029_vm4, %v985_v3, %v5429_v24  ;;  %v941_v50 = vsel %vm931_vm2, %v892_v48, %v6854_v7  ;;  %v942_v54 = vsel %vm931_vm2, %v893_v10, %v6883_v4  ;;  %v1084_v12 = vsel %vm1078_vm5, %v1035_v9, %v5420_v39 }
  0xba   :  { %v5435_v15 = vunpack.i.h.bf16 %v5433_v63  ;;  %v5434_v0 = vunpack.i.l.bf16 %v5433_v63  ;;  %v1083_v16 = vsel %vm1078_vm5, %v1034_v30, %v5419_v45  ;;  %v5440_v3 = vunpack.i.h.bf16 %v5438_v25 }
  0xbb   :  { %v5439_v23 = vunpack.i.l.bf16 %v5438_v25  ;;  %v943_v6 = vsel %vm931_vm2, %v894_v41, %v6875_v60  ;;  %v1129_v24 = vpack.c.bf16 %v1084_v12, %v1083_v16  ;;  %v895_v39 = vsel %vm882_vm1, %v6898_v44, %v7000_v33 }
  0xbc   :  { %v1036_v11 = vsel %vm1029_vm4, %v987_v42, %v5434_v0  ;;  %v1037_v1 = vsel %vm1029_vm4, %v988_v38, %v5435_v15  ;;  %v896_v38 = vsel %vm882_vm1, %v6890_v57, %v6994_v59  ;;  %v8112_v42 = vmax.f32 %v7018_v61, 1e-08 }
  0xbd   :  { %v5443_v7 = vpop.permute.xlu1 %5442  ;;  %v1085_v48 = vsel %vm1078_vm5, %v1036_v11, %v5424_v17  ;;  %v1086_v4 = vsel %vm1078_vm5, %v1037_v1, %v5425_v55  ;;  %v990_v60 = vsel %vm980_vm3, %v941_v50, %v5440_v3  ;;  %v989_v63 = vsel %vm980_vm3, %v940_v34, %v5439_v23  ;;  %5041 = vmatprep.mubr.msk.bf16.mxu0 %vm1159_vm6, %v1129_v24  ;;  %v5448_v55 = vpop.permute.xlu0 %5447 }
  0xbe   :  { %v5445_v45 = vunpack.i.h.bf16 %v5443_v7  ;;  %v5444_v10 = vunpack.i.l.bf16 %v5443_v7  ;;  %5993 = vrcp.f32 %v8112_v42  ;;  %v1130_v17 = vpack.c.bf16 %v1086_v4, %v1085_v48 }
  0xbf   :  { %v5450_v41 = vunpack.i.h.bf16 %v5448_v55  ;;  %v5449_v30 = vunpack.i.l.bf16 %v5448_v55  ;;  %v897_v33 = vsel %vm882_vm1, %v6912_v40, %v7022_v49  ;;  %v898_v59 = vsel %vm882_vm1, %v6905_v21, %v7008_v29 }
  0xc0   :  { %v7159_v61 = vpop.eup %5991  ;;  %v992_v9 = vsel %vm980_vm3, %v943_v6, %v5445_v45  ;;  %v991_v34 = vsel %vm980_vm3, %v942_v54, %v5444_v10  ;;  %5042 = vmatmul.mubr.msk.bf16.gmra.mrb[4].mxu0 %vm1159_vm6, %v1130_v17  ;;  %v944_v0 = vsel %vm931_vm2, %v895_v39, %v6898_v44  ;;  %v945_v50 = vsel %vm931_vm2, %v896_v38, %v6890_v57 }
  0xc1   :  { %v5453_v15 = vpop.permute.xlu1 %5452  ;;  %v1038_v49 = vsel %vm1029_vm4, %v989_v63, %v5449_v30  ;;  %v1039_v25 = vsel %vm1029_vm4, %v990_v60, %v5450_v41  ;;  %v5458_v54 = vpop.permute.xlu0 %5457  ;;  %v946_v1 = vsel %vm931_vm2, %v897_v33, %v6912_v40  ;;  %v947_v44 = vsel %vm931_vm2, %v898_v59, %v6905_v21 }
  0xc2   :  { %v5455_v29 = vunpack.i.h.bf16 %v5453_v15  ;;  %v5454_v16 = vunpack.i.l.bf16 %v5453_v15  ;;  %v1087_v12 = vsel %vm1078_vm5, %v1038_v49, %v5439_v23  ;;  %v1088_v11 = vsel %vm1078_vm5, %v1039_v25, %v5440_v3 }
  0xc3   :  { %v1131_v7 = vpack.c.bf16 %v1088_v11, %v1087_v12  ;;  %v5460_v24 = vunpack.i.h.bf16 %v5458_v54  ;;  %v5459_v23 = vunpack.i.l.bf16 %v5458_v54  ;;  %v899_v3 = vsel %vm882_vm1, %v6926_v22, %v7041_v8 }
  0xc4   :  { %v1040_v6 = vsel %vm1029_vm4, %v991_v34, %v5454_v16  ;;  %v1041_v57 = vsel %vm1029_vm4, %v992_v9, %v5455_v29  ;;  %v900_v42 = vsel %vm882_vm1, %v6919_v51, %v7035_v31  ;;  %5995 = vrcp.f32 %v192_v36 }
  0xc5   :  { %v1089_v48 = vsel %vm1078_vm5, %v1040_v6, %v5444_v10  ;;  %v1090_v4 = vsel %vm1078_vm5, %v1041_v57, %v5445_v45  ;;  %v5463_v39 = vpop.permute.xlu1 %5462  ;;  %5045 = vmatprep.mubr.msk.bf16.mxu0 %vm1159_vm6, %v1131_v7  ;;  %v191_v45 = vmax.f32 %v7081_v14, 1e-08  ;;  %v994_v10 = vsel %vm980_vm3, %v945_v50, %v5460_v24  ;;  %v5468_v63 = vpop.permute.xlu0 %5467  ;;  %v6055_v6 = vld [vmem:[%s8087_s0 + $0xa8] sm:$0xff] }
  0xc6   :  { %v1132_v40 = vpack.c.bf16 %v1090_v4, %v1089_v48  ;;  %v5465_v21 = vunpack.i.h.bf16 %v5463_v39  ;;  %v5464_v38 = vunpack.i.l.bf16 %v5463_v39  ;;  %v993_v60 = vsel %vm980_vm3, %v944_v0, %v5459_v23 }
  0xc7   :  { %v5470_v8 = vunpack.i.h.bf16 %v5468_v63  ;;  %v5469_v55 = vunpack.i.l.bf16 %v5468_v63  ;;  %v901_v17 = vsel %vm882_vm1, %v6940_v53, %v7054_v26  ;;  %v902_v31 = vsel %vm882_vm1, %v6933_v52, %v7045_v13 }
  0xc8   :  { %v7198_v41 = vpop.eup %5993  ;;  %5046 = vmatmul.mubr.msk.bf16.gmra.mrb[8].mxu0 %vm1159_vm6, %v1132_v40  ;;  %v996_v32 = vsel %vm980_vm3, %v947_v44, %v5465_v21  ;;  %v995_v14 = vsel %vm980_vm3, %v946_v1, %v5464_v38  ;;  %v948_v30 = vsel %vm931_vm2, %v899_v3, %v6926_v22  ;;  %v949_v33 = vsel %vm931_vm2, %v900_v42, %v6919_v51  ;;  %v6057_v3 = vld [vmem:[%s8087_s0 + $0xb8] sm:$0xff] }
  0xc9   :  { %v5473_v36 = vpop.permute.xlu1 %5472  ;;  %v1042_v26 = vsel %vm1029_vm4, %v993_v60, %v5469_v55  ;;  %v1043_v59 = vsel %vm1029_vm4, %v994_v10, %v5470_v8  ;;  %v5478_v0 = vpop.permute.xlu0 %5477  ;;  %v950_v50 = vsel %vm931_vm2, %v901_v17, %v6940_v53  ;;  %v951_v22 = vsel %vm931_vm2, %v902_v31, %v6933_v52 }
  0xca   :  { %v5475_v13 = vunpack.i.h.bf16 %v5473_v36  ;;  %v5474_v9 = vunpack.i.l.bf16 %v5473_v36  ;;  %v1091_v34 = vsel %vm1078_vm5, %v1042_v26, %v5459_v23  ;;  %v1092_v15 = vsel %vm1078_vm5, %v1043_v59, %v5460_v24  ;;  %v6056_v23 = vld [vmem:[%s8087_s0 + $0xb0] sm:$0xff] }
  0xcb   :  { %v1133_v25 = vpack.c.bf16 %v1092_v15, %v1091_v34  ;;  %v5480_v29 = vunpack.i.h.bf16 %v5478_v0  ;;  %v5479_v11 = vunpack.i.l.bf16 %v5478_v0  ;;  %v903_v1 = vsel %vm882_vm1, %v6949_v18, %v7067_v62 }
  0xcc   :  { %v1044_v49 = vsel %vm1029_vm4, %v995_v14, %v5474_v9  ;;  %v1045_v51 = vsel %vm1029_vm4, %v996_v32, %v5475_v13  ;;  %v904_v57 = vsel %vm882_vm1, %v6055_v6, %v7061_v56  ;;  %5997 = vrcp.f32 %v191_v45  ;;  %v6058_v9 = vld [vmem:[%s8087_s0 + $0xc0] sm:$0xff] }
  0xcd   :  { %v1093_v16 = vsel %vm1078_vm5, %v1044_v49, %v5464_v38  ;;  %v1094_v12 = vsel %vm1078_vm5, %v1045_v51, %v5465_v21  ;;  %v5483_v54 = vpop.permute.xlu1 %5482  ;;  %5049 = vmatprep.mubr.msk.bf16.mxu0 %vm1159_vm6, %v1133_v25  ;;  %v998_v7 = vsel %vm980_vm3, %v949_v33, %v5480_v29  ;;  %v997_v24 = vsel %vm980_vm3, %v948_v30, %v5479_v11  ;;  %v5488_v48 = vpop.permute.xlu0 %5487 }
  0xce   :  { %v1134_v53 = vpack.c.bf16 %v1094_v12, %v1093_v16  ;;  %v5485_v52 = vunpack.i.h.bf16 %v5483_v54  ;;  %v5484_v44 = vunpack.i.l.bf16 %v5483_v54  ;;  %v5490_v4 = vunpack.i.h.bf16 %v5488_v48  ;;  %v7240_v40 = vpop.eup %5995 }
  0xcf   :  { %v5489_v62 = vunpack.i.l.bf16 %v5488_v48  ;;  %v905_v39 = vsel %vm882_vm1, %v6056_v23, %v7083_v35  ;;  %v906_v56 = vsel %vm882_vm1, %v6057_v3, %v7072_v19  ;;  %v952_v45 = vsel %vm931_vm2, %v903_v1, %v6949_v18 }
  0xd0   :  { %5050 = vmatmul.mubr.msk.bf16.gmra.mrb[12].mxu0 %vm1159_vm6, %v1134_v53  ;;  %v1000_v21 = vsel %vm980_vm3, %v951_v22, %v5485_v52  ;;  %v999_v38 = vsel %vm980_vm3, %v950_v50, %v5484_v44  ;;  %v953_v35 = vsel %vm931_vm2, %v904_v57, %v6055_v6  ;;  %v1047_v60 = vsel %vm1029_vm4, %v998_v7, %v5490_v4  ;;  %v6059_v22 = vld [vmem:[%s8087_s0 + $0xc8] sm:$0xff] }
  0xd1   :  { %v5493_v42 = vpop.permute.xlu1 %5492  ;;  %v1046_v10 = vsel %vm1029_vm4, %v997_v24, %v5489_v62  ;;  %v1096_v55 = vsel %vm1078_vm5, %v1047_v60, %v5480_v29  ;;  %v5498_v17 = vpop.permute.xlu0 %5497  ;;  %v954_v31 = vsel %vm931_vm2, %v905_v39, %v6056_v23  ;;  %v955_v32 = vsel %vm931_vm2, %v906_v56, %v6057_v3  ;;  %v6061_v62 = vld [vmem:[%s8087_s0 + $0xd8] sm:$0xff] }
  0xd2   :  { %v5495_v63 = vunpack.i.h.bf16 %v5493_v42  ;;  %v5494_v19 = vunpack.i.l.bf16 %v5493_v42  ;;  %v1095_v8 = vsel %vm1078_vm5, %v1046_v10, %v5479_v11  ;;  %v5500_v30 = vunpack.i.h.bf16 %v5498_v17 }
  0xd3   :  { %v1135_v36 = vpack.c.bf16 %v1096_v55, %v1095_v8  ;;  %v5499_v59 = vunpack.i.l.bf16 %v5498_v17  ;;  %v907_v34 = vsel %vm882_vm1, %v6058_v9, %v7100_v37  ;;  %v908_v49 = vsel %vm882_vm1, %v6059_v22, %v7092_v2  ;;  %v6060_v37 = vld [vmem:[%s8087_s0 + $0xd0] sm:$0xff] }
  0xd4   :  { %v1048_v14 = vsel %vm1029_vm4, %v999_v38, %v5494_v19  ;;  %v1049_v18 = vsel %vm1029_vm4, %v1000_v21, %v5495_v63  ;;  %v1002_v51 = vsel %vm980_vm3, %v953_v35, %v5500_v30  ;;  %v909_v11 = vsel %vm882_vm1, %v6060_v37, %v7136_v5 }
  0xd5   :  { %v1097_v33 = vsel %vm1078_vm5, %v1048_v14, %v5484_v44  ;;  %v1098_v26 = vsel %vm1078_vm5, %v1049_v18, %v5485_v52  ;;  %v5503_v13 = vpop.permute.xlu1 %5502  ;;  %5053 = vmatprep.mubr.msk.bf16.mxu0 %vm1159_vm6, %v1135_v36  ;;  %v1001_v25 = vsel %vm980_vm3, %v952_v45, %v5499_v59  ;;  %v5508_v29 = vpop.permute.xlu0 %5507  ;;  %v956_v52 = vsel %vm931_vm2, %v907_v34, %v6058_v9  ;;  %v6062_v18 = vld [vmem:[%s8087_s0 + $0xe8] sm:$0xff] }
  0xd6   :  { %v1136_v15 = vpack.c.bf16 %v1098_v26, %v1097_v33  ;;  %v5505_v0 = vunpack.i.h.bf16 %v5503_v13  ;;  %v5504_v50 = vunpack.i.l.bf16 %v5503_v13  ;;  %v5510_v16 = vunpack.i.h.bf16 %v5508_v29  ;;  %v5998_v54 = vpop.eup %5997 }
  0xd7   :  { %v5509_v12 = vunpack.i.l.bf16 %v5508_v29  ;;  %v957_v44 = vsel %vm931_vm2, %v908_v49, %v6059_v22  ;;  %v910_v23 = vsel %vm882_vm1, %v6061_v62, %v7117_v27  ;;  %v958_v39 = vsel %vm931_vm2, %v909_v11, %v6060_v37 }
  0xd8   :  { %5054 = vmatmul.mubr.msk.bf16.gmra.mrb[16].mxu0 %vm1159_vm6, %v1136_v15  ;;  %v1004_v1 = vsel %vm980_vm3, %v955_v32, %v5505_v0  ;;  %v1003_v2 = vsel %vm980_vm3, %v954_v31, %v5504_v50  ;;  %v1051_v57 = vsel %vm1029_vm4, %v1002_v51, %v5510_v16  ;;  %v911_v60 = vsel %vm882_vm1, %v7014_v28, %v7198_v41 }
  0xd9   :  { %v5513_v53 = vpop.permute.xlu1 %5512  ;;  %v1050_v6 = vsel %vm1029_vm4, %v1001_v25, %v5509_v12  ;;  %v1100_v48 = vsel %vm1078_vm5, %v1051_v57, %v5500_v30  ;;  %v5518_v4 = vpop.permute.xlu0 %5517  ;;  %v959_v63 = vsel %vm931_vm2, %v910_v23, %v6061_v62  ;;  %v912_v41 = vsel %vm882_vm1, %v6062_v18, %v7159_v61 }
  0xda   :  { %v5515_v7 = vunpack.i.h.bf16 %v5513_v53  ;;  %v5514_v24 = vunpack.i.l.bf16 %v5513_v53  ;;  %v1099_v5 = vsel %vm1078_vm5, %v1050_v6, %v5499_v59  ;;  %v5520_v38 = vunpack.i.h.bf16 %v5518_v4 }
  0xdb   :  { %v1137_v21 = vpack.c.bf16 %v1100_v48, %v1099_v5  ;;  %v5519_v35 = vunpack.i.l.bf16 %v5518_v4  ;;  %v960_v26 = vsel %vm931_vm2, %v911_v60, %v7014_v28  ;;  %v913_v59 = vsel %vm882_vm1, %v7077_v43, %v5998_v54 }
  0xdc   :  { %v1052_v3 = vsel %vm1029_vm4, %v1003_v2, %v5514_v24  ;;  %v1053_v56 = vsel %vm1029_vm4, %v1004_v1, %v5515_v7  ;;  %v1006_v55 = vsel %vm980_vm3, %v957_v44, %v5520_v38  ;;  %v914_v28 = vsel %vm882_vm1, %v7027_v46, %v7240_v40 }
  0xdd   :  { %v1101_v42 = vsel %vm1078_vm5, %v1052_v3, %v5504_v50  ;;  %v1102_v45 = vsel %vm1078_vm5, %v1053_v56, %v5505_v0  ;;  %v5523_v10 = vpop.permute.xlu1 %5522  ;;  %5057 = vmatprep.mubr.msk.bf16.mxu0 %vm1159_vm6, %v1137_v21  ;;  %v1005_v17 = vsel %vm980_vm3, %v956_v52, %v5519_v35  ;;  %v5528_v31 = vpop.permute.xlu0 %5527  ;;  %v961_v50 = vsel %vm931_vm2, %v912_v41, %v6062_v18  ;;  %v8113_v18 = vld [vmem:[#allocation11_spill] sm:$0xff] }
  0xde   :  { %v1138_v27 = vpack.c.bf16 %v1102_v45, %v1101_v42  ;;  %v5525_v19 = vunpack.i.h.bf16 %v5523_v10  ;;  %v5524_v8 = vunpack.i.l.bf16 %v5523_v10  ;;  %v5530_v32 = vunpack.i.h.bf16 %v5528_v31 }
  0xdf   :  { %v5529_v14 = vunpack.i.l.bf16 %v5528_v31  ;;  %v962_v11 = vsel %vm931_vm2, %v913_v59, %v7077_v43  ;;  %v963_v40 = vsel %vm931_vm2, %v914_v28, %v7027_v46 }
  0xe0   :  { %5058 = vmatmul.mubr.msk.bf16.gmra.mrb[20].mxu0 %vm1159_vm6, %v1138_v27  ;;  %v1008_v36 = vsel %vm980_vm3, %v959_v63, %v5525_v19  ;;  %v1007_v30 = vsel %vm980_vm3, %v958_v39, %v5524_v8  ;;  %v1055_v9 = vsel %vm1029_vm4, %v1006_v55, %v5530_v32 }
  0xe1   :  { %v5533_v33 = vpop.permute.xlu1 %5532  ;;  %v1054_v13 = vsel %vm1029_vm4, %v1005_v17, %v5529_v14  ;;  %v1104_v0 = vsel %vm1078_vm5, %v1055_v9, %v5520_v38  ;;  %v5538_v22 = vpop.permute.xlu0 %5537 }
  0xe2   :  { %v5535_v34 = vunpack.i.h.bf16 %v5533_v33  ;;  %v5534_v15 = vunpack.i.l.bf16 %v5533_v33  ;;  %v1103_v61 = vsel %vm1078_vm5, %v1054_v13, %v5519_v35  ;;  %v5540_v29 = vunpack.i.h.bf16 %v5538_v22 }
  0xe3   :  { %v1139_v25 = vpack.c.bf16 %v1104_v0, %v1103_v61  ;;  %v5539_v37 = vunpack.i.l.bf16 %v5538_v22 }
  0xe4   :  { %v1056_v49 = vsel %vm1029_vm4, %v1007_v30, %v5534_v15  ;;  %v1057_v51 = vsel %vm1029_vm4, %v1008_v36, %v5535_v34  ;;  %v1010_v52 = vsel %vm980_vm3, %v961_v50, %v5540_v29 }
  0xe5   :  { %v1105_v16 = vsel %vm1078_vm5, %v1056_v49, %v5524_v8  ;;  %v1106_v12 = vsel %vm1078_vm5, %v1057_v51, %v5525_v19  ;;  %v5543_v54 = vpop.permute.xlu1 %5542  ;;  %5061 = vmatprep.mubr.msk.bf16.mxu0 %vm1159_vm6, %v1139_v25  ;;  %v1009_v44 = vsel %vm980_vm3, %v960_v26, %v5539_v37  ;;  %v5548_v6 = vpop.permute.xlu0 %5547  ;;  %v8114_v25 = vld [vmem:[#allocation13_spill] sm:$0xff] }
  0xe6   :  { %v1140_v1 = vpack.c.bf16 %v1106_v12, %v1105_v16  ;;  %v5545_v2 = vunpack.i.h.bf16 %v5543_v54  ;;  %v5544_v53 = vunpack.i.l.bf16 %v5543_v54  ;;  %v5550_v57 = vunpack.i.h.bf16 %v5548_v6  ;;  %v8115_v16 = vld [vmem:[#allocation12_spill] sm:$0xff] }
  0xe7   :  { %v5549_v7 = vunpack.i.l.bf16 %v5548_v6 }
  0xe8   :  { %5062 = vmatmul.mubr.msk.bf16.gmra.mrb[24].mxu0 %vm1159_vm6, %v1140_v1  ;;  %v1012_v43 = vsel %vm980_vm3, %v963_v40, %v5545_v2  ;;  %v1011_v24 = vsel %vm980_vm3, %v962_v11, %v5544_v53  ;;  %v1059_v46 = vsel %vm1029_vm4, %v1010_v52, %v5550_v57  ;;  %v8116_v1 = vld [vmem:[#allocation15_spill] sm:$0xff] }
  0xe9   :  { %v5553_v5 = vpop.permute.xlu1 %5552  ;;  %v1058_v48 = vsel %vm1029_vm4, %v1009_v44, %v5549_v7  ;;  %v1108_v39 = vsel %vm1078_vm5, %v1059_v46, %v5540_v29  ;;  %v5558_v3 = vpop.permute.xlu0 %5557 }
  0xea   :  { %v5555_v4 = vunpack.i.h.bf16 %v5553_v5  ;;  %v5554_v62 = vunpack.i.l.bf16 %v5553_v5  ;;  %v1107_v23 = vsel %vm1078_vm5, %v1058_v48, %v5539_v37  ;;  %v5560_v42 = vunpack.i.h.bf16 %v5558_v3 }
  0xeb   :  { %v1141_v38 = vpack.c.bf16 %v1108_v39, %v1107_v23  ;;  %v5559_v10 = vunpack.i.l.bf16 %v5558_v3 }
  0xec   :  { %v1060_v56 = vsel %vm1029_vm4, %v1011_v24, %v5554_v62  ;;  %v1061_v21 = vsel %vm1029_vm4, %v1012_v43, %v5555_v4  ;;  %v1014_v8 = vsel %vm980_vm3, %v6748_v47, %v5560_v42 }
  0xed   :  { %v1109_v45 = vsel %vm1078_vm5, %v1060_v56, %v5544_v53  ;;  %v1110_v35 = vsel %vm1078_vm5, %v1061_v21, %v5545_v2  ;;  %v5563_v60 = vpop.permute.xlu1 %5562  ;;  %5065 = vmatprep.mubr.msk.bf16.mxu0 %vm1159_vm6, %v1141_v38  ;;  %v1013_v55 = vsel %vm980_vm3, %v6740_v20, %v5559_v10  ;;  %v5568_v17 = vpop.permute.xlu0 %5567  ;;  %v8117_v2 = vld [vmem:[#allocation14_spill] sm:$0xff] }
  0xee   :  { %v1142_v27 = vpack.c.bf16 %v1110_v35, %v1109_v45  ;;  %v5565_v63 = vunpack.i.h.bf16 %v5563_v60  ;;  %v5564_v19 = vunpack.i.l.bf16 %v5563_v60  ;;  %v5570_v31 = vunpack.i.h.bf16 %v5568_v17  ;;  %v8118_v45 = vld [vmem:[#allocation17_spill] sm:$0xff] }
  0xef   :  { %v5569_v32 = vunpack.i.l.bf16 %v5568_v17  ;;  %v8121_v17 = vld [vmem:[#allocation18_spill] sm:$0xff] }
  0xf0   :  { %5066 = vmatmul.mubr.msk.bf16.gmra.mrb[28].mxu0 %vm1159_vm6, %v1142_v27  ;;  %v1016_v14 = vsel %vm980_vm3, %v6759_v58, %v5565_v63  ;;  %v1015_v41 = vsel %vm980_vm3, %v8113_v18, %v5564_v19  ;;  %v1063_v33 = vsel %vm1029_vm4, %v1014_v8, %v5570_v31  ;;  %v8120_v8 = vld [vmem:[#allocation19_spill] sm:$0xff] }
  0xf1   :  { %v5573_v36 = vpop.permute.xlu1 %5572  ;;  %v1062_v30 = vsel %vm1029_vm4, %v1013_v55, %v5569_v32  ;;  %v1112_v59 = vsel %vm1078_vm5, %v1063_v33, %v5560_v42  ;;  %v5578_v13 = vpop.permute.xlu0 %5577 }
  0xf2   :  { %v5575_v47 = vunpack.i.h.bf16 %v5573_v36  ;;  %v5574_v26 = vunpack.i.l.bf16 %v5573_v36  ;;  %v1111_v20 = vsel %vm1078_vm5, %v1062_v30, %v5559_v10  ;;  %v5580_v15 = vunpack.i.h.bf16 %v5578_v13  ;;  %v8119_v10 = vld [vmem:[#allocation16_spill] sm:$0xff] }
  0xf3   :  { %v1143_v58 = vpack.c.bf16 %v1112_v59, %v1111_v20  ;;  %v5579_v50 = vunpack.i.l.bf16 %v5578_v13 }
  0xf4   :  { %v1064_v9 = vsel %vm1029_vm4, %v1015_v41, %v5574_v26  ;;  %v1065_v34 = vsel %vm1029_vm4, %v1016_v14, %v5575_v47  ;;  %v1018_v29 = vsel %vm980_vm3, %v8114_v25, %v5580_v15 }
  0xf5   :  { %v1113_v61 = vsel %vm1078_vm5, %v1064_v9, %v5564_v19  ;;  %v1114_v0 = vsel %vm1078_vm5, %v1065_v34, %v5565_v63  ;;  %v5583_v22 = vpop.permute.xlu1 %5582  ;;  %5069 = vmatprep.mubr.msk.bf16.mxu0 %vm1159_vm6, %v1143_v58  ;;  %v1017_v12 = vsel %vm980_vm3, %v8115_v16, %v5579_v50  ;;  %v5588_v37 = vpop.permute.xlu0 %5587 }
  0xf6   :  { %v1144_v28 = vpack.c.bf16 %v1114_v0, %v1113_v61  ;;  %v5585_v49 = vunpack.i.h.bf16 %v5583_v22  ;;  %v5584_v51 = vunpack.i.l.bf16 %v5583_v22  ;;  %v5590_v11 = vunpack.i.h.bf16 %v5588_v37  ;;  %v8122_v22 = vld [vmem:[#allocation21_spill] sm:$0xff] }
  0xf7   :  { %v5589_v54 = vunpack.i.l.bf16 %v5588_v37 }
  0xf8   :  { %5070 = vmatmul.mubr.msk.bf16.gmra.mrb[32].mxu0 %vm1159_vm6, %v1144_v28  ;;  %v1020_v40 = vsel %vm980_vm3, %v8116_v1, %v5585_v49  ;;  %v1019_v53 = vsel %vm980_vm3, %v8117_v2, %v5584_v51  ;;  %v1067_v6 = vsel %vm1029_vm4, %v1018_v29, %v5590_v11  ;;  %v8125_v11 = vld [vmem:[#allocation22_spill] sm:$0xff] }
  0xf9   :  { %v5593_v52 = vpop.permute.xlu1 %5592  ;;  %v1066_v44 = vsel %vm1029_vm4, %v1017_v12, %v5589_v54  ;;  %v1116_v24 = vsel %vm1078_vm5, %v1067_v6, %v5580_v15  ;;  %v5598_v5 = vpop.permute.xlu0 %5597  ;;  %v8124_v12 = vld [vmem:[#allocation23_spill] sm:$0xff] }
  0xfa   :  { %v5595_v57 = vunpack.i.h.bf16 %v5593_v52  ;;  %v5594_v7 = vunpack.i.l.bf16 %v5593_v52  ;;  %v1115_v43 = vsel %vm1078_vm5, %v1066_v44, %v5579_v50  ;;  %v5600_v62 = vunpack.i.h.bf16 %v5598_v5 }
  0xfb   :  { %v1145_v4 = vpack.c.bf16 %v1116_v24, %v1115_v43  ;;  %v5599_v3 = vunpack.i.l.bf16 %v5598_v5 }
  0xfc   :  { %v1068_v48 = vsel %vm1029_vm4, %v1019_v53, %v5594_v7  ;;  %v1069_v46 = vsel %vm1029_vm4, %v1020_v40, %v5595_v57  ;;  %v1022_v35 = vsel %vm980_vm3, %v8118_v45, %v5600_v62  ;;  %v5640_v57 = vld [vmem:[#allocation6 + $0x20] ss:$8 sps:$4 sm:$0xff]   ;;  %v5654_v45 = vld [vmem:[#allocation6 + $0x84] ss:$8 sps:$4 sm:$0xff]  }
  0xfd   :  { %v1117_v23 = vsel %vm1078_vm5, %v1068_v48, %v5584_v51  ;;  %v1118_v39 = vsel %vm1078_vm5, %v1069_v46, %v5585_v49  ;;  %v5603_v56 = vpop.permute.xlu1 %5602  ;;  %5073 = vmatprep.mubr.msk.bf16.mxu0 %vm1159_vm6, %v1145_v4  ;;  %v1021_v60 = vsel %vm980_vm3, %v8119_v10, %v5599_v3  ;;  %v5608_v27 = vpop.permute.xlu0 %5607  ;;  %v8123_v49 = vld [vmem:[#allocation20_spill] sm:$0xff]  ;;  %5087 = vmatprep.subr.bf16.mxu1 %v5640_v57 }
  0xfe   :  { %v1146_v21 = vpack.c.bf16 %v1118_v39, %v1117_v23  ;;  %v5605_v38 = vunpack.i.h.bf16 %v5603_v56  ;;  %v5604_v42 = vunpack.i.l.bf16 %v5603_v56  ;;  %v5610_v63 = vunpack.i.h.bf16 %v5608_v27  ;;  %5088 = vmatpush3.bf16.msra.mxu1 %v5640_v57  ;;  %v5641_v4 = vld [vmem:[#allocation6 + $0x30] ss:$8 sps:$4 sm:$0xff]   ;;  %v5645_v39 = vld [vmem:[#allocation6 + $0x54] ss:$8 sps:$4 sm:$0xff]   ;;  %v5648_v56 = vld [vmem:[#allocation6 + $0x64] ss:$8 sps:$4 sm:$0xff]  }
  0xff   :  { %v5609_v19 = vunpack.i.l.bf16 %v5608_v27  ;;  %5089 = vmatprep.subr.bf16.mxu1 %v5641_v4  ;;  %v5643_v23 = vld [vmem:[#allocation6 + $0x50] ss:$8 sps:$4 sm:$0xff]   ;;  %2141 = vmatprep.subr.bf16.mxu0 %v5645_v39  ;;  %v5658_v27 = vld [vmem:[#allocation6 + $0xa0] ss:$8 sps:$4 sm:$0xff]  }
 0x100   :  { %5074 = vmatmul.mubr.msk.bf16.gmra.mrb[36].mxu0 %vm1159_vm6, %v1146_v21  ;;  %v1024_v55 = vsel %vm980_vm3, %v8120_v8, %v5605_v38  ;;  %v1023_v31 = vsel %vm980_vm3, %v8121_v17, %v5604_v42  ;;  %v1071_v18 = vsel %vm1029_vm4, %v1022_v35, %v5610_v63  ;;  %v5649_v21 = vld [vmem:[#allocation6 + $0x70] ss:$8 sps:$4 sm:$0xff]   ;;  %v5657_v35 = vld [vmem:[#allocation6 + $0x94] ss:$8 sps:$4 sm:$0xff]   ;;  %v5666_v8 = vld [vmem:[#allocation6 + $0xc4] ss:$8 sps:$4 sm:$0xff]  }
 0x101   :  { %v5613_v32 = vpop.permute.xlu1 %5612  ;;  %v1070_v14 = vsel %vm1029_vm4, %v1021_v60, %v5609_v19  ;;  %v1120_v33 = vsel %vm1078_vm5, %v1071_v18, %v5600_v62  ;;  %v5618_v47 = vpop.permute.xlu0 %5617  ;;  %v5642_v62 = vld [vmem:[#allocation6 + $0x40] ss:$8 sps:$4 sm:$0xff]   ;;  %2142 = vmatpush1.bf16.msra.mxu0 %v5643_v23  ;;  %v5655_v10 = vld [vmem:[#allocation6 + $0x90] ss:$8 sps:$4 sm:$0xff]   ;;  %v5660_v60 = vld [vmem:[#allocation6 + $0xa4] ss:$8 sps:$4 sm:$0xff]  }
 0x102   :  { %v5615_v41 = vunpack.i.h.bf16 %v5613_v32  ;;  %v5614_v36 = vunpack.i.l.bf16 %v5613_v32  ;;  %v1119_v30 = vsel %vm1078_vm5, %v1070_v14, %v5599_v3  ;;  %v5620_v13 = vunpack.i.h.bf16 %v5618_v47  ;;  %5090 = vmatpush3.bf16.msra.mxu1 %v5641_v4  ;;  %v5646_v3 = vld [vmem:[#allocation6 + $0x60] ss:$8 sps:$4 sm:$0xff]   ;;  %2143 = vmatprep.subr.bf16.mxu0 %v5648_v56  ;;  %v5663_v63 = vld [vmem:[#allocation6 + $0xb4] ss:$8 sps:$4 sm:$0xff]   ;;  %v5661_v19 = vld [vmem:[#allocation6 + $0xb0] ss:$8 sps:$4 sm:$0xff]  }
 0x103   :  { %v1147_v59 = vpack.c.bf16 %v1120_v33, %v1119_v30  ;;  %v5619_v58 = vunpack.i.l.bf16 %v5618_v47  ;;  %5091 = vmatprep.subr.bf16.mxu1 %v5642_v62  ;;  %v7421_v17 = vld [vmem:[%s8094_s7] ss:$0 sm:$0xff] }
 0x104   :  { %v1072_v26 = vsel %vm1029_vm4, %v1023_v31, %v5614_v36  ;;  %v1073_v20 = vsel %vm1029_vm4, %v1024_v55, %v5615_v41  ;;  %v1026_v28 = vsel %vm980_vm3, %v8122_v22, %v5620_v13  ;;  %v5664_v55 = vld [vmem:[#allocation6 + $0xc0] ss:$8 sps:$4 sm:$0xff]  }
 0x105   :  { %v1121_v9 = vsel %vm1078_vm5, %v1072_v26, %v5604_v42  ;;  %v1122_v34 = vsel %vm1078_vm5, %v1073_v20, %v5605_v38  ;;  %v5623_v15 = vpop.permute.xlu1 %5622  ;;  %5077 = vmatprep.mubr.msk.bf16.mxu0 %vm1159_vm6, %v1147_v59  ;;  %v1025_v51 = vsel %vm980_vm3, %v8123_v49, %v5619_v58  ;;  %v5628_v25 = vpop.permute.xlu0 %5627  ;;  %2144 = vmatpush1.bf16.msra.mxu0 %v5646_v3  ;;  %v5651_v38 = vld [vmem:[#allocation6 + $0x74] ss:$8 sps:$4 sm:$0xff]   ;;  %v5652_v42 = vld [vmem:[#allocation6 + $0x80] ss:$8 sps:$4 sm:$0xff]  }
 0x106   :  { %v1148_v61 = vpack.c.bf16 %v1122_v34, %v1121_v9  ;;  %v5625_v0 = vunpack.i.h.bf16 %v5623_v15  ;;  %v5624_v50 = vunpack.i.l.bf16 %v5623_v15  ;;  %v5630_v29 = vunpack.i.h.bf16 %v5628_v25  ;;  %5092 = vmatpush3.bf16.msra.mxu1 %v5642_v62  ;;  %2145 = vmatprep.subr.bf16.mxu0 %v5651_v38 }
 0x107   :  { %v5629_v16 = vunpack.i.l.bf16 %v5628_v25 }
 0x108   :  { %5078 = vmatmul.mubr.msk.bf16.gmra.mrb[40].mxu0 %vm1159_vm6, %v1148_v61  ;;  %v1028_v37 = vsel %vm980_vm3, %v8124_v12, %v5625_v0  ;;  %v1027_v54 = vsel %vm980_vm3, %v8125_v11, %v5624_v50  ;;  %v1075_v2 = vsel %vm1029_vm4, %v1026_v28, %v5630_v29 }
 0x109   :  { %v5633_v1 = vpop.permute.xlu1 %5632  ;;  %v1074_v40 = vsel %vm1029_vm4, %v1025_v51, %v5629_v16  ;;  %v1124_v6 = vsel %vm1078_vm5, %v1075_v2, %v5620_v13  ;;  %2146 = vmatpush1.bf16.msra.mxu0 %v5649_v21 }
 0x10a   :  { %v5635_v53 = vunpack.i.h.bf16 %v5633_v1  ;;  %v5634_v52 = vunpack.i.l.bf16 %v5633_v1  ;;  %v1123_v44 = vsel %vm1078_vm5, %v1074_v40, %v5619_v58  ;;  %2147 = vmatprep.subr.bf16.mxu0 %v5654_v45 }
 0x10b   :  { %v1149_v24 = vpack.c.bf16 %v1124_v6, %v1123_v44 }
 0x10c   :  { %v1076_v7 = vsel %vm1029_vm4, %v1027_v54, %v5634_v52  ;;  %v1077_v43 = vsel %vm1029_vm4, %v1028_v37, %v5635_v53 }
 0x10d   :  { %v1125_v5 = vsel %vm1078_vm5, %v1076_v7, %v5624_v50  ;;  %v1126_v48 = vsel %vm1078_vm5, %v1077_v43, %v5625_v0  ;;  %5081 = vmatprep.mubr.msk.bf16.mxu0 %vm1159_vm6, %v1149_v24  ;;  %2148 = vmatpush1.bf16.msra.mxu0 %v5652_v42 }
 0x10e   :  { %v1150_v46 = vpack.c.bf16 %v1126_v48, %v1125_v5  ;;  %2149 = vmatprep.subr.bf16.mxu0 %v5657_v35 }
 0x110   :  { %5082 = vmatmul.mubr.msk.bf16.gmra.mrb[44].mxu0 %vm1159_vm6, %v1150_v46 }
 0x111   :  { %2150 = vmatpush1.bf16.msra.mxu0 %v5655_v10 }
 0x112   :  { %2151 = vmatprep.subr.bf16.mxu0 %v5660_v60 }
 0x115   :  { %2152 = vmatpush1.bf16.msra.mxu0 %v5658_v27 }
 0x116   :  { %2153 = vmatprep.subr.bf16.mxu0 %v5663_v63 }
 0x119   :  { %2154 = vmatpush1.bf16.msra.mxu0 %v5661_v19 }
 0x11a   :  { %2155 = vmatprep.subr.bf16.mxu0 %v5666_v8 }
 0x11d   :  { %2156 = vmatpush1.bf16.msra.mxu0 %v5664_v55 }
 0x18b   :  { %v5039_v31 = vpop.f32.mrb[0].mxu0 }
 0x18c   :  { %v1279_v32 = vadd.f32 %v5039_v31, %v7421_v17  ;;  %v1270_v14 = vpop.f32.mrb[1].mxu0 }
 0x18d   :  { %v1271_v18 = vadd.f32 %v1270_v14, %v7421_v17  ;;  %v5040_v41 = vpop.f32.mrb[2].mxu0 }
 0x18e   :  { %v1463_v36 = vmul.f32 0.01, %v1279_v32  ;;  %v1282_v30 = vadd.f32 %v5040_v41, %v7421_v17  ;;  %v1273_v33 = vpop.f32.mrb[3].mxu0 }
 0x18f   :  { %v1461_v47 = vmul.f32 0.01, %v1271_v18  ;;  %v1274_v26 = vadd.f32 %v1273_v33, %v7421_v17 }
 0x190   :  { %v1464_v20 = vmul.f32 0.01, %v1282_v30  ;;  %v1511_v13 = vmax.f32 %v1279_v32, %v1463_v36 }
 0x191   :  { %v1462_v59 = vmul.f32 0.01, %v1274_v26  ;;  %v1509_v34 = vmax.f32 %v1271_v18, %v1461_v47 }
 0x192   :  { %v1512_v9 = vmax.f32 %v1282_v30, %v1464_v20 }
 0x193   :  { %v1510_v58 = vmax.f32 %v1274_v26, %v1462_v59  ;;  %v5043_v61 = vpop.f32.mrb[4].mxu0 }
 0x194   :  { %v1558_v15 = vpack.c.bf16 %v1512_v9, %v1511_v13  ;;  %v1295_v0 = vadd.f32 %v5043_v61, %v7421_v17  ;;  %v1286_v50 = vpop.f32.mrb[5].mxu0 }
 0x195   :  { %v1557_v22 = vpack.c.bf16 %v1510_v58, %v1509_v34  ;;  %v1287_v28 = vadd.f32 %v1286_v50, %v7421_v17  ;;  %v5044_v49 = vpop.f32.mrb[6].mxu0 }
 0x196   :  { %v1467_v51 = vmul.f32 0.01, %v1295_v0  ;;  %v1298_v25 = vadd.f32 %v5044_v49, %v7421_v17  ;;  %v1289_v29 = vpop.f32.mrb[7].mxu0 }
 0x197   :  { %5093 = vmatprep.mubr.msk.bf16.mxu1 %vm1614_vm7, %v1557_v22  ;;  %v1465_v16 = vmul.f32 0.01, %v1287_v28  ;;  %v1290_v12 = vadd.f32 %v1289_v29, %v7421_v17 }
 0x198   :  { %5094 = vmatmul.mubr.msk.bf16.vlgmr.msra.gmra.mrb[0].mxu1 %vm1614_vm7, %v1558_v15  ;;  %v1515_v37 = vmax.f32 %v1295_v0, %v1467_v51  ;;  %v1468_v11 = vmul.f32 0.01, %v1298_v25 }
 0x199   :  { %v1466_v54 = vmul.f32 0.01, %v1290_v12  ;;  %v1513_v40 = vmax.f32 %v1287_v28, %v1465_v16 }
 0x19a   :  { %v1516_v1 = vmax.f32 %v1298_v25, %v1468_v11 }
 0x19b   :  { %v1514_v2 = vmax.f32 %v1290_v12, %v1466_v54  ;;  %v5047_v53 = vpop.f32.mrb[8].mxu0 }
 0x19c   :  { %v1560_v52 = vpack.c.bf16 %v1516_v1, %v1515_v37  ;;  %v1311_v44 = vadd.f32 %v5047_v53, %v7421_v17  ;;  %v1302_v6 = vpop.f32.mrb[9].mxu0 }
 0x19d   :  { %v1559_v57 = vpack.c.bf16 %v1514_v2, %v1513_v40  ;;  %v1303_v7 = vadd.f32 %v1302_v6, %v7421_v17  ;;  %v5048_v43 = vpop.f32.mrb[10].mxu0 }
 0x19e   :  { %v1471_v24 = vmul.f32 0.01, %v1311_v44  ;;  %v1314_v5 = vadd.f32 %v5048_v43, %v7421_v17  ;;  %v1305_v48 = vpop.f32.mrb[11].mxu0 }
 0x19f   :  { %v1469_v46 = vmul.f32 0.01, %v1303_v7  ;;  %v1306_v4 = vadd.f32 %v1305_v48, %v7421_v17  ;;  %5097 = vmatprep.mubr.msk.bf16.mxu1 %vm1614_vm7, %v1559_v57 }
 0x1a0   :  { %v1519_v62 = vmax.f32 %v1311_v44, %v1471_v24  ;;  %v1472_v23 = vmul.f32 0.01, %v1314_v5  ;;  %5098 = vmatmul.mubr.msk.bf16.gmra.mrb[4].mxu1 %vm1614_vm7, %v1560_v52 }
 0x1a1   :  { %v1517_v39 = vmax.f32 %v1303_v7, %v1469_v46  ;;  %v1470_v3 = vmul.f32 0.01, %v1306_v4 }
 0x1a2   :  { %v1520_v56 = vmax.f32 %v1314_v5, %v1472_v23 }
 0x1a3   :  { %v1518_v21 = vmax.f32 %v1306_v4, %v1470_v3  ;;  %v5051_v38 = vpop.f32.mrb[12].mxu0 }
 0x1a4   :  { %v1562_v42 = vpack.c.bf16 %v1520_v56, %v1519_v62  ;;  %v1327_v45 = vadd.f32 %v5051_v38, %v7421_v17  ;;  %v1318_v35 = vpop.f32.mrb[13].mxu0 }
 0x1a5   :  { %v1561_v10 = vpack.c.bf16 %v1518_v21, %v1517_v39  ;;  %v1319_v60 = vadd.f32 %v1318_v35, %v7421_v17  ;;  %v5052_v27 = vpop.f32.mrb[14].mxu0 }
 0x1a6   :  { %v1475_v63 = vmul.f32 0.01, %v1327_v45  ;;  %v1330_v19 = vadd.f32 %v5052_v27, %v7421_v17  ;;  %v1321_v8 = vpop.f32.mrb[15].mxu0 }
 0x1a7   :  { %5101 = vmatprep.mubr.msk.bf16.mxu1 %vm1614_vm7, %v1561_v10  ;;  %v1473_v55 = vmul.f32 0.01, %v1319_v60  ;;  %v1322_v31 = vadd.f32 %v1321_v8, %v7421_v17 }
 0x1a8   :  { %5102 = vmatmul.mubr.msk.bf16.gmra.mrb[8].mxu1 %vm1614_vm7, %v1562_v42  ;;  %v1523_v32 = vmax.f32 %v1327_v45, %v1475_v63  ;;  %v1476_v14 = vmul.f32 0.01, %v1330_v19 }
 0x1a9   :  { %v1521_v18 = vmax.f32 %v1319_v60, %v1473_v55  ;;  %v1474_v41 = vmul.f32 0.01, %v1322_v31 }
 0x1aa   :  { %v1524_v36 = vmax.f32 %v1330_v19, %v1476_v14 }
 0x1ab   :  { %v1522_v30 = vmax.f32 %v1322_v31, %v1474_v41  ;;  %v5055_v33 = vpop.f32.mrb[16].mxu0 }
 0x1ac   :  { %v1564_v47 = vpack.c.bf16 %v1524_v36, %v1523_v32  ;;  %v1343_v26 = vadd.f32 %v5055_v33, %v7421_v17  ;;  %v1334_v20 = vpop.f32.mrb[17].mxu0 }
 0x1ad   :  { %v1563_v59 = vpack.c.bf16 %v1522_v30, %v1521_v18  ;;  %v1335_v13 = vadd.f32 %v1334_v20, %v7421_v17  ;;  %v5056_v9 = vpop.f32.mrb[18].mxu0 }
 0x1ae   :  { %v1479_v34 = vmul.f32 0.01, %v1343_v26  ;;  %v1346_v58 = vadd.f32 %v5056_v9, %v7421_v17  ;;  %v1337_v15 = vpop.f32.mrb[19].mxu0 }
 0x1af   :  { %5105 = vmatprep.mubr.msk.bf16.mxu1 %vm1614_vm7, %v1563_v59  ;;  %v1477_v61 = vmul.f32 0.01, %v1335_v13  ;;  %v1338_v0 = vadd.f32 %v1337_v15, %v7421_v17 }
 0x1b0   :  { %5106 = vmatmul.mubr.msk.bf16.gmra.mrb[12].mxu1 %vm1614_vm7, %v1564_v47  ;;  %v1527_v50 = vmax.f32 %v1343_v26, %v1479_v34  ;;  %v1480_v22 = vmul.f32 0.01, %v1346_v58 }
 0x1b1   :  { %v1525_v28 = vmax.f32 %v1335_v13, %v1477_v61  ;;  %v1478_v49 = vmul.f32 0.01, %v1338_v0 }
 0x1b2   :  { %v1528_v51 = vmax.f32 %v1346_v58, %v1480_v22 }
 0x1b3   :  { %v1526_v25 = vmax.f32 %v1338_v0, %v1478_v49  ;;  %v5059_v29 = vpop.f32.mrb[20].mxu0 }
 0x1b4   :  { %v1566_v16 = vpack.c.bf16 %v1528_v51, %v1527_v50  ;;  %v1359_v12 = vadd.f32 %v5059_v29, %v7421_v17  ;;  %v1350_v37 = vpop.f32.mrb[21].mxu0 }
 0x1b5   :  { %v1565_v11 = vpack.c.bf16 %v1526_v25, %v1525_v28  ;;  %v1351_v54 = vadd.f32 %v1350_v37, %v7421_v17  ;;  %v5060_v1 = vpop.f32.mrb[22].mxu0 }
 0x1b6   :  { %v1483_v40 = vmul.f32 0.01, %v1359_v12  ;;  %v1362_v2 = vadd.f32 %v5060_v1, %v7421_v17  ;;  %v1353_v53 = vpop.f32.mrb[23].mxu0 }
 0x1b7   :  { %5109 = vmatprep.mubr.msk.bf16.mxu1 %vm1614_vm7, %v1565_v11  ;;  %v1481_v52 = vmul.f32 0.01, %v1351_v54  ;;  %v1354_v44 = vadd.f32 %v1353_v53, %v7421_v17 }
 0x1b8   :  { %5110 = vmatmul.mubr.msk.bf16.gmra.mrb[16].mxu1 %vm1614_vm7, %v1566_v16  ;;  %v1531_v6 = vmax.f32 %v1359_v12, %v1483_v40  ;;  %v1484_v57 = vmul.f32 0.01, %v1362_v2 }
 0x1b9   :  { %v1529_v7 = vmax.f32 %v1351_v54, %v1481_v52  ;;  %v1482_v43 = vmul.f32 0.01, %v1354_v44 }
 0x1ba   :  { %v1532_v24 = vmax.f32 %v1362_v2, %v1484_v57 }
 0x1bb   :  { %v1530_v5 = vmax.f32 %v1354_v44, %v1482_v43  ;;  %v5063_v48 = vpop.f32.mrb[24].mxu0 }
 0x1bc   :  { %v1568_v46 = vpack.c.bf16 %v1532_v24, %v1531_v6  ;;  %v1375_v4 = vadd.f32 %v5063_v48, %v7421_v17  ;;  %v1366_v62 = vpop.f32.mrb[25].mxu0 }
 0x1bd   :  { %v1567_v23 = vpack.c.bf16 %v1530_v5, %v1529_v7  ;;  %v1367_v39 = vadd.f32 %v1366_v62, %v7421_v17  ;;  %v5064_v3 = vpop.f32.mrb[26].mxu0 }
 0x1be   :  { %v1487_v56 = vmul.f32 0.01, %v1375_v4  ;;  %v1378_v21 = vadd.f32 %v5064_v3, %v7421_v17  ;;  %v1369_v38 = vpop.f32.mrb[27].mxu0 }
 0x1bf   :  { %5113 = vmatprep.mubr.msk.bf16.mxu1 %vm1614_vm7, %v1567_v23  ;;  %v1485_v42 = vmul.f32 0.01, %v1367_v39  ;;  %v1370_v45 = vadd.f32 %v1369_v38, %v7421_v17 }
 0x1c0   :  { %5114 = vmatmul.mubr.msk.bf16.gmra.mrb[20].mxu1 %vm1614_vm7, %v1568_v46  ;;  %v1535_v35 = vmax.f32 %v1375_v4, %v1487_v56  ;;  %v1488_v10 = vmul.f32 0.01, %v1378_v21 }
 0x1c1   :  { %v1533_v60 = vmax.f32 %v1367_v39, %v1485_v42  ;;  %v1486_v27 = vmul.f32 0.01, %v1370_v45 }
 0x1c2   :  { %v1536_v63 = vmax.f32 %v1378_v21, %v1488_v10 }
 0x1c3   :  { %v1534_v19 = vmax.f32 %v1370_v45, %v1486_v27  ;;  %v5067_v8 = vpop.f32.mrb[28].mxu0 }
 0x1c4   :  { %v1570_v55 = vpack.c.bf16 %v1536_v63, %v1535_v35  ;;  %v1391_v31 = vadd.f32 %v5067_v8, %v7421_v17  ;;  %v1382_v32 = vpop.f32.mrb[29].mxu0 }
 0x1c5   :  { %v1569_v14 = vpack.c.bf16 %v1534_v19, %v1533_v60  ;;  %v1383_v18 = vadd.f32 %v1382_v32, %v7421_v17  ;;  %v5068_v41 = vpop.f32.mrb[30].mxu0 }
 0x1c6   :  { %v1491_v36 = vmul.f32 0.01, %v1391_v31  ;;  %v1394_v30 = vadd.f32 %v5068_v41, %v7421_v17  ;;  %v1385_v33 = vpop.f32.mrb[31].mxu0 }
 0x1c7   :  { %5117 = vmatprep.mubr.msk.bf16.mxu1 %vm1614_vm7, %v1569_v14  ;;  %v1489_v47 = vmul.f32 0.01, %v1383_v18  ;;  %v1386_v26 = vadd.f32 %v1385_v33, %v7421_v17 }
 0x1c8   :  { %5118 = vmatmul.mubr.msk.bf16.gmra.mrb[24].mxu1 %vm1614_vm7, %v1570_v55  ;;  %v1539_v20 = vmax.f32 %v1391_v31, %v1491_v36  ;;  %v1492_v59 = vmul.f32 0.01, %v1394_v30 }
 0x1c9   :  { %v1537_v13 = vmax.f32 %v1383_v18, %v1489_v47  ;;  %v1490_v9 = vmul.f32 0.01, %v1386_v26 }
 0x1ca   :  { %v1540_v34 = vmax.f32 %v1394_v30, %v1492_v59 }
 0x1cb   :  { %v1538_v58 = vmax.f32 %v1386_v26, %v1490_v9  ;;  %v5071_v15 = vpop.f32.mrb[32].mxu0 }
 0x1cc   :  { %v1572_v61 = vpack.c.bf16 %v1540_v34, %v1539_v20  ;;  %v1407_v0 = vadd.f32 %v5071_v15, %v7421_v17  ;;  %v1398_v50 = vpop.f32.mrb[33].mxu0 }
 0x1cd   :  { %v1571_v22 = vpack.c.bf16 %v1538_v58, %v1537_v13  ;;  %v1399_v28 = vadd.f32 %v1398_v50, %v7421_v17  ;;  %v5072_v49 = vpop.f32.mrb[34].mxu0 }
 0x1ce   :  { %v1495_v51 = vmul.f32 0.01, %v1407_v0  ;;  %v1410_v25 = vadd.f32 %v5072_v49, %v7421_v17  ;;  %v1401_v29 = vpop.f32.mrb[35].mxu0 }
 0x1cf   :  { %5121 = vmatprep.mubr.msk.bf16.mxu1 %vm1614_vm7, %v1571_v22  ;;  %v1493_v16 = vmul.f32 0.01, %v1399_v28  ;;  %v1402_v12 = vadd.f32 %v1401_v29, %v7421_v17 }
 0x1d0   :  { %5122 = vmatmul.mubr.msk.bf16.gmra.mrb[28].mxu1 %vm1614_vm7, %v1572_v61  ;;  %v1543_v37 = vmax.f32 %v1407_v0, %v1495_v51  ;;  %v1496_v11 = vmul.f32 0.01, %v1410_v25 }
 0x1d1   :  { %v1541_v54 = vmax.f32 %v1399_v28, %v1493_v16  ;;  %v1494_v1 = vmul.f32 0.01, %v1402_v12 }
 0x1d2   :  { %v1544_v40 = vmax.f32 %v1410_v25, %v1496_v11 }
 0x1d3   :  { %v1542_v2 = vmax.f32 %v1402_v12, %v1494_v1  ;;  %v5075_v53 = vpop.f32.mrb[36].mxu0  ;;  %v6130_v12 = vmov 0  }
 0x1d4   :  { %v1574_v52 = vpack.c.bf16 %v1544_v40, %v1543_v37  ;;  %v1423_v44 = vadd.f32 %v5075_v53, %v7421_v17  ;;  %v1414_v6 = vpop.f32.mrb[37].mxu0  ;;  %2173 = vmatprep.mubr.bf16.mxu0 %v6130_v12  ;;  %5637 = vset.pattern.permute.xlu0 %v6130_v12 }
 0x1d5   :  { %v1573_v57 = vpack.c.bf16 %v1542_v2, %v1541_v54  ;;  %v1415_v7 = vadd.f32 %v1414_v6, %v7421_v17  ;;  %v5076_v43 = vpop.f32.mrb[38].mxu0  ;;  %5636 = vset.pattern.permute.xlu1 %v6130_v12 }
 0x1d6   :  { %v1499_v24 = vmul.f32 0.01, %v1423_v44  ;;  %v1426_v5 = vadd.f32 %v5076_v43, %v7421_v17  ;;  %v1417_v48 = vpop.f32.mrb[39].mxu0 }
 0x1d7   :  { %5125 = vmatprep.mubr.msk.bf16.mxu1 %vm1614_vm7, %v1573_v57  ;;  %v1497_v46 = vmul.f32 0.01, %v1415_v7  ;;  %v1418_v4 = vadd.f32 %v1417_v48, %v7421_v17 }
 0x1d8   :  { %5126 = vmatmul.mubr.msk.bf16.gmra.mrb[32].mxu1 %vm1614_vm7, %v1574_v52  ;;  %v1547_v62 = vmax.f32 %v1423_v44, %v1499_v24  ;;  %v1500_v23 = vmul.f32 0.01, %v1426_v5 }
 0x1d9   :  { %v1545_v39 = vmax.f32 %v1415_v7, %v1497_v46  ;;  %v1498_v3 = vmul.f32 0.01, %v1418_v4 }
 0x1da   :  { %v1548_v56 = vmax.f32 %v1426_v5, %v1500_v23 }
 0x1db   :  { %v1546_v21 = vmax.f32 %v1418_v4, %v1498_v3  ;;  %v5079_v38 = vpop.f32.mrb[40].mxu0 }
 0x1dc   :  { %v1576_v42 = vpack.c.bf16 %v1548_v56, %v1547_v62  ;;  %v1439_v45 = vadd.f32 %v5079_v38, %v7421_v17  ;;  %v1430_v35 = vpop.f32.mrb[41].mxu0 }
 0x1dd   :  { %v1575_v10 = vpack.c.bf16 %v1546_v21, %v1545_v39  ;;  %v1431_v60 = vadd.f32 %v1430_v35, %v7421_v17  ;;  %v5080_v27 = vpop.f32.mrb[42].mxu0 }
 0x1de   :  { %v1503_v63 = vmul.f32 0.01, %v1439_v45  ;;  %v1442_v19 = vadd.f32 %v5080_v27, %v7421_v17  ;;  %v1433_v8 = vpop.f32.mrb[43].mxu0 }
 0x1df   :  { %5129 = vmatprep.mubr.msk.bf16.mxu1 %vm1614_vm7, %v1575_v10  ;;  %v1501_v55 = vmul.f32 0.01, %v1431_v60  ;;  %v1434_v31 = vadd.f32 %v1433_v8, %v7421_v17 }
 0x1e0   :  { %5130 = vmatmul.mubr.msk.bf16.gmra.mrb[36].mxu1 %vm1614_vm7, %v1576_v42  ;;  %v1551_v32 = vmax.f32 %v1439_v45, %v1503_v63  ;;  %v1504_v14 = vmul.f32 0.01, %v1442_v19 }
 0x1e1   :  { %v1549_v18 = vmax.f32 %v1431_v60, %v1501_v55  ;;  %v1502_v41 = vmul.f32 0.01, %v1434_v31 }
 0x1e2   :  { %v1552_v36 = vmax.f32 %v1442_v19, %v1504_v14 }
 0x1e3   :  { %v1550_v30 = vmax.f32 %v1434_v31, %v1502_v41  ;;  %v5083_v33 = vpop.f32.mrb[44].mxu0 }
 0x1e4   :  { %v1578_v47 = vpack.c.bf16 %v1552_v36, %v1551_v32  ;;  %v1455_v26 = vadd.f32 %v5083_v33, %v7421_v17  ;;  %v1446_v20 = vpop.f32.mrb[45].mxu0 }
 0x1e5   :  { %v1577_v59 = vpack.c.bf16 %v1550_v30, %v1549_v18  ;;  %v1447_v13 = vadd.f32 %v1446_v20, %v7421_v17  ;;  %v5084_v9 = vpop.f32.mrb[46].mxu0 }
 0x1e6   :  { %v1507_v34 = vmul.f32 0.01, %v1455_v26  ;;  %v1458_v58 = vadd.f32 %v5084_v9, %v7421_v17  ;;  %v1449_v15 = vpop.f32.mrb[47].mxu0 }
 0x1e7   :  { %5133 = vmatprep.mubr.msk.bf16.mxu1 %vm1614_vm7, %v1577_v59  ;;  %v1505_v61 = vmul.f32 0.01, %v1447_v13  ;;  %v1450_v0 = vadd.f32 %v1449_v15, %v7421_v17  ;;  %v7501_v17 = vld [vmem:[%s8094_s7 + $0x1] ss:$0 sm:$0xff] }
 0x1e8   :  { %5134 = vmatmul.mubr.msk.bf16.gmra.mrb[40].mxu1 %vm1614_vm7, %v1578_v47  ;;  %v1555_v50 = vmax.f32 %v1455_v26, %v1507_v34  ;;  %v1508_v22 = vmul.f32 0.01, %v1458_v58 }
 0x1e9   :  { %v1553_v28 = vmax.f32 %v1447_v13, %v1505_v61  ;;  %v1506_v49 = vmul.f32 0.01, %v1450_v0 }
 0x1ea   :  { %v1556_v51 = vmax.f32 %v1458_v58, %v1508_v22 }
 0x1eb   :  { %v1554_v25 = vmax.f32 %v1450_v0, %v1506_v49 }
 0x1ec   :  { %v1580_v29 = vpack.c.bf16 %v1556_v51, %v1555_v50 }
 0x1ed   :  { %v1579_v16 = vpack.c.bf16 %v1554_v25, %v1553_v28 }
 0x1ef   :  { %5137 = vmatprep.mubr.msk.bf16.mxu1 %vm1614_vm7, %v1579_v16 }
 0x1f0   :  { %5138 = vmatmul.mubr.msk.bf16.gmra.mrb[44].mxu1 %vm1614_vm7, %v1580_v29 }
 0x26b   :  { %v5095_v37 = vpop.f32.mrb[0].mxu1 }
 0x26c   :  { %v1730_v11 = vadd.f32 %v5095_v37, %v7501_v17  ;;  %v1721_v54 = vpop.f32.mrb[1].mxu1 }
 0x26d   :  { %v1722_v1 = vadd.f32 %v1721_v54, %v7501_v17  ;;  %v5096_v40 = vpop.f32.mrb[2].mxu1 }
 0x26e   :  { %v1914_v2 = vmul.f32 0.01, %v1730_v11  ;;  %v1733_v53 = vadd.f32 %v5096_v40, %v7501_v17  ;;  %v1724_v52 = vpop.f32.mrb[3].mxu1 }
 0x26f   :  { %v1912_v44 = vmul.f32 0.01, %v1722_v1  ;;  %v1725_v6 = vadd.f32 %v1724_v52, %v7501_v17 }
 0x270   :  { %v1915_v57 = vmul.f32 0.01, %v1733_v53  ;;  %v1962_v43 = vmax.f32 %v1730_v11, %v1914_v2 }
 0x271   :  { %v1913_v7 = vmul.f32 0.01, %v1725_v6  ;;  %v1960_v5 = vmax.f32 %v1722_v1, %v1912_v44 }
 0x272   :  { %v1963_v24 = vmax.f32 %v1733_v53, %v1915_v57 }
 0x273   :  { %v1961_v48 = vmax.f32 %v1725_v6, %v1913_v7  ;;  %v5099_v46 = vpop.f32.mrb[4].mxu1 }
 0x274   :  { %v2009_v4 = vpack.c.bf16 %v1963_v24, %v1962_v43  ;;  %v1746_v23 = vadd.f32 %v5099_v46, %v7501_v17  ;;  %v1737_v39 = vpop.f32.mrb[5].mxu1 }
 0x275   :  { %v2008_v62 = vpack.c.bf16 %v1961_v48, %v1960_v5  ;;  %v1738_v3 = vadd.f32 %v1737_v39, %v7501_v17  ;;  %v5100_v56 = vpop.f32.mrb[6].mxu1 }
 0x276   :  { %v1918_v21 = vmul.f32 0.01, %v1746_v23  ;;  %v1749_v38 = vadd.f32 %v5100_v56, %v7501_v17  ;;  %v1740_v42 = vpop.f32.mrb[7].mxu1 }
 0x277   :  { %2174 = vmatmul.mubr.bf16.vlgmr.msra.gmra.mrb[48].mxu0 %v2008_v62  ;;  %v1916_v45 = vmul.f32 0.01, %v1738_v3  ;;  %v1741_v35 = vadd.f32 %v1740_v42, %v7501_v17 }
 0x278   :  { %2183 = vmatprep.mubr.bf16.mxu0 %v6130_v12  ;;  %v1919_v10 = vmul.f32 0.01, %v1749_v38  ;;  %v1966_v27 = vmax.f32 %v1746_v23, %v1918_v21 }
 0x279   :  { %v1917_v60 = vmul.f32 0.01, %v1741_v35  ;;  %v1964_v19 = vmax.f32 %v1738_v3, %v1916_v45 }
 0x27a   :  { %v1967_v63 = vmax.f32 %v1749_v38, %v1919_v10 }
 0x27b   :  { %v1965_v8 = vmax.f32 %v1741_v35, %v1917_v60  ;;  %v5103_v55 = vpop.f32.mrb[8].mxu1 }
 0x27c   :  { %v1762_v31 = vadd.f32 %v5103_v55, %v7501_v17  ;;  %v1753_v32 = vpop.f32.mrb[9].mxu1  ;;  %v2011_v14 = vpack.c.bf16 %v1967_v63, %v1966_v27 }
 0x27d   :  { %v1754_v18 = vadd.f32 %v1753_v32, %v7501_v17  ;;  %v5104_v41 = vpop.f32.mrb[10].mxu1  ;;  %v2010_v36 = vpack.c.bf16 %v1965_v8, %v1964_v19 }
 0x27e   :  { %v1922_v30 = vmul.f32 0.01, %v1762_v31  ;;  %v1765_v33 = vadd.f32 %v5104_v41, %v7501_v17  ;;  %v1756_v47 = vpop.f32.mrb[11].mxu1 }
 0x27f   :  { %2184 = vmatmul.mubr.bf16.gmra.mrb[52].mxu0 %v2009_v4  ;;  %v1920_v26 = vmul.f32 0.01, %v1754_v18  ;;  %v1757_v20 = vadd.f32 %v1756_v47, %v7501_v17 }
 0x280   :  { %2193 = vmatprep.mubr.bf16.mxu0 %v6130_v12  ;;  %v1970_v59 = vmax.f32 %v1762_v31, %v1922_v30  ;;  %v1923_v13 = vmul.f32 0.01, %v1765_v33 }
 0x281   :  { %v1968_v9 = vmax.f32 %v1754_v18, %v1920_v26  ;;  %v1921_v34 = vmul.f32 0.01, %v1757_v20 }
 0x282   :  { %v1971_v58 = vmax.f32 %v1765_v33, %v1923_v13 }
 0x283   :  { %v1969_v15 = vmax.f32 %v1757_v20, %v1921_v34  ;;  %v5107_v61 = vpop.f32.mrb[12].mxu1 }
 0x284   :  { %v1778_v0 = vadd.f32 %v5107_v61, %v7501_v17  ;;  %v1769_v50 = vpop.f32.mrb[13].mxu1  ;;  %v7518_v22 = vpack.c.bf16 %v1971_v58, %v1970_v59 }
 0x285   :  { %v1770_v28 = vadd.f32 %v1769_v50, %v7501_v17  ;;  %v5108_v49 = vpop.f32.mrb[14].mxu1  ;;  %v2012_v51 = vpack.c.bf16 %v1969_v15, %v1968_v9 }
 0x286   :  { %v1926_v25 = vmul.f32 0.01, %v1778_v0  ;;  %v1781_v29 = vadd.f32 %v5108_v49, %v7501_v17  ;;  %v1772_v16 = vpop.f32.mrb[15].mxu1 }
 0x287   :  { %2194 = vmatmul.mubr.bf16.gmra.mrb[56].mxu0 %v2010_v36  ;;  %v1924_v37 = vmul.f32 0.01, %v1770_v28  ;;  %v1773_v11 = vadd.f32 %v1772_v16, %v7501_v17 }
 0x288   :  { %2203 = vmatprep.mubr.bf16.mxu0 %v6130_v12  ;;  %v1974_v54 = vmax.f32 %v1778_v0, %v1926_v25  ;;  %v1927_v1 = vmul.f32 0.01, %v1781_v29 }
 0x289   :  { %v1972_v40 = vmax.f32 %v1770_v28, %v1924_v37  ;;  %v1925_v2 = vmul.f32 0.01, %v1773_v11 }
 0x28a   :  { %v1975_v53 = vmax.f32 %v1781_v29, %v1927_v1 }
 0x28b   :  { %v1973_v52 = vmax.f32 %v1773_v11, %v1925_v2  ;;  %v5111_v44 = vpop.f32.mrb[16].mxu1 }
 0x28c   :  { %v1794_v6 = vadd.f32 %v5111_v44, %v7501_v17  ;;  %v1785_v57 = vpop.f32.mrb[17].mxu1  ;;  %v7525_v7 = vpack.c.bf16 %v1975_v53, %v1974_v54 }
 0x28d   :  { %v1786_v43 = vadd.f32 %v1785_v57, %v7501_v17  ;;  %v5112_v24 = vpop.f32.mrb[18].mxu1  ;;  %v2014_v5 = vpack.c.bf16 %v1973_v52, %v1972_v40 }
 0x28e   :  { %v1930_v48 = vmul.f32 0.01, %v1794_v6  ;;  %v1797_v46 = vadd.f32 %v5112_v24, %v7501_v17  ;;  %v1788_v4 = vpop.f32.mrb[19].mxu1 }
 0x28f   :  { %2204 = vmatmul.mubr.bf16.gmra.mrb[60].mxu0 %v2011_v14  ;;  %v1928_v62 = vmul.f32 0.01, %v1786_v43  ;;  %v1789_v23 = vadd.f32 %v1788_v4, %v7501_v17 }
 0x290   :  { %2213 = vmatprep.mubr.bf16.mxu0 %v6130_v12  ;;  %v1978_v39 = vmax.f32 %v1794_v6, %v1930_v48  ;;  %v1931_v3 = vmul.f32 0.01, %v1797_v46 }
 0x291   :  { %v1976_v56 = vmax.f32 %v1786_v43, %v1928_v62  ;;  %v1929_v21 = vmul.f32 0.01, %v1789_v23 }
 0x292   :  { %v1979_v38 = vmax.f32 %v1797_v46, %v1931_v3 }
 0x293   :  { %v1977_v42 = vmax.f32 %v1789_v23, %v1929_v21  ;;  %v5115_v45 = vpop.f32.mrb[20].mxu1 }
 0x294   :  { %v1810_v35 = vadd.f32 %v5115_v45, %v7501_v17  ;;  %v1801_v10 = vpop.f32.mrb[21].mxu1  ;;  %v7532_v60 = vpack.c.bf16 %v1979_v38, %v1978_v39 }
 0x295   :  { %v1802_v27 = vadd.f32 %v1801_v10, %v7501_v17  ;;  %v5116_v63 = vpop.f32.mrb[22].mxu1  ;;  %v7535_v19 = vpack.c.bf16 %v1977_v42, %v1976_v56 }
 0x296   :  { %v1934_v8 = vmul.f32 0.01, %v1810_v35  ;;  %v1813_v55 = vadd.f32 %v5116_v63, %v7501_v17  ;;  %v1804_v31 = vpop.f32.mrb[23].mxu1 }
 0x297   :  { %2214 = vmatmul.mubr.bf16.gmra.mrb[64].mxu0 %v2012_v51  ;;  %v1932_v32 = vmul.f32 0.01, %v1802_v27  ;;  %v1805_v14 = vadd.f32 %v1804_v31, %v7501_v17 }
 0x298   :  { %2223 = vmatprep.mubr.bf16.mxu0 %v6130_v12  ;;  %v1982_v18 = vmax.f32 %v1810_v35, %v1934_v8  ;;  %v1935_v41 = vmul.f32 0.01, %v1813_v55 }
 0x299   :  { %v1980_v36 = vmax.f32 %v1802_v27, %v1932_v32  ;;  %v1933_v30 = vmul.f32 0.01, %v1805_v14 }
 0x29a   :  { %v1983_v33 = vmax.f32 %v1813_v55, %v1935_v41 }
 0x29b   :  { %v1981_v47 = vmax.f32 %v1805_v14, %v1933_v30  ;;  %v5119_v26 = vpop.f32.mrb[24].mxu1 }
 0x29c   :  { %v1826_v20 = vadd.f32 %v5119_v26, %v7501_v17  ;;  %v1817_v59 = vpop.f32.mrb[25].mxu1  ;;  %v7541_v13 = vpack.c.bf16 %v1983_v33, %v1982_v18 }
 0x29d   :  { %v1818_v9 = vadd.f32 %v1817_v59, %v7501_v17  ;;  %v5120_v34 = vpop.f32.mrb[26].mxu1  ;;  %v7544_v58 = vpack.c.bf16 %v1981_v47, %v1980_v36 }
 0x29e   :  { %v1938_v15 = vmul.f32 0.01, %v1826_v20  ;;  %v1829_v61 = vadd.f32 %v5120_v34, %v7501_v17  ;;  %v1820_v0 = vpop.f32.mrb[27].mxu1 }
 0x29f   :  { %2224 = vmatmul.mubr.bf16.gmra.mrb[68].mxu0 %v7518_v22  ;;  %v1936_v50 = vmul.f32 0.01, %v1818_v9  ;;  %v1821_v28 = vadd.f32 %v1820_v0, %v7501_v17 }
 0x2a0   :  { %2233 = vmatprep.mubr.bf16.mxu0 %v6130_v12  ;;  %v1986_v49 = vmax.f32 %v1826_v20, %v1938_v15  ;;  %v1939_v51 = vmul.f32 0.01, %v1829_v61 }
 0x2a1   :  { %v1984_v25 = vmax.f32 %v1818_v9, %v1936_v50  ;;  %v1937_v29 = vmul.f32 0.01, %v1821_v28 }
 0x2a2   :  { %v1987_v16 = vmax.f32 %v1829_v61, %v1939_v51 }
 0x2a3   :  { %v1985_v37 = vmax.f32 %v1821_v28, %v1937_v29  ;;  %v5123_v11 = vpop.f32.mrb[28].mxu1 }
 0x2a4   :  { %v1842_v54 = vadd.f32 %v5123_v11, %v7501_v17  ;;  %v1833_v1 = vpop.f32.mrb[29].mxu1  ;;  %v7551_v22 = vpack.c.bf16 %v1987_v16, %v1986_v49 }
 0x2a5   :  { %v1834_v40 = vadd.f32 %v1833_v1, %v7501_v17  ;;  %v5124_v2 = vpop.f32.mrb[30].mxu1  ;;  %v7554_v53 = vpack.c.bf16 %v1985_v37, %v1984_v25 }
 0x2a6   :  { %v1942_v52 = vmul.f32 0.01, %v1842_v54  ;;  %v1845_v44 = vadd.f32 %v5124_v2, %v7501_v17  ;;  %v1836_v6 = vpop.f32.mrb[31].mxu1 }
 0x2a7   :  { %2234 = vmatmul.mubr.bf16.gmra.mrb[72].mxu0 %v2014_v5  ;;  %v1940_v57 = vmul.f32 0.01, %v1834_v40  ;;  %v1837_v43 = vadd.f32 %v1836_v6, %v7501_v17 }
 0x2a8   :  { %2243 = vmatprep.mubr.bf16.mxu0 %v6130_v12  ;;  %v1990_v24 = vmax.f32 %v1842_v54, %v1942_v52  ;;  %v1943_v48 = vmul.f32 0.01, %v1845_v44 }
 0x2a9   :  { %v1988_v46 = vmax.f32 %v1834_v40, %v1940_v57  ;;  %v1941_v4 = vmul.f32 0.01, %v1837_v43 }
 0x2aa   :  { %v1991_v62 = vmax.f32 %v1845_v44, %v1943_v48 }
 0x2ab   :  { %v1989_v23 = vmax.f32 %v1837_v43, %v1941_v4  ;;  %v5127_v39 = vpop.f32.mrb[32].mxu1 }
 0x2ac   :  { %v1858_v3 = vadd.f32 %v5127_v39, %v7501_v17  ;;  %v1849_v56 = vpop.f32.mrb[33].mxu1  ;;  %v7560_v5 = vpack.c.bf16 %v1991_v62, %v1990_v24 }
 0x2ad   :  { %v1850_v21 = vadd.f32 %v1849_v56, %v7501_v17  ;;  %v5128_v38 = vpop.f32.mrb[34].mxu1  ;;  %v7563_v42 = vpack.c.bf16 %v1989_v23, %v1988_v46 }
 0x2ae   :  { %v1946_v45 = vmul.f32 0.01, %v1858_v3  ;;  %v1861_v35 = vadd.f32 %v5128_v38, %v7501_v17  ;;  %v1852_v10 = vpop.f32.mrb[35].mxu1 }
 0x2af   :  { %2244 = vmatmul.mubr.bf16.gmra.mrb[76].mxu0 %v7525_v7  ;;  %v1944_v27 = vmul.f32 0.01, %v1850_v21  ;;  %v1853_v63 = vadd.f32 %v1852_v10, %v7501_v17 }
 0x2b0   :  { %2253 = vmatprep.mubr.bf16.mxu0 %v6130_v12  ;;  %v1994_v8 = vmax.f32 %v1858_v3, %v1946_v45  ;;  %v1947_v55 = vmul.f32 0.01, %v1861_v35 }
 0x2b1   :  { %v1992_v31 = vmax.f32 %v1850_v21, %v1944_v27  ;;  %v1945_v32 = vmul.f32 0.01, %v1853_v63 }
 0x2b2   :  { %v1995_v14 = vmax.f32 %v1861_v35, %v1947_v55 }
 0x2b3   :  { %v1993_v18 = vmax.f32 %v1853_v63, %v1945_v32  ;;  %v5131_v41 = vpop.f32.mrb[36].mxu1 }
 0x2b4   :  { %v1874_v36 = vadd.f32 %v5131_v41, %v7501_v17  ;;  %v1865_v30 = vpop.f32.mrb[37].mxu1  ;;  %v7570_v7 = vpack.c.bf16 %v1995_v14, %v1994_v8 }
 0x2b5   :  { %v1866_v33 = vadd.f32 %v1865_v30, %v7501_v17  ;;  %v5132_v47 = vpop.f32.mrb[38].mxu1  ;;  %v7573_v26 = vpack.c.bf16 %v1993_v18, %v1992_v31 }
 0x2b6   :  { %v1950_v20 = vmul.f32 0.01, %v1874_v36  ;;  %v1877_v59 = vadd.f32 %v5132_v47, %v7501_v17  ;;  %v1868_v9 = vpop.f32.mrb[39].mxu1 }
 0x2b7   :  { %2254 = vmatmul.mubr.bf16.gmra.mrb[80].mxu0 %v7535_v19  ;;  %v1948_v34 = vmul.f32 0.01, %v1866_v33  ;;  %v1869_v15 = vadd.f32 %v1868_v9, %v7501_v17 }
 0x2b8   :  { %2263 = vmatprep.mubr.bf16.mxu0 %v6130_v12  ;;  %v1998_v61 = vmax.f32 %v1874_v36, %v1950_v20  ;;  %v1951_v0 = vmul.f32 0.01, %v1877_v59 }
 0x2b9   :  { %v1996_v50 = vmax.f32 %v1866_v33, %v1948_v34  ;;  %v1949_v28 = vmul.f32 0.01, %v1869_v15 }
 0x2ba   :  { %v1999_v49 = vmax.f32 %v1877_v59, %v1951_v0 }
 0x2bb   :  { %v1997_v51 = vmax.f32 %v1869_v15, %v1949_v28  ;;  %v5135_v25 = vpop.f32.mrb[40].mxu1 }
 0x2bc   :  { %v1890_v29 = vadd.f32 %v5135_v25, %v7501_v17  ;;  %v1881_v16 = vpop.f32.mrb[41].mxu1  ;;  %v2027_v19 = vpack.c.bf16 %v1999_v49, %v1998_v61 }
 0x2bd   :  { %v1882_v37 = vadd.f32 %v1881_v16, %v7501_v17  ;;  %v5136_v11 = vpop.f32.mrb[42].mxu1  ;;  %v2026_v54 = vpack.c.bf16 %v1997_v51, %v1996_v50 }
 0x2be   :  { %v1954_v1 = vmul.f32 0.01, %v1890_v29  ;;  %v1893_v40 = vadd.f32 %v5136_v11, %v7501_v17  ;;  %v1884_v2 = vpop.f32.mrb[43].mxu1 }
 0x2bf   :  { %2264 = vmatmul.mubr.bf16.gmra.mrb[84].mxu0 %v7532_v60  ;;  %v1952_v52 = vmul.f32 0.01, %v1882_v37  ;;  %v1885_v44 = vadd.f32 %v1884_v2, %v7501_v17 }
 0x2c0   :  { %2273 = vmatprep.mubr.bf16.mxu0 %v6130_v12  ;;  %v2002_v6 = vmax.f32 %v1890_v29, %v1954_v1  ;;  %v1955_v57 = vmul.f32 0.01, %v1893_v40 }
 0x2c1   :  { %v2000_v43 = vmax.f32 %v1882_v37, %v1952_v52  ;;  %v1953_v24 = vmul.f32 0.01, %v1885_v44 }
 0x2c2   :  { %v2003_v48 = vmax.f32 %v1893_v40, %v1955_v57 }
 0x2c3   :  { %v2001_v46 = vmax.f32 %v1885_v44, %v1953_v24  ;;  %v5139_v4 = vpop.f32.mrb[44].mxu1 }
 0x2c4   :  { %v1906_v62 = vadd.f32 %v5139_v4, %v7501_v17  ;;  %v1897_v23 = vpop.f32.mrb[45].mxu1  ;;  %v2029_v60 = vpack.c.bf16 %v2003_v48, %v2002_v6 }
 0x2c5   :  { %v1898_v39 = vadd.f32 %v1897_v23, %v7501_v17  ;;  %v5140_v3 = vpop.f32.mrb[46].mxu1  ;;  %v2028_v56 = vpack.c.bf16 %v2001_v46, %v2000_v43 }
 0x2c6   :  { %v1958_v21 = vmul.f32 0.01, %v1906_v62  ;;  %v1909_v38 = vadd.f32 %v5140_v3, %v7501_v17  ;;  %v1900_v45 = vpop.f32.mrb[47].mxu1 }
 0x2c7   :  { %2274 = vmatmul.mubr.bf16.gmra.mrb[88].mxu0 %v7544_v58  ;;  %v1956_v35 = vmul.f32 0.01, %v1898_v39  ;;  %v1901_v10 = vadd.f32 %v1900_v45, %v7501_v17  ;;  %v2763_v17 = vld [vmem:[#allocation6 + $0x150] sm:$0xf] }
 0x2c8   :  { %2283 = vmatprep.mubr.bf16.mxu0 %v6130_v12  ;;  %v2006_v27 = vmax.f32 %v1906_v62, %v1958_v21  ;;  %v1959_v63 = vmul.f32 0.01, %v1909_v38  ;;  %v2769_v58 = vsel %vm2767_vm8, %v2763_v17, 0 }
 0x2c9   :  { %v2004_v8 = vmax.f32 %v1898_v39, %v1956_v35  ;;  %v1957_v55 = vmul.f32 0.01, %v1901_v10 }
 0x2ca   :  { %v2007_v31 = vmax.f32 %v1909_v38, %v1959_v63 }
 0x2cb   :  { %v2005_v32 = vmax.f32 %v1901_v10, %v1957_v55 }
 0x2cc   :  { %v2031_v14 = vpack.c.bf16 %v2007_v31, %v2006_v27 }
 0x2cd   :  { %v2030_v18 = vpack.c.bf16 %v2005_v32, %v2004_v8 }
 0x2cf   :  { %2284 = vmatmul.mubr.bf16.gmra.mrb[92].mxu0 %v7541_v13  ;;  %v6131_v13 = vmov 0.0  }
 0x2d0   :  { %2293 = vmatprep.mubr.bf16.mxu0 %v6130_v12  ;;  %5141 = vmatprep.subr.bf16.mxu1 %v6131_v13 }
 0x2d1   :  { %5142 = vmatpush3.bf16.msra.mxu1 %v2769_v58  ;;  %5143 = vmatprep.mubr.msk.bf16.mxu1 %vm6132_vm9, %v6131_v13 }
 0x2d2   :  { %5147 = vmatprep.subr.bf16.mxu1 %v6131_v13 }
 0x2d7   :  { %2294 = vmatmul.mubr.bf16.gmra.mrb[96].mxu0 %v7554_v53 }
 0x2d8   :  { %2303 = vmatprep.mubr.bf16.mxu0 %v6130_v12 }
 0x2df   :  { %2304 = vmatmul.mubr.bf16.gmra.mrb[100].mxu0 %v7551_v22  ;;  %v2051_v22 = vlaneseq }
 0x2e0   :  { %2313 = vmatprep.mubr.bf16.mxu0 %v6130_v12 }
 0x2e1   :  { %v2052_v53 = vshrl.u32 %v2051_v22, 7 }
 0x2e3   :  { %v7619_v41 = vsub.s32 1, %v2052_v53 }
 0x2e7   :  { %2314 = vmatmul.mubr.bf16.gmra.mrb[104].mxu0 %v7563_v42  ;;  %v4740_v42 = vld [vmem:[%s8094_s7 + $0x2] ss:$8 sm:$0x3] }
 0x2e8   :  { %2323 = vmatprep.mubr.bf16.mxu0 %v6130_v12  ;;  %v7625_v30 = vrot.slane %v4740_v42, %v7619_v41 }
 0x2ef   :  { %2324 = vmatmul.mubr.bf16.gmra.mrb[108].mxu0 %v7560_v5  ;;  %v7614_v5 = vsub.s32 0, %v2052_v53 }
 0x2f0   :  { %2333 = vmatprep.mubr.bf16.mxu0 %v6130_v12 }
 0x2f1   :  { %v7622_v36 = vrot.slane %v4740_v42, %v7614_v5 }
 0x2f7   :  { %2334 = vmatmul.mubr.bf16.gmra.mrb[112].mxu0 %v7573_v26 }
 0x2f8   :  { %2343 = vmatprep.mubr.bf16.mxu0 %v6130_v12 }
 0x2ff   :  { %2344 = vmatmul.mubr.bf16.gmra.mrb[116].mxu0 %v7570_v7 }
 0x300   :  { %2353 = vmatprep.mubr.bf16.mxu0 %v6130_v12 }
 0x307   :  { %2354 = vmatmul.mubr.bf16.gmra.mrb[120].mxu0 %v2026_v54 }
 0x308   :  { %2363 = vmatprep.mubr.bf16.mxu0 %v6130_v12 }
 0x30f   :  { %2364 = vmatmul.mubr.bf16.gmra.mrb[124].mxu0 %v2027_v19 }
 0x310   :  { %2373 = vmatprep.mubr.bf16.mxu0 %v6130_v12 }
 0x317   :  { %2374 = vmatmul.mubr.bf16.gmra.mrb[128].mxu0 %v2028_v56 }
 0x318   :  { %2383 = vmatprep.mubr.bf16.mxu0 %v6130_v12 }
 0x31f   :  { %2384 = vmatmul.mubr.bf16.gmra.mrb[132].mxu0 %v2029_v60 }
 0x320   :  { %2393 = vmatprep.mubr.bf16.mxu0 %v6130_v12 }
 0x327   :  { %2394 = vmatmul.mubr.bf16.gmra.mrb[136].mxu0 %v2030_v18 }
 0x328   :  { %2403 = vmatprep.mubr.bf16.mxu0 %v6130_v12 }
 0x32f   :  { %2404 = vmatmul.mubr.bf16.gmra.mrb[140].mxu0 %v2031_v14 }
 0x330   :  { %3867 = vmatprep.mubr.bf16.mxu0 %v6130_v12 }
 0x34a   :  { %v2175_v7 = vpop.f32.mrb[48].mxu0 }
 0x34b   :  { %v2176_v33 = vadd.f32 %v2175_v7, %v7622_v36  ;;  %v2177_v47 = vpop.f32.mrb[49].mxu0 }
 0x34c   :  { %v2178_v26 = vadd.f32 %v2177_v47, %v7625_v30  ;;  %v2179_v20 = vpop.f32.mrb[50].mxu0 }
 0x34d   :  { %v2414_v59 = vmul.f32 0.01, %v2176_v33  ;;  %v2180_v9 = vadd.f32 %v2179_v20, %v7622_v36  ;;  %v2181_v34 = vpop.f32.mrb[51].mxu0 }
 0x34e   :  { %v2415_v15 = vmul.f32 0.01, %v2178_v26  ;;  %v2182_v61 = vadd.f32 %v2181_v34, %v7625_v30 }
 0x34f   :  { %v2416_v0 = vmul.f32 0.01, %v2180_v9  ;;  %v2510_v28 = vmax.f32 %v2176_v33, %v2414_v59 }
 0x350   :  { %v2417_v50 = vmul.f32 0.01, %v2182_v61  ;;  %v2511_v51 = vmax.f32 %v2178_v26, %v2415_v15 }
 0x351   :  { %v2512_v49 = vmax.f32 %v2180_v9, %v2416_v0 }
 0x352   :  { %v2513_v25 = vmax.f32 %v2182_v61, %v2417_v50  ;;  %v2185_v29 = vpop.f32.mrb[52].mxu0 }
 0x353   :  { %v2606_v16 = vmax.f32 %v2510_v28, %v2512_v49  ;;  %v2186_v19 = vadd.f32 %v2185_v29, %v7622_v36  ;;  %v2187_v37 = vpop.f32.mrb[53].mxu0 }
 0x354   :  { %v2623_v11 = vmax.f32 %v2511_v51, %v2513_v25  ;;  %v2188_v54 = vadd.f32 %v2187_v37, %v7625_v30  ;;  %v2189_v1 = vpop.f32.mrb[54].mxu0 }
 0x355   :  { %v2418_v40 = vmul.f32 0.01, %v2186_v19  ;;  %v2190_v2 = vadd.f32 %v2189_v1, %v7622_v36  ;;  %v2191_v52 = vpop.f32.mrb[55].mxu0 }
 0x356   :  { %v2419_v44 = vmul.f32 0.01, %v2188_v54  ;;  %v2192_v6 = vadd.f32 %v2191_v52, %v7625_v30 }
 0x357   :  { %v2514_v57 = vmax.f32 %v2186_v19, %v2418_v40  ;;  %v2420_v43 = vmul.f32 0.01, %v2190_v2 }
 0x358   :  { %v2515_v24 = vmax.f32 %v2188_v54, %v2419_v44  ;;  %v2421_v48 = vmul.f32 0.01, %v2192_v6 }
 0x359   :  { %v2607_v46 = vmax.f32 %v2606_v16, %v2514_v57  ;;  %v2516_v4 = vmax.f32 %v2190_v2, %v2420_v43 }
 0x35a   :  { %v2624_v62 = vmax.f32 %v2623_v11, %v2515_v24  ;;  %v2517_v23 = vmax.f32 %v2192_v6, %v2421_v48  ;;  %v2195_v60 = vpop.f32.mrb[56].mxu0 }
 0x35b   :  { %v2608_v39 = vmax.f32 %v2607_v46, %v2516_v4  ;;  %v2196_v3 = vadd.f32 %v2195_v60, %v7622_v36  ;;  %v2197_v56 = vpop.f32.mrb[57].mxu0 }
 0x35c   :  { %v2625_v21 = vmax.f32 %v2624_v62, %v2517_v23  ;;  %v2198_v38 = vadd.f32 %v2197_v56, %v7625_v30  ;;  %v2199_v45 = vpop.f32.mrb[58].mxu0 }
 0x35d   :  { %v2422_v35 = vmul.f32 0.01, %v2196_v3  ;;  %v2200_v10 = vadd.f32 %v2199_v45, %v7622_v36  ;;  %v2201_v27 = vpop.f32.mrb[59].mxu0 }
 0x35e   :  { %v2423_v63 = vmul.f32 0.01, %v2198_v38  ;;  %v2202_v8 = vadd.f32 %v2201_v27, %v7625_v30 }
 0x35f   :  { %v2518_v55 = vmax.f32 %v2196_v3, %v2422_v35  ;;  %v2424_v31 = vmul.f32 0.01, %v2200_v10 }
 0x360   :  { %v2519_v32 = vmax.f32 %v2198_v38, %v2423_v63  ;;  %v2425_v14 = vmul.f32 0.01, %v2202_v8 }
 0x361   :  { %v2609_v18 = vmax.f32 %v2608_v39, %v2518_v55  ;;  %v2520_v17 = vmax.f32 %v2200_v10, %v2424_v31 }
 0x362   :  { %v2626_v58 = vmax.f32 %v2625_v21, %v2519_v32  ;;  %v2521_v22 = vmax.f32 %v2202_v8, %v2425_v14  ;;  %v2205_v53 = vpop.f32.mrb[60].mxu0 }
 0x363   :  { %v2610_v42 = vmax.f32 %v2609_v18, %v2520_v17  ;;  %v2206_v7 = vadd.f32 %v2205_v53, %v7622_v36  ;;  %v2207_v33 = vpop.f32.mrb[61].mxu0 }
 0x364   :  { %v2627_v47 = vmax.f32 %v2626_v58, %v2521_v22  ;;  %v2208_v26 = vadd.f32 %v2207_v33, %v7625_v30  ;;  %v2209_v20 = vpop.f32.mrb[62].mxu0 }
 0x365   :  { %v2426_v59 = vmul.f32 0.01, %v2206_v7  ;;  %v2210_v9 = vadd.f32 %v2209_v20, %v7622_v36  ;;  %v2211_v34 = vpop.f32.mrb[63].mxu0 }
 0x366   :  { %v2427_v15 = vmul.f32 0.01, %v2208_v26  ;;  %v2212_v61 = vadd.f32 %v2211_v34, %v7625_v30  ;;  %v106_v34 = vld [vmem:[%s8088_s1] sm:$0xf]  ;;  %s6147_s1 = smov 110  }
 0x367   :  { %v2522_v0 = vmax.f32 %v2206_v7, %v2426_v59  ;;  %v2428_v50 = vmul.f32 0.01, %v2210_v9 }
 0x368   :  { %v2523_v28 = vmax.f32 %v2208_v26, %v2427_v15  ;;  %v2429_v49 = vmul.f32 0.01, %v2212_v61 }
 0x369   :  { %v2611_v51 = vmax.f32 %v2610_v42, %v2522_v0  ;;  %v2524_v25 = vmax.f32 %v2210_v9, %v2428_v50 }
 0x36a   :  { %v2628_v29 = vmax.f32 %v2627_v47, %v2523_v28  ;;  %v2525_v16 = vmax.f32 %v2212_v61, %v2429_v49  ;;  %v2215_v19 = vpop.f32.mrb[64].mxu0  ;;  %v7664_v49 = vpack.c.bf16 %v106_v34, %v106_v34 }
 0x36b   :  { %v2612_v37 = vmax.f32 %v2611_v51, %v2524_v25  ;;  %v2216_v11 = vadd.f32 %v2215_v19, %v7622_v36  ;;  %v2217_v54 = vpop.f32.mrb[65].mxu0 }
 0x36c   :  { %v2629_v1 = vmax.f32 %v2628_v29, %v2525_v16  ;;  %v2218_v40 = vadd.f32 %v2217_v54, %v7625_v30  ;;  %v2219_v2 = vpop.f32.mrb[66].mxu0  ;;  %5144 = vmatmul.mubr.msk.bf16.vlgmr.msra.gmra.mrb[48].mxu1 %vm1029_vm4, %v7664_v49  ;;  %v5667_v29 = vld [vmem:[#allocation6 + $0xd0] ss:$8 sps:$4 sm:$0xff]   ;;  %v5670_v16 = vld [vmem:[#allocation6 + $0x364] ss:$8 sps:$4 sm:$0xff]  }
 0x36d   :  { %v2430_v52 = vmul.f32 0.01, %v2216_v11  ;;  %v2220_v44 = vadd.f32 %v2219_v2, %v7622_v36  ;;  %v2221_v6 = vpop.f32.mrb[67].mxu0  ;;  %5163 = vmatprep.mubr.msk.bf16.mxu1 %vm6132_vm9, %v6131_v13  ;;  %5148 = vmatpush3.bf16.msra.mxu1 %v5667_v29 }
 0x36e   :  { %v2431_v57 = vmul.f32 0.01, %v2218_v40  ;;  %v2222_v43 = vadd.f32 %v2221_v6, %v7625_v30  ;;  %3835 = vmatprep.subr.bf16.mxu0 %v5670_v16  ;;  %5149 = vmatprep.subr.bf16.mxu1 %v6131_v13  ;;  %v5684_v16 = vld [vmem:[#allocation6 + $0x3a0] ss:$8 sps:$4 sm:$0xff]  }
 0x36f   :  { %v2526_v24 = vmax.f32 %v2216_v11, %v2430_v52  ;;  %v2432_v48 = vmul.f32 0.01, %v2220_v44  ;;  %v5668_v11 = vld [vmem:[#allocation6 + $0x360] ss:$8 sps:$4 sm:$0xff]  }
 0x370   :  { %v2527_v46 = vmax.f32 %v2218_v40, %v2431_v57  ;;  %v2433_v4 = vmul.f32 0.01, %v2222_v43  ;;  %3836 = vmatpush1.bf16.msra.mxu0 %v5668_v11 }
 0x371   :  { %v2613_v62 = vmax.f32 %v2612_v37, %v2526_v24  ;;  %v2528_v23 = vmax.f32 %v2220_v44, %v2432_v48  ;;  %v5671_v24 = vld [vmem:[#allocation6 + $0xe0] ss:$8 sps:$4 sm:$0xff]   ;;  %v5674_v48 = vld [vmem:[#allocation6 + $0x374] ss:$8 sps:$4 sm:$0xff]  }
 0x372   :  { %v2630_v60 = vmax.f32 %v2629_v1, %v2527_v46  ;;  %v2529_v39 = vmax.f32 %v2222_v43, %v2433_v4  ;;  %v2225_v3 = vpop.f32.mrb[68].mxu0  ;;  %5150 = vmatpush3.bf16.msra.mxu1 %v5671_v24  ;;  %3837 = vmatprep.subr.bf16.mxu0 %v5674_v48 }
 0x373   :  { %v2614_v56 = vmax.f32 %v2613_v62, %v2528_v23  ;;  %v2226_v21 = vadd.f32 %v2225_v3, %v7622_v36  ;;  %v2227_v38 = vpop.f32.mrb[69].mxu0  ;;  %v5672_v23 = vld [vmem:[#allocation6 + $0x370] ss:$8 sps:$4 sm:$0xff]   ;;  %5151 = vmatprep.subr.bf16.mxu1 %v6131_v13 }
 0x374   :  { %v2631_v45 = vmax.f32 %v2630_v60, %v2529_v39  ;;  %v2228_v35 = vadd.f32 %v2227_v38, %v7625_v30  ;;  %v2229_v10 = vpop.f32.mrb[70].mxu0  ;;  %3838 = vmatpush1.bf16.msra.mxu0 %v5672_v23 }
 0x375   :  { %v2434_v27 = vmul.f32 0.01, %v2226_v21  ;;  %v2230_v63 = vadd.f32 %v2229_v10, %v7622_v36  ;;  %v2231_v8 = vpop.f32.mrb[71].mxu0 }
 0x376   :  { %v2435_v55 = vmul.f32 0.01, %v2228_v35  ;;  %v2232_v31 = vadd.f32 %v2231_v8, %v7625_v30 }
 0x377   :  { %v2530_v32 = vmax.f32 %v2226_v21, %v2434_v27  ;;  %v2436_v14 = vmul.f32 0.01, %v2230_v63 }
 0x378   :  { %v2531_v18 = vmax.f32 %v2228_v35, %v2435_v55  ;;  %v2437_v17 = vmul.f32 0.01, %v2232_v31  ;;  %v5678_v35 = vld [vmem:[#allocation6 + $0x384] ss:$8 sps:$4 sm:$0xff]  }
 0x379   :  { %v2615_v58 = vmax.f32 %v2614_v56, %v2530_v32  ;;  %v2532_v22 = vmax.f32 %v2230_v63, %v2436_v14  ;;  %v5676_v63 = vld [vmem:[#allocation6 + $0x380] ss:$8 sps:$4 sm:$0xff]   ;;  %3839 = vmatprep.subr.bf16.mxu0 %v5678_v35 }
 0x37a   :  { %v2632_v53 = vmax.f32 %v2631_v45, %v2531_v18  ;;  %v2533_v42 = vmax.f32 %v2232_v31, %v2437_v17  ;;  %v2235_v7 = vpop.f32.mrb[72].mxu0  ;;  %v5675_v45 = vld [vmem:[#allocation6 + $0xf0] ss:$8 sps:$4 sm:$0xff]   ;;  %3840 = vmatpush1.bf16.msra.mxu0 %v5676_v63  ;;  %v5692_v35 = vld [vmem:[#allocation6 + $0x3c0] ss:$8 sps:$4 sm:$0xff]  }
 0x37b   :  { %v7651_v33 = vmax.f32 %v2615_v58, %v2532_v22  ;;  %v2236_v47 = vadd.f32 %v2235_v7, %v7622_v36  ;;  %v2237_v26 = vpop.f32.mrb[73].mxu0  ;;  %5152 = vmatpush3.bf16.msra.mxu1 %v5675_v45 }
 0x37c   :  { %v7654_v20 = vmax.f32 %v2632_v53, %v2533_v42  ;;  %v2238_v59 = vadd.f32 %v2237_v26, %v7625_v30  ;;  %v2239_v9 = vpop.f32.mrb[74].mxu0  ;;  %5153 = vmatprep.subr.bf16.mxu1 %v6131_v13  ;;  %v5679_v53 = vld [vmem:[#allocation6 + $0x100] ss:$8 sps:$4 sm:$0xff]   ;;  %v5682_v42 = vld [vmem:[#allocation6 + $0x394] ss:$8 sps:$4 sm:$0xff]  }
 0x37d   :  { %v2438_v15 = vmul.f32 0.01, %v2236_v47  ;;  %v2240_v61 = vadd.f32 %v2239_v9, %v7622_v36  ;;  %v2241_v0 = vpop.f32.mrb[75].mxu0  ;;  %3841 = vmatprep.subr.bf16.mxu0 %v5682_v42 }
 0x37e   :  { %v2439_v50 = vmul.f32 0.01, %v2238_v59  ;;  %v2242_v28 = vadd.f32 %v2241_v0, %v7625_v30 }
 0x37f   :  { %v2440_v51 = vmul.f32 0.01, %v2240_v61  ;;  %v2534_v19 = vmax.f32 %v2236_v47, %v2438_v15  ;;  %5154 = vmatpush3.bf16.msra.mxu1 %v5679_v53 }
 0x380   :  { %v2441_v25 = vmul.f32 0.01, %v2242_v28  ;;  %v2535_v54 = vmax.f32 %v2238_v59, %v2439_v50  ;;  %v5680_v59 = vld [vmem:[#allocation6 + $0x390] ss:$8 sps:$4 sm:$0xff]   ;;  %5155 = vmatprep.subr.bf16.mxu1 %v6131_v13 }
 0x381   :  { %v2536_v37 = vmax.f32 %v2240_v61, %v2440_v51  ;;  %3842 = vmatpush1.bf16.msra.mxu0 %v5680_v59  ;;  %v5686_v51 = vld [vmem:[#allocation6 + $0x3a4] ss:$8 sps:$4 sm:$0xff]   ;;  %v2617_v59 = vrot.slane %v7651_v33, 4 }
 0x382   :  { %v2537_v1 = vmax.f32 %v2242_v28, %v2441_v25  ;;  %v2245_v40 = vpop.f32.mrb[76].mxu0  ;;  %v5683_v28 = vld [vmem:[#allocation6 + $0x110] ss:$8 sps:$4 sm:$0xff]   ;;  %3843 = vmatprep.subr.bf16.mxu0 %v5686_v51 }
 0x383   :  { %v2640_v2 = vmax.f32 %v2534_v19, %v2536_v37  ;;  %v2246_v52 = vadd.f32 %v2245_v40, %v7622_v36  ;;  %v2247_v44 = vpop.f32.mrb[77].mxu0  ;;  %5156 = vmatpush3.bf16.msra.mxu1 %v5683_v28 }
 0x384   :  { %v2657_v6 = vmax.f32 %v2535_v54, %v2537_v1  ;;  %v2248_v57 = vadd.f32 %v2247_v44, %v7625_v30  ;;  %v2249_v43 = vpop.f32.mrb[78].mxu0  ;;  %5157 = vmatprep.subr.bf16.mxu1 %v6131_v13 }
 0x385   :  { %v2442_v46 = vmul.f32 0.01, %v2246_v52  ;;  %v2250_v4 = vadd.f32 %v2249_v43, %v7622_v36  ;;  %v2251_v62 = vpop.f32.mrb[79].mxu0  ;;  %3844 = vmatpush1.bf16.msra.mxu0 %v5684_v16  ;;  %v2618_v16 = vmax.f32 %v7651_v33, %v2617_v59 }
 0x386   :  { %v2443_v60 = vmul.f32 0.01, %v2248_v57  ;;  %v2252_v39 = vadd.f32 %v2251_v62, %v7625_v30 }
 0x387   :  { %v2538_v3 = vmax.f32 %v2246_v52, %v2442_v46  ;;  %v2444_v56 = vmul.f32 0.01, %v2250_v4  ;;  %v5688_v46 = vld [vmem:[#allocation6 + $0x3b0] ss:$8 sps:$4 sm:$0xff]  }
 0x388   :  { %v2539_v21 = vmax.f32 %v2248_v57, %v2443_v60  ;;  %v2445_v38 = vmul.f32 0.01, %v2252_v39  ;;  %v5690_v57 = vld [vmem:[#allocation6 + $0x3b4] ss:$8 sps:$4 sm:$0xff]  }
 0x389   :  { %v2641_v10 = vmax.f32 %v2640_v2, %v2538_v3  ;;  %v2540_v27 = vmax.f32 %v2250_v4, %v2444_v56  ;;  %3845 = vmatprep.subr.bf16.mxu0 %v5690_v57  ;;  %v5691_v56 = vld [vmem:[#allocation6 + $0x130] ss:$8 sps:$4 sm:$0xff]  }
 0x38a   :  { %v2658_v8 = vmax.f32 %v2657_v6, %v2539_v21  ;;  %v2541_v55 = vmax.f32 %v2252_v39, %v2445_v38  ;;  %v2255_v31 = vpop.f32.mrb[80].mxu0  ;;  %v5687_v6 = vld [vmem:[#allocation6 + $0x120] ss:$8 sps:$4 sm:$0xff]   ;;  %3846 = vmatpush1.bf16.msra.mxu0 %v5688_v46  ;;  %v5694_v21 = vld [vmem:[#allocation6 + $0x3c4] ss:$8 sps:$4 sm:$0xff]  }
 0x38b   :  { %v2642_v32 = vmax.f32 %v2641_v10, %v2540_v27  ;;  %v2256_v14 = vadd.f32 %v2255_v31, %v7622_v36  ;;  %v2257_v18 = vpop.f32.mrb[81].mxu0  ;;  %5158 = vmatpush3.bf16.msra.mxu1 %v5687_v6  ;;  %3847 = vmatprep.subr.bf16.mxu0 %v5694_v21 }
 0x38c   :  { %v2659_v17 = vmax.f32 %v2658_v8, %v2541_v55  ;;  %v2258_v58 = vadd.f32 %v2257_v18, %v7625_v30  ;;  %v2259_v22 = vpop.f32.mrb[82].mxu0  ;;  %5159 = vmatprep.subr.bf16.mxu1 %v6131_v13 }
 0x38d   :  { %v2446_v7 = vmul.f32 0.01, %v2256_v14  ;;  %v2260_v47 = vadd.f32 %v2259_v22, %v7622_v36  ;;  %v2261_v26 = vpop.f32.mrb[83].mxu0 }
 0x38e   :  { %v2447_v9 = vmul.f32 0.01, %v2258_v58  ;;  %v2262_v34 = vadd.f32 %v2261_v26, %v7625_v30  ;;  %3848 = vmatpush1.bf16.msra.mxu0 %v5692_v35 }
 0x38f   :  { %v2542_v15 = vmax.f32 %v2256_v14, %v2446_v7  ;;  %v2448_v61 = vmul.f32 0.01, %v2260_v47  ;;  %5160 = vmatpush3.bf16.msra.mxu1 %v5691_v56  ;;  %v5698_v7 = vld [vmem:[#allocation6 + $0x3d4] ss:$8 sps:$4 sm:$0xff]  }
 0x390   :  { %v2543_v0 = vmax.f32 %v2258_v58, %v2447_v9  ;;  %v2449_v50 = vmul.f32 0.01, %v2262_v34  ;;  %5161 = vmatprep.subr.bf16.mxu1 %v6131_v13  ;;  %v5696_v58 = vld [vmem:[#allocation6 + $0x3d0] ss:$8 sps:$4 sm:$0xff]   ;;  %3849 = vmatprep.subr.bf16.mxu0 %v5698_v7 }
 0x391   :  { %v2643_v25 = vmax.f32 %v2642_v32, %v2542_v15  ;;  %v2544_v29 = vmax.f32 %v2260_v47, %v2448_v61  ;;  %v2634_v15 = vrot.slane %v7654_v20, 4 }
 0x392   :  { %v2660_v19 = vmax.f32 %v2659_v17, %v2543_v0  ;;  %v2545_v37 = vmax.f32 %v2262_v34, %v2449_v50  ;;  %v2265_v11 = vpop.f32.mrb[84].mxu0  ;;  %v5695_v17 = vld [vmem:[#allocation6 + $0x140] ss:$8 sps:$4 sm:$0xff]   ;;  %3850 = vmatpush1.bf16.msra.mxu0 %v5696_v58 }
 0x393   :  { %v2644_v54 = vmax.f32 %v2643_v25, %v2544_v29  ;;  %v2266_v1 = vadd.f32 %v2265_v11, %v7622_v36  ;;  %v2267_v40 = vpop.f32.mrb[85].mxu0  ;;  %5162 = vmatpush3.bf16.msra.mxu1 %v5695_v17  ;;  %5247 = vmatprep.subr.bf16.mxu0 %v6131_v13 }
 0x394   :  { %v2661_v2 = vmax.f32 %v2660_v19, %v2545_v37  ;;  %v2268_v52 = vadd.f32 %v2267_v40, %v7625_v30  ;;  %v2269_v44 = vpop.f32.mrb[86].mxu0  ;;  %5167 = vmatprep.subr.bf16.mxu1 %v6131_v13 }
 0x395   :  { %v2450_v43 = vmul.f32 0.01, %v2266_v1  ;;  %v2270_v24 = vadd.f32 %v2269_v44, %v7622_v36  ;;  %v2271_v48 = vpop.f32.mrb[87].mxu0 }
 0x396   :  { %v2451_v4 = vmul.f32 0.01, %v2268_v52  ;;  %v2272_v62 = vadd.f32 %v2271_v48, %v7625_v30 }
 0x397   :  { %v2546_v23 = vmax.f32 %v2266_v1, %v2450_v43  ;;  %v2452_v60 = vmul.f32 0.01, %v2270_v24 }
 0x398   :  { %v2547_v39 = vmax.f32 %v2268_v52, %v2451_v4  ;;  %v2453_v3 = vmul.f32 0.01, %v2272_v62 }
 0x399   :  { %v2645_v38 = vmax.f32 %v2644_v54, %v2546_v23  ;;  %v2548_v45 = vmax.f32 %v2270_v24, %v2452_v60  ;;  %v2635_v54 = vmax.f32 %v7654_v20, %v2634_v15  ;;  %v2619_v24 = vrot.slane %v2618_v16, 2 }
 0x39a   :  { %v2662_v10 = vmax.f32 %v2661_v2, %v2547_v39  ;;  %v2549_v27 = vmax.f32 %v2272_v62, %v2453_v3  ;;  %v2275_v63 = vpop.f32.mrb[88].mxu0 }
 0x39b   :  { %v2646_v8 = vmax.f32 %v2645_v38, %v2548_v45  ;;  %v2276_v55 = vadd.f32 %v2275_v63, %v7622_v36  ;;  %v2277_v31 = vpop.f32.mrb[89].mxu0  ;;  %v2636_v46 = vrot.slane %v2635_v54, 2  ;;  %v2620_v56 = vmax.f32 %v2618_v16, %v2619_v24 }
 0x39c   :  { %v2663_v32 = vmax.f32 %v2662_v10, %v2549_v27  ;;  %v2278_v14 = vadd.f32 %v2277_v31, %v7625_v30  ;;  %v2279_v18 = vpop.f32.mrb[90].mxu0 }
 0x39d   :  { %v2454_v22 = vmul.f32 0.01, %v2276_v55  ;;  %v2280_v53 = vadd.f32 %v2279_v18, %v7622_v36  ;;  %v2281_v42 = vpop.f32.mrb[91].mxu0  ;;  %v2637_v35 = vmax.f32 %v2635_v54, %v2636_v46  ;;  %v2621_v58 = vrot.slane %v2620_v56, 1 }
 0x39e   :  { %v2455_v47 = vmul.f32 0.01, %v2278_v14  ;;  %v2282_v26 = vadd.f32 %v2281_v42, %v7625_v30 }
 0x39f   :  { %v2550_v9 = vmax.f32 %v2276_v55, %v2454_v22  ;;  %v2456_v34 = vmul.f32 0.01, %v2280_v53  ;;  %v2638_v42 = vrot.slane %v2637_v35, 1 }
 0x3a0   :  { %v2551_v61 = vmax.f32 %v2278_v14, %v2455_v47  ;;  %v2457_v0 = vmul.f32 0.01, %v2282_v26 }
 0x3a1   :  { %v2647_v50 = vmax.f32 %v2646_v8, %v2550_v9  ;;  %v2552_v28 = vmax.f32 %v2280_v53, %v2456_v34  ;;  %v2639_v16 = vmax.f32 %v2637_v35, %v2638_v42 }
 0x3a2   :  { %v2664_v51 = vmax.f32 %v2663_v32, %v2551_v61  ;;  %v2553_v25 = vmax.f32 %v2282_v26, %v2457_v0  ;;  %v2285_v29 = vpop.f32.mrb[92].mxu0 }
 0x3a3   :  { %v2648_v19 = vmax.f32 %v2647_v50, %v2552_v28  ;;  %v2286_v37 = vadd.f32 %v2285_v29, %v7622_v36  ;;  %v2287_v11 = vpop.f32.mrb[93].mxu0  ;;  %v2622_v50 = vmax.f32 %v2620_v56, %v2621_v58  ;;  %v3669_v46 = vpack.c.bf16 %v2639_v16, %v2639_v16 }
 0x3a4   :  { %v2665_v1 = vmax.f32 %v2664_v51, %v2553_v25  ;;  %v2288_v40 = vadd.f32 %v2287_v11, %v7625_v30  ;;  %v2289_v2 = vpop.f32.mrb[94].mxu0 }
 0x3a5   :  { %v2458_v52 = vmul.f32 0.01, %v2286_v37  ;;  %v2290_v44 = vadd.f32 %v2289_v2, %v7622_v36  ;;  %v2291_v6 = vpop.f32.mrb[95].mxu0 }
 0x3a6   :  { %v2459_v57 = vmul.f32 0.01, %v2288_v40  ;;  %v2292_v43 = vadd.f32 %v2291_v6, %v7625_v30 }
 0x3a7   :  { %v2554_v48 = vmax.f32 %v2286_v37, %v2458_v52  ;;  %v2460_v33 = vmul.f32 0.01, %v2290_v44 }
 0x3a8   :  { %v2555_v4 = vmax.f32 %v2288_v40, %v2459_v57  ;;  %v2461_v62 = vmul.f32 0.01, %v2292_v43 }
 0x3a9   :  { %v2649_v23 = vmax.f32 %v2648_v19, %v2554_v48  ;;  %v2556_v60 = vmax.f32 %v2290_v44, %v2460_v33 }
 0x3aa   :  { %v2666_v20 = vmax.f32 %v2665_v1, %v2555_v4  ;;  %v2557_v39 = vmax.f32 %v2292_v43, %v2461_v62  ;;  %v2295_v3 = vpop.f32.mrb[96].mxu0  ;;  %v2743_v43 = vpack.c.bf16 %v2622_v50, %v2622_v50 }
 0x3ab   :  { %v2650_v21 = vmax.f32 %v2649_v23, %v2556_v60  ;;  %v2296_v38 = vadd.f32 %v2295_v3, %v7622_v36  ;;  %v2297_v45 = vpop.f32.mrb[97].mxu0 }
 0x3ac   :  { %v2667_v10 = vmax.f32 %v2666_v20, %v2557_v39  ;;  %v2298_v27 = vadd.f32 %v2297_v45, %v7625_v30  ;;  %v2299_v63 = vpop.f32.mrb[98].mxu0  ;;  %v2815_v45 = vunpack.c.l.b16 %v2743_v43 }
 0x3ad   :  { %v2651_v8 = vrot.slane %v2650_v21, 4  ;;  %v2462_v55 = vmul.f32 0.01, %v2296_v38  ;;  %v2300_v31 = vadd.f32 %v2299_v63, %v7622_v36  ;;  %v2301_v32 = vpop.f32.mrb[99].mxu0 }
 0x3ae   :  { %v2668_v14 = vrot.slane %v2667_v10, 4  ;;  %v2463_v18 = vmul.f32 0.01, %v2298_v27  ;;  %v2302_v17 = vadd.f32 %v2301_v32, %v7625_v30 }
 0x3af   :  { %v2652_v22 = vmax.f32 %v2650_v21, %v2651_v8  ;;  %v2464_v53 = vmul.f32 0.01, %v2300_v31  ;;  %v2558_v59 = vmax.f32 %v2296_v38, %v2462_v55  ;;  %v3746_v8 = vunpack.c.l.b16 %v3669_v46 }
 0x3b0   :  { %v2669_v7 = vmax.f32 %v2667_v10, %v2668_v14  ;;  %v2465_v47 = vmul.f32 0.01, %v2302_v17  ;;  %v2559_v15 = vmax.f32 %v2298_v27, %v2463_v18 }
 0x3b1   :  { %v2653_v26 = vrot.slane %v2652_v22, 2  ;;  %v2560_v9 = vmax.f32 %v2300_v31, %v2464_v53 }
 0x3b2   :  { %v2670_v34 = vrot.slane %v2669_v7, 2  ;;  %v2561_v61 = vmax.f32 %v2302_v17, %v2465_v47  ;;  %v2305_v0 = vpop.f32.mrb[100].mxu0 }
 0x3b3   :  { %v2654_v28 = vmax.f32 %v2652_v22, %v2653_v26  ;;  %v2674_v51 = vmax.f32 %v2558_v59, %v2560_v9  ;;  %v2306_v25 = vadd.f32 %v2305_v0, %v7622_v36  ;;  %v2307_v29 = vpop.f32.mrb[101].mxu0 }
 0x3b4   :  { %v2671_v19 = vmax.f32 %v2669_v7, %v2670_v34  ;;  %v2691_v37 = vmax.f32 %v2559_v15, %v2561_v61  ;;  %v2308_v11 = vadd.f32 %v2307_v29, %v7625_v30  ;;  %v2309_v54 = vpop.f32.mrb[102].mxu0 }
 0x3b5   :  { %v2655_v1 = vrot.slane %v2654_v28, 1  ;;  %v2466_v40 = vmul.f32 0.01, %v2306_v25  ;;  %v2310_v2 = vadd.f32 %v2309_v54, %v7622_v36  ;;  %v2311_v52 = vpop.f32.mrb[103].mxu0 }
 0x3b6   :  { %v2672_v44 = vrot.slane %v2671_v19, 1  ;;  %v2467_v6 = vmul.f32 0.01, %v2308_v11  ;;  %v2312_v57 = vadd.f32 %v2311_v52, %v7625_v30 }
 0x3b7   :  { %v2656_v24 = vmax.f32 %v2654_v28, %v2655_v1  ;;  %v2562_v48 = vmax.f32 %v2306_v25, %v2466_v40  ;;  %v2468_v33 = vmul.f32 0.01, %v2310_v2 }
 0x3b8   :  { %v2673_v4 = vmax.f32 %v2671_v19, %v2672_v44  ;;  %v2563_v62 = vmax.f32 %v2308_v11, %v2467_v6  ;;  %v2469_v23 = vmul.f32 0.01, %v2312_v57 }
 0x3b9   :  { %v2744_v60 = vpack.c.bf16 %v2656_v24, %v2656_v24  ;;  %v2675_v20 = vmax.f32 %v2674_v51, %v2562_v48  ;;  %v2564_v39 = vmax.f32 %v2310_v2, %v2468_v33 }
 0x3ba   :  { %v3670_v3 = vpack.c.bf16 %v2673_v4, %v2673_v4  ;;  %v2692_v56 = vmax.f32 %v2691_v37, %v2563_v62  ;;  %v2565_v21 = vmax.f32 %v2312_v57, %v2469_v23  ;;  %v2315_v38 = vpop.f32.mrb[104].mxu0 }
 0x3bb   :  { %v2816_v35 = vunpack.c.l.b16 %v2744_v60  ;;  %v2676_v10 = vmax.f32 %v2675_v20, %v2564_v39  ;;  %v2316_v27 = vadd.f32 %v2315_v38, %v7622_v36  ;;  %v2317_v63 = vpop.f32.mrb[105].mxu0 }
 0x3bc   :  { %v3747_v55 = vunpack.c.l.b16 %v3670_v3  ;;  %v2693_v31 = vmax.f32 %v2692_v56, %v2565_v21  ;;  %v2318_v32 = vadd.f32 %v2317_v63, %v7625_v30  ;;  %v2319_v14 = vpop.f32.mrb[106].mxu0 }
 0x3bd   :  { %v2470_v18 = vmul.f32 0.01, %v2316_v27  ;;  %v2320_v17 = vadd.f32 %v2319_v14, %v7622_v36  ;;  %v2321_v58 = vpop.f32.mrb[107].mxu0  ;;  %v7715_v22 = vsel %vm2819_vm10, %v2816_v35, %v2815_v45 }
 0x3be   :  { %v2471_v53 = vmul.f32 0.01, %v2318_v32  ;;  %v2322_v42 = vadd.f32 %v2321_v58, %v7625_v30  ;;  %v7719_v7 = vsel %vm2819_vm10, %v3747_v55, %v3746_v8 }
 0x3bf   :  { %v2566_v47 = vmax.f32 %v2316_v27, %v2470_v18  ;;  %v2472_v26 = vmul.f32 0.01, %v2320_v17 }
 0x3c0   :  { %v2567_v59 = vmax.f32 %v2318_v32, %v2471_v53  ;;  %v2473_v9 = vmul.f32 0.01, %v2322_v42 }
 0x3c1   :  { %v2677_v34 = vmax.f32 %v2676_v10, %v2566_v47  ;;  %v2568_v15 = vmax.f32 %v2320_v17, %v2472_v26 }
 0x3c2   :  { %v2694_v61 = vmax.f32 %v2693_v31, %v2567_v59  ;;  %v2569_v0 = vmax.f32 %v2322_v42, %v2473_v9  ;;  %v2325_v50 = vpop.f32.mrb[108].mxu0 }
 0x3c3   :  { %v2678_v28 = vmax.f32 %v2677_v34, %v2568_v15  ;;  %v2326_v51 = vadd.f32 %v2325_v50, %v7622_v36  ;;  %v2327_v25 = vpop.f32.mrb[109].mxu0 }
 0x3c4   :  { %v2695_v29 = vmax.f32 %v2694_v61, %v2569_v0  ;;  %v2328_v16 = vadd.f32 %v2327_v25, %v7625_v30  ;;  %v2329_v19 = vpop.f32.mrb[110].mxu0 }
 0x3c5   :  { %v2474_v37 = vmul.f32 0.01, %v2326_v51  ;;  %v2330_v11 = vadd.f32 %v2329_v19, %v7622_v36  ;;  %v2331_v54 = vpop.f32.mrb[111].mxu0 }
 0x3c6   :  { %v2475_v1 = vmul.f32 0.01, %v2328_v16  ;;  %v2332_v40 = vadd.f32 %v2331_v54, %v7625_v30 }
 0x3c7   :  { %v2570_v2 = vmax.f32 %v2326_v51, %v2474_v37  ;;  %v2476_v52 = vmul.f32 0.01, %v2330_v11 }
 0x3c8   :  { %v2571_v44 = vmax.f32 %v2328_v16, %v2475_v1  ;;  %v2477_v6 = vmul.f32 0.01, %v2332_v40 }
 0x3c9   :  { %v2679_v57 = vmax.f32 %v2678_v28, %v2570_v2  ;;  %v2572_v43 = vmax.f32 %v2330_v11, %v2476_v52 }
 0x3ca   :  { %v2696_v24 = vmax.f32 %v2695_v29, %v2571_v44  ;;  %v2573_v48 = vmax.f32 %v2332_v40, %v2477_v6  ;;  %v2335_v33 = vpop.f32.mrb[112].mxu0 }
 0x3cb   :  { %v2680_v46 = vmax.f32 %v2679_v57, %v2572_v43  ;;  %v2336_v4 = vadd.f32 %v2335_v33, %v7622_v36  ;;  %v2337_v62 = vpop.f32.mrb[113].mxu0 }
 0x3cc   :  { %v2697_v23 = vmax.f32 %v2696_v24, %v2573_v48  ;;  %v2338_v60 = vadd.f32 %v2337_v62, %v7625_v30  ;;  %v2339_v20 = vpop.f32.mrb[114].mxu0 }
 0x3cd   :  { %v2478_v39 = vmul.f32 0.01, %v2336_v4  ;;  %v2340_v3 = vadd.f32 %v2339_v20, %v7622_v36  ;;  %v2341_v56 = vpop.f32.mrb[115].mxu0 }
 0x3ce   :  { %v2479_v21 = vmul.f32 0.01, %v2338_v60  ;;  %v2342_v38 = vadd.f32 %v2341_v56, %v7625_v30 }
 0x3cf   :  { %v2574_v45 = vmax.f32 %v2336_v4, %v2478_v39  ;;  %v2480_v35 = vmul.f32 0.01, %v2340_v3 }
 0x3d0   :  { %v2575_v10 = vmax.f32 %v2338_v60, %v2479_v21  ;;  %v2481_v27 = vmul.f32 0.01, %v2342_v38 }
 0x3d1   :  { %v2681_v63 = vmax.f32 %v2680_v46, %v2574_v45  ;;  %v2576_v8 = vmax.f32 %v2340_v3, %v2480_v35 }
 0x3d2   :  { %v2698_v55 = vmax.f32 %v2697_v23, %v2575_v10  ;;  %v2577_v31 = vmax.f32 %v2342_v38, %v2481_v27  ;;  %v2345_v32 = vpop.f32.mrb[116].mxu0 }
 0x3d3   :  { %v2682_v14 = vmax.f32 %v2681_v63, %v2576_v8  ;;  %v2346_v18 = vadd.f32 %v2345_v32, %v7622_v36  ;;  %v2347_v17 = vpop.f32.mrb[117].mxu0 }
 0x3d4   :  { %v2699_v58 = vmax.f32 %v2698_v55, %v2577_v31  ;;  %v2348_v53 = vadd.f32 %v2347_v17, %v7625_v30  ;;  %v2349_v42 = vpop.f32.mrb[118].mxu0 }
 0x3d5   :  { %v2482_v47 = vmul.f32 0.01, %v2346_v18  ;;  %v2350_v26 = vadd.f32 %v2349_v42, %v7622_v36  ;;  %v2351_v59 = vpop.f32.mrb[119].mxu0 }
 0x3d6   :  { %v2483_v9 = vmul.f32 0.01, %v2348_v53  ;;  %v2352_v34 = vadd.f32 %v2351_v59, %v7625_v30 }
 0x3d7   :  { %v2578_v15 = vmax.f32 %v2346_v18, %v2482_v47  ;;  %v2484_v61 = vmul.f32 0.01, %v2350_v26 }
 0x3d8   :  { %v2579_v0 = vmax.f32 %v2348_v53, %v2483_v9  ;;  %v2485_v50 = vmul.f32 0.01, %v2352_v34 }
 0x3d9   :  { %v2683_v28 = vmax.f32 %v2682_v14, %v2578_v15  ;;  %v2580_v51 = vmax.f32 %v2350_v26, %v2484_v61 }
 0x3da   :  { %v2700_v25 = vmax.f32 %v2699_v58, %v2579_v0  ;;  %v2581_v29 = vmax.f32 %v2352_v34, %v2485_v50  ;;  %v2355_v16 = vpop.f32.mrb[120].mxu0 }
 0x3db   :  { %v2684_v19 = vmax.f32 %v2683_v28, %v2580_v51  ;;  %v2356_v37 = vadd.f32 %v2355_v16, %v7622_v36  ;;  %v2357_v11 = vpop.f32.mrb[121].mxu0 }
 0x3dc   :  { %v2701_v54 = vmax.f32 %v2700_v25, %v2581_v29  ;;  %v2358_v1 = vadd.f32 %v2357_v11, %v7625_v30  ;;  %v2359_v40 = vpop.f32.mrb[122].mxu0 }
 0x3dd   :  { %v2685_v2 = vrot.slane %v2684_v19, 4  ;;  %v2486_v52 = vmul.f32 0.01, %v2356_v37  ;;  %v2360_v44 = vadd.f32 %v2359_v40, %v7622_v36  ;;  %v2361_v6 = vpop.f32.mrb[123].mxu0 }
 0x3de   :  { %v2702_v57 = vrot.slane %v2701_v54, 4  ;;  %v2487_v43 = vmul.f32 0.01, %v2358_v1  ;;  %v2362_v24 = vadd.f32 %v2361_v6, %v7625_v30 }
 0x3df   :  { %v2686_v48 = vmax.f32 %v2684_v19, %v2685_v2  ;;  %v2488_v33 = vmul.f32 0.01, %v2360_v44  ;;  %v2582_v23 = vmax.f32 %v2356_v37, %v2486_v52 }
 0x3e0   :  { %v2703_v46 = vmax.f32 %v2701_v54, %v2702_v57  ;;  %v2489_v4 = vmul.f32 0.01, %v2362_v24  ;;  %v2583_v39 = vmax.f32 %v2358_v1, %v2487_v43 }
 0x3e1   :  { %v2687_v62 = vrot.slane %v2686_v48, 2  ;;  %v2584_v60 = vmax.f32 %v2360_v44, %v2488_v33 }
 0x3e2   :  { %v2704_v20 = vrot.slane %v2703_v46, 2  ;;  %v2585_v3 = vmax.f32 %v2362_v24, %v2489_v4  ;;  %v2365_v56 = vpop.f32.mrb[124].mxu0 }
 0x3e3   :  { %v2688_v21 = vmax.f32 %v2686_v48, %v2687_v62  ;;  %v2708_v38 = vmax.f32 %v2582_v23, %v2584_v60  ;;  %v2366_v45 = vadd.f32 %v2365_v56, %v7622_v36  ;;  %v2367_v35 = vpop.f32.mrb[125].mxu0 }
 0x3e4   :  { %v2705_v10 = vmax.f32 %v2703_v46, %v2704_v20  ;;  %v2725_v27 = vmax.f32 %v2583_v39, %v2585_v3  ;;  %v2368_v63 = vadd.f32 %v2367_v35, %v7625_v30  ;;  %v2369_v8 = vpop.f32.mrb[126].mxu0 }
 0x3e5   :  { %v2689_v55 = vrot.slane %v2688_v21, 1  ;;  %v2490_v31 = vmul.f32 0.01, %v2366_v45  ;;  %v2370_v32 = vadd.f32 %v2369_v8, %v7622_v36  ;;  %v2371_v14 = vpop.f32.mrb[127].mxu0 }
 0x3e6   :  { %v2706_v18 = vrot.slane %v2705_v10, 1  ;;  %v2491_v17 = vmul.f32 0.01, %v2368_v63  ;;  %v2372_v58 = vadd.f32 %v2371_v14, %v7625_v30 }
 0x3e7   :  { %v2690_v53 = vmax.f32 %v2688_v21, %v2689_v55  ;;  %v2586_v42 = vmax.f32 %v2366_v45, %v2490_v31  ;;  %v2492_v47 = vmul.f32 0.01, %v2370_v32 }
 0x3e8   :  { %v2707_v26 = vmax.f32 %v2705_v10, %v2706_v18  ;;  %v2587_v59 = vmax.f32 %v2368_v63, %v2491_v17  ;;  %v2493_v9 = vmul.f32 0.01, %v2372_v58 }
 0x3e9   :  { %v2745_v34 = vpack.c.bf16 %v2690_v53, %v2690_v53  ;;  %v2709_v15 = vmax.f32 %v2708_v38, %v2586_v42  ;;  %v2588_v61 = vmax.f32 %v2370_v32, %v2492_v47 }
 0x3ea   :  { %v3671_v0 = vpack.c.bf16 %v2707_v26, %v2707_v26  ;;  %v2726_v50 = vmax.f32 %v2725_v27, %v2587_v59  ;;  %v2589_v28 = vmax.f32 %v2372_v58, %v2493_v9  ;;  %v2375_v51 = vpop.f32.mrb[128].mxu0 }
 0x3eb   :  { %v2817_v25 = vunpack.c.l.b16 %v2745_v34  ;;  %v2710_v29 = vmax.f32 %v2709_v15, %v2588_v61  ;;  %v2376_v16 = vadd.f32 %v2375_v51, %v7622_v36  ;;  %v2377_v19 = vpop.f32.mrb[129].mxu0 }
 0x3ec   :  { %v3748_v37 = vunpack.c.l.b16 %v3671_v0  ;;  %v2727_v11 = vmax.f32 %v2726_v50, %v2589_v28  ;;  %v2378_v54 = vadd.f32 %v2377_v19, %v7625_v30  ;;  %v2379_v1 = vpop.f32.mrb[130].mxu0 }
 0x3ed   :  { %v2494_v40 = vmul.f32 0.01, %v2376_v16  ;;  %v2380_v2 = vadd.f32 %v2379_v1, %v7622_v36  ;;  %v2381_v52 = vpop.f32.mrb[131].mxu0  ;;  %v7745_v44 = vsel %vm2821_vm11, %v2817_v25, %v7715_v22 }
 0x3ee   :  { %v2495_v6 = vmul.f32 0.01, %v2378_v54  ;;  %v2382_v57 = vadd.f32 %v2381_v52, %v7625_v30  ;;  %v7749_v43 = vsel %vm2821_vm11, %v3748_v37, %v7719_v7 }
 0x3ef   :  { %v2590_v24 = vmax.f32 %v2376_v16, %v2494_v40  ;;  %v2496_v48 = vmul.f32 0.01, %v2380_v2 }
 0x3f0   :  { %v2591_v33 = vmax.f32 %v2378_v54, %v2495_v6  ;;  %v2497_v46 = vmul.f32 0.01, %v2382_v57 }
 0x3f1   :  { %v2711_v4 = vmax.f32 %v2710_v29, %v2590_v24  ;;  %v2592_v62 = vmax.f32 %v2380_v2, %v2496_v48 }
 0x3f2   :  { %v2728_v23 = vmax.f32 %v2727_v11, %v2591_v33  ;;  %v2593_v60 = vmax.f32 %v2382_v57, %v2497_v46  ;;  %v2385_v20 = vpop.f32.mrb[132].mxu0 }
 0x3f3   :  { %v2712_v39 = vmax.f32 %v2711_v4, %v2592_v62  ;;  %v2386_v3 = vadd.f32 %v2385_v20, %v7622_v36  ;;  %v2387_v22 = vpop.f32.mrb[133].mxu0 }
 0x3f4   :  { %v2729_v56 = vmax.f32 %v2728_v23, %v2593_v60  ;;  %v2388_v21 = vadd.f32 %v2387_v22, %v7625_v30  ;;  %v2389_v38 = vpop.f32.mrb[134].mxu0 }
 0x3f5   :  { %v2498_v45 = vmul.f32 0.01, %v2386_v3  ;;  %v2390_v7 = vadd.f32 %v2389_v38, %v7622_v36  ;;  %v2391_v35 = vpop.f32.mrb[135].mxu0 }
 0x3f6   :  { %v2499_v10 = vmul.f32 0.01, %v2388_v21  ;;  %v2392_v27 = vadd.f32 %v2391_v35, %v7625_v30 }
 0x3f7   :  { %v2594_v63 = vmax.f32 %v2386_v3, %v2498_v45  ;;  %v2500_v8 = vmul.f32 0.01, %v2390_v7 }
 0x3f8   :  { %v2595_v55 = vmax.f32 %v2388_v21, %v2499_v10  ;;  %v2501_v31 = vmul.f32 0.01, %v2392_v27 }
 0x3f9   :  { %v2713_v32 = vmax.f32 %v2712_v39, %v2594_v63  ;;  %v2596_v14 = vmax.f32 %v2390_v7, %v2500_v8 }
 0x3fa   :  { %v2730_v18 = vmax.f32 %v2729_v56, %v2595_v55  ;;  %v2597_v17 = vmax.f32 %v2392_v27, %v2501_v31  ;;  %v2395_v58 = vpop.f32.mrb[136].mxu0 }
 0x3fb   :  { %v2714_v53 = vmax.f32 %v2713_v32, %v2596_v14  ;;  %v2396_v42 = vadd.f32 %v2395_v58, %v7622_v36  ;;  %v2397_v47 = vpop.f32.mrb[137].mxu0 }
 0x3fc   :  { %v2731_v26 = vmax.f32 %v2730_v18, %v2597_v17  ;;  %v2398_v59 = vadd.f32 %v2397_v47, %v7625_v30  ;;  %v2399_v9 = vpop.f32.mrb[138].mxu0 }
 0x3fd   :  { %v2502_v34 = vmul.f32 0.01, %v2396_v42  ;;  %v2400_v15 = vadd.f32 %v2399_v9, %v7622_v36  ;;  %v2401_v61 = vpop.f32.mrb[139].mxu0  ;;  %v5700_v9 = vld [vmem:[#allocation6 + $0x170] ss:$8 sps:$4 sm:$0xff]  }
 0x3fe   :  { %v2503_v0 = vmul.f32 0.01, %v2398_v59  ;;  %v2402_v50 = vadd.f32 %v2401_v61, %v7625_v30 }
 0x3ff   :  { %v2598_v28 = vmax.f32 %v2396_v42, %v2502_v34  ;;  %v2504_v51 = vmul.f32 0.01, %v2400_v15  ;;  %v5699_v42 = vld [vmem:[#allocation6 + $0x160] ss:$8 sps:$4 sm:$0xff]  }
 0x400   :  { %v2599_v25 = vmax.f32 %v2398_v59, %v2503_v0  ;;  %v2505_v29 = vmul.f32 0.01, %v2402_v50  ;;  %v5701_v34 = vld [vmem:[#allocation6 + $0x180] ss:$8 sps:$4 sm:$0xff]  }
 0x401   :  { %v2715_v16 = vmax.f32 %v2714_v53, %v2598_v28  ;;  %v2600_v19 = vmax.f32 %v2400_v15, %v2504_v51  ;;  %v5704_v28 = vld [vmem:[#allocation6 + $0x1b0] ss:$8 sps:$4 sm:$0xff]   ;;  %v5705_v51 = vld [vmem:[#allocation6 + $0x1c0] ss:$8 sps:$4 sm:$0xff]  }
 0x402   :  { %v2732_v37 = vmax.f32 %v2731_v26, %v2599_v25  ;;  %v2601_v11 = vmax.f32 %v2402_v50, %v2505_v29  ;;  %v2405_v54 = vpop.f32.mrb[140].mxu0  ;;  %v5706_v25 = vld [vmem:[#allocation6 + $0x1d0] ss:$8 sps:$4 sm:$0xff]  }
 0x403   :  { %v2716_v1 = vmax.f32 %v2715_v16, %v2600_v19  ;;  %v2406_v40 = vadd.f32 %v2405_v54, %v7622_v36  ;;  %v2407_v2 = vpop.f32.mrb[141].mxu0  ;;  %v2915_v16 = vld [vmem:[%s8094_s7 + $0x3] ss:$0 sm:$0xff] }
 0x404   :  { %v2733_v52 = vmax.f32 %v2732_v37, %v2601_v11  ;;  %v2408_v6 = vadd.f32 %v2407_v2, %v7625_v30  ;;  %v2409_v57 = vpop.f32.mrb[142].mxu0 }
 0x405   :  { %v2506_v24 = vmul.f32 0.01, %v2406_v40  ;;  %v2410_v48 = vadd.f32 %v2409_v57, %v7622_v36  ;;  %v2411_v33 = vpop.f32.mrb[143].mxu0 }
 0x406   :  { %v2507_v46 = vmul.f32 0.01, %v2408_v6  ;;  %v2412_v4 = vadd.f32 %v2411_v33, %v7625_v30 }
 0x407   :  { %v2602_v62 = vmax.f32 %v2406_v40, %v2506_v24  ;;  %v2508_v23 = vmul.f32 0.01, %v2410_v48 }
 0x408   :  { %v2603_v60 = vmax.f32 %v2408_v6, %v2507_v46  ;;  %v2509_v20 = vmul.f32 0.01, %v2412_v4  ;;  %v5708_v46 = vld [vmem:[#allocation6 + $0x1f0] ss:$8 sps:$4 sm:$0xff]  }
 0x409   :  { %v2717_v39 = vmax.f32 %v2716_v1, %v2602_v62  ;;  %v2604_v3 = vmax.f32 %v2410_v48, %v2508_v23  ;;  %v5707_v48 = vld [vmem:[#allocation6 + $0x1e0] ss:$8 sps:$4 sm:$0xff]   ;;  %v5710_v62 = vld [vmem:[#allocation6 + $0x210] ss:$8 sps:$4 sm:$0xff]  }
 0x40a   :  { %v2734_v22 = vmax.f32 %v2733_v52, %v2603_v60  ;;  %v2605_v56 = vmax.f32 %v2412_v4, %v2509_v20  ;;  %v5709_v4 = vld [vmem:[#allocation6 + $0x200] ss:$8 sps:$4 sm:$0xff]   ;;  %v5712_v60 = vld [vmem:[#allocation6 + $0x230] ss:$8 sps:$4 sm:$0xff]  }
 0x40b   :  { %v2718_v21 = vmax.f32 %v2717_v39, %v2604_v3  ;;  %v5711_v23 = vld [vmem:[#allocation6 + $0x220] ss:$8 sps:$4 sm:$0xff]   ;;  %v5714_v39 = vld [vmem:[#allocation6 + $0x250] ss:$8 sps:$4 sm:$0xff]   ;;  %v2936_v3 = vld [vmem:[%s8094_s7 + $0x4] ss:$0 sm:$0xff] }
 0x40c   :  { %v2735_v38 = vmax.f32 %v2734_v22, %v2605_v56  ;;  %v5713_v20 = vld [vmem:[#allocation6 + $0x240] ss:$8 sps:$4 sm:$0xff]  }
 0x40d   :  { %v2719_v45 = vrot.slane %v2718_v21, 4 }
 0x40e   :  { %v2736_v7 = vrot.slane %v2735_v38, 4 }
 0x40f   :  { %v2720_v35 = vmax.f32 %v2718_v21, %v2719_v45 }
 0x410   :  { %v2737_v10 = vmax.f32 %v2735_v38, %v2736_v7 }
 0x411   :  { %v2721_v27 = vrot.slane %v2720_v35, 2 }
 0x412   :  { %v2738_v36 = vrot.slane %v2737_v10, 2 }
 0x413   :  { %v2722_v63 = vmax.f32 %v2720_v35, %v2721_v27 }
 0x414   :  { %v2739_v8 = vmax.f32 %v2737_v10, %v2738_v36  ;;  %v5715_v10 = vld [vmem:[#allocation6 + $0x260] ss:$8 sps:$4 sm:$0xff]   ;;  %v5716_v36 = vld [vmem:[#allocation6 + $0x270] ss:$8 sps:$4 sm:$0xff]  }
 0x415   :  { %v2723_v55 = vrot.slane %v2722_v63, 1 }
 0x416   :  { %v2740_v30 = vrot.slane %v2739_v8, 1 }
 0x417   :  { %v2724_v31 = vmax.f32 %v2722_v63, %v2723_v55  ;;  %v5717_v63 = vld [vmem:[#allocation6 + $0x280] ss:$8 sps:$4 sm:$0xff]  }
 0x418   :  { %v2741_v32 = vmax.f32 %v2739_v8, %v2740_v30  ;;  %v5718_v8 = vld [vmem:[#allocation6 + $0x290] ss:$8 sps:$4 sm:$0xff]   ;;  %v5719_v55 = vld [vmem:[#allocation6 + $0x2a0] ss:$8 sps:$4 sm:$0xff]  }
 0x419   :  { %v2746_v14 = vpack.c.bf16 %v2724_v31, %v2724_v31  ;;  %v5720_v30 = vld [vmem:[#allocation6 + $0x2b0] ss:$8 sps:$4 sm:$0xff]   ;;  %v5721_v31 = vld [vmem:[#allocation6 + $0x2c0] ss:$8 sps:$4 sm:$0xff]  }
 0x41a   :  { %v3672_v18 = vpack.c.bf16 %v2741_v32, %v2741_v32  ;;  %v5722_v32 = vld [vmem:[#allocation6 + $0x2d0] ss:$8 sps:$4 sm:$0xff]  }
 0x41b   :  { %v2818_v17 = vunpack.c.l.b16 %v2746_v14  ;;  %v3044_v14 = vld [vmem:[%s8094_s7 + $0x5] ss:$0 sm:$0xff] }
 0x41c   :  { %v3749_v58 = vunpack.c.l.b16 %v3672_v18 }
 0x41d   :  { %v2824_v53 = vsel %vm2823_vm12, %v2818_v17, %v7745_v44  ;;  %v5702_v44 = vld [vmem:[#allocation6 + $0x190] ss:$8 sps:$4 sm:$0xff]  }
 0x41e   :  { %v2825_v47 = vpack.c.b16 %v2824_v53, %v2824_v53  ;;  %v3752_v26 = vsel %vm2823_vm12, %v3749_v58, %v7749_v43  ;;  %v5703_v43 = vld [vmem:[#allocation6 + $0x1a0] ss:$8 sps:$4 sm:$0xff]  }
 0x41f   :  { %v3753_v59 = vpack.c.b16 %v3752_v26, %v3752_v26 }
 0x420   :  { %5164 = vmatmul.mubr.bf16.vlgmr.msra.gmra.mrb[52].mxu1 %v2825_v47 }
 0x421   :  { %3868 = vmatmul.mubr.bf16.vlgmr.msra.gmra.mrb[144].mxu0 %v3753_v59  ;;  %5168 = vmatpush3.bf16.msra.mxu1 %v5699_v42  ;;  %v5723_v59 = vld [vmem:[#allocation6 + $0x2e0] ss:$8 sps:$4 sm:$0xff]  }
 0x422   :  { %5169 = vmatprep.subr.bf16.mxu1 %v6131_v13  ;;  %5183 = vmatprep.mubr.msk.bf16.mxu1 %vm6132_vm9, %v6131_v13 }
 0x423   :  { %5263 = vmatprep.mubr.msk.bf16.mxu0 %vm6132_vm9, %v6131_v13 }
 0x425   :  { %5170 = vmatpush3.bf16.msra.mxu1 %v5700_v9 }
 0x426   :  { %5171 = vmatprep.subr.bf16.mxu1 %v6131_v13 }
 0x429   :  { %5172 = vmatpush3.bf16.msra.mxu1 %v5701_v34  ;;  %v5724_v34 = vld [vmem:[#allocation6 + $0x2f0] ss:$8 sps:$4 sm:$0xff]  }
 0x42a   :  { %5173 = vmatprep.subr.bf16.mxu1 %v6131_v13 }
 0x42d   :  { %5174 = vmatpush3.bf16.msra.mxu1 %v5702_v44  ;;  %v5725_v44 = vld [vmem:[#allocation6 + $0x300] ss:$8 sps:$4 sm:$0xff]  }
 0x42e   :  { %5175 = vmatprep.subr.bf16.mxu1 %v6131_v13 }
 0x431   :  { %5176 = vmatpush3.bf16.msra.mxu1 %v5703_v43  ;;  %v5726_v43 = vld [vmem:[#allocation6 + $0x310] ss:$8 sps:$4 sm:$0xff]  }
 0x432   :  { %5177 = vmatprep.subr.bf16.mxu1 %v6131_v13 }
 0x435   :  { %5178 = vmatpush3.bf16.msra.mxu1 %v5704_v28  ;;  %v3689_v28 = vld [vmem:[#allocation6 + $0x3e0] sm:$0xff] }
 0x436   :  { %5179 = vmatprep.subr.bf16.mxu1 %v6131_v13 }
 0x439   :  { %5180 = vmatpush3.bf16.msra.mxu1 %v5705_v51  ;;  %v4803_v51 = vcombine.high %v3689_v28, %v3689_v28 }
 0x43a   :  { %5181 = vmatprep.subr.bf16.mxu1 %v6131_v13 }
 0x43d   :  { %5182 = vmatpush3.bf16.msra.mxu1 %v5706_v25  ;;  %v3152_v25 = vld [vmem:[%s8094_s7 + $0x6] ss:$0 sm:$0xff] }
 0x43e   :  { %5187 = vmatprep.subr.bf16.mxu1 %v6131_v13 }
 0x43f   :  { %v2805_v15 = vpop.f32.mrb[48].mxu1 }
 0x440   :  { %v5145_v61 = vpop.f32.mrb[49].mxu1 }
 0x441   :  { %v2808_v0 = vpop.f32.mrb[50].mxu1  ;;  %v5728_v61 = vld [vmem:[#allocation6 + $0x330] ss:$8 sps:$4 sm:$0xff]  }
 0x442   :  { %v5146_v50 = vpop.f32.mrb[51].mxu1  ;;  %v5729_v0 = vld [vmem:[#allocation6 + $0x340] ss:$8 sps:$4 sm:$0xff]  }
 0x443   :  { %v5730_v50 = vld [vmem:[#allocation6 + $0x350] ss:$8 sps:$4 sm:$0xff]  }
 0x4f3   :  { %v2909_v29 = vpop.f32.mrb[52].mxu1 }
 0x4f4   :  { %v2910_v19 = vadd.f32 %v2909_v29, %v2805_v15  ;;  %v5165_v37 = vpop.f32.mrb[53].mxu1  ;;  %v7780_v11 = vpop.f32.mrb[144].mxu0  ;;  %v5727_v15 = vld [vmem:[#allocation6 + $0x320] ss:$8 sps:$4 sm:$0xff]  }
 0x4f5   :  { %v2912_v54 = vpop.f32.mrb[54].mxu1  ;;  %v7782_v1 = vpop.f32.mrb[145].mxu0 }
 0x4f6   :  { %v2916_v40 = vadd.f32 %v2915_v16, %v2910_v19  ;;  %v5166_v2 = vpop.f32.mrb[55].mxu1  ;;  %v3873_v52 = vpop.f32.mrb[146].mxu0 }
 0x4f7   :  { %v3874_v6 = vpop.f32.mrb[147].mxu0  ;;  %v4802_v2 = vcombine.low %v3689_v28, %v3689_v28 }
 0x4f8   :  { %v2917_v57 = vmul.f32 0.01, %v2916_v40 }
 0x4fa   :  { %v2918_v24 = vmax.f32 %v2916_v40, %v2917_v57  ;;  %v3696_v57 = vsel %vm2767_vm8, %v4802_v2, 0 }
 0x4fc   :  { %v2919_v33 = vpack.c.bf16 %v2918_v24, %v2918_v24  ;;  %v3260_v24 = vld [vmem:[%s8094_s7 + $0x7] ss:$0 sm:$0xff] }
 0x4fe   :  { %5184 = vmatmul.mubr.bf16.vlgmr.msra.gmra.mrb[56].mxu1 %v2919_v33 }
 0x4ff   :  { %5188 = vmatpush3.bf16.msra.mxu1 %v5707_v48  ;;  %5203 = vmatprep.mubr.msk.bf16.mxu1 %vm6132_vm9, %v6131_v13 }
 0x500   :  { %5189 = vmatprep.subr.bf16.mxu1 %v6131_v13 }
 0x503   :  { %5190 = vmatpush3.bf16.msra.mxu1 %v5708_v46 }
 0x504   :  { %5191 = vmatprep.subr.bf16.mxu1 %v6131_v13 }
 0x507   :  { %5192 = vmatpush3.bf16.msra.mxu1 %v5709_v4 }
 0x508   :  { %5193 = vmatprep.subr.bf16.mxu1 %v6131_v13 }
 0x50b   :  { %5194 = vmatpush3.bf16.msra.mxu1 %v5710_v62 }
 0x50c   :  { %5195 = vmatprep.subr.bf16.mxu1 %v6131_v13 }
 0x50f   :  { %5196 = vmatpush3.bf16.msra.mxu1 %v5711_v23 }
 0x510   :  { %5197 = vmatprep.subr.bf16.mxu1 %v6131_v13 }
 0x513   :  { %5198 = vmatpush3.bf16.msra.mxu1 %v5712_v60 }
 0x514   :  { %5199 = vmatprep.subr.bf16.mxu1 %v6131_v13 }
 0x517   :  { %5200 = vmatpush3.bf16.msra.mxu1 %v5713_v20 }
 0x518   :  { %5201 = vmatprep.subr.bf16.mxu1 %v6131_v13 }
 0x51b   :  { %5202 = vmatpush3.bf16.msra.mxu1 %v5714_v39 }
 0x51c   :  { %5207 = vmatprep.subr.bf16.mxu1 %v6131_v13 }
 0x5d1   :  { %v3019_v22 = vpop.f32.mrb[56].mxu1 }
 0x5d2   :  { %v3020_v56 = vadd.f32 %v3019_v22, %v2936_v3  ;;  %v5185_v21 = vpop.f32.mrb[57].mxu1 }
 0x5d3   :  { %v3022_v38 = vpop.f32.mrb[58].mxu1 }
 0x5d4   :  { %v3025_v45 = vmul.f32 0.01, %v3020_v56  ;;  %v5186_v7 = vpop.f32.mrb[59].mxu1 }
 0x5d6   :  { %v3026_v35 = vmax.f32 %v3020_v56, %v3025_v45 }
 0x5d8   :  { %v3027_v27 = vpack.c.bf16 %v3026_v35, %v3026_v35 }
 0x5da   :  { %5204 = vmatmul.mubr.bf16.vlgmr.msra.gmra.mrb[60].mxu1 %v3027_v27 }
 0x5db   :  { %5208 = vmatpush3.bf16.msra.mxu1 %v5715_v10  ;;  %5223 = vmatprep.mubr.msk.bf16.mxu1 %vm6132_vm9, %v6131_v13 }
 0x5dc   :  { %5209 = vmatprep.subr.bf16.mxu1 %v6131_v13 }
 0x5df   :  { %5210 = vmatpush3.bf16.msra.mxu1 %v5716_v36 }
 0x5e0   :  { %5211 = vmatprep.subr.bf16.mxu1 %v6131_v13 }
 0x5e3   :  { %5212 = vmatpush3.bf16.msra.mxu1 %v5717_v63 }
 0x5e4   :  { %5213 = vmatprep.subr.bf16.mxu1 %v6131_v13 }
 0x5e7   :  { %5214 = vmatpush3.bf16.msra.mxu1 %v5718_v8 }
 0x5e8   :  { %5215 = vmatprep.subr.bf16.mxu1 %v6131_v13 }
 0x5eb   :  { %5216 = vmatpush3.bf16.msra.mxu1 %v5719_v55 }
 0x5ec   :  { %5217 = vmatprep.subr.bf16.mxu1 %v6131_v13 }
 0x5ef   :  { %5218 = vmatpush3.bf16.msra.mxu1 %v5720_v30 }
 0x5f0   :  { %5219 = vmatprep.subr.bf16.mxu1 %v6131_v13 }
 0x5f3   :  { %5220 = vmatpush3.bf16.msra.mxu1 %v5721_v31 }
 0x5f4   :  { %5221 = vmatprep.subr.bf16.mxu1 %v6131_v13 }
 0x5f7   :  { %5222 = vmatpush3.bf16.msra.mxu1 %v5722_v32 }
 0x5f8   :  { %5227 = vmatprep.subr.bf16.mxu1 %v6131_v13 }
 0x6ad   :  { %v3127_v18 = vpop.f32.mrb[60].mxu1 }
 0x6ae   :  { %v3128_v17 = vadd.f32 %v3127_v18, %v3044_v14  ;;  %v5205_v58 = vpop.f32.mrb[61].mxu1 }
 0x6af   :  { %v3130_v53 = vpop.f32.mrb[62].mxu1 }
 0x6b0   :  { %v3133_v42 = vmul.f32 0.01, %v3128_v17  ;;  %v5206_v47 = vpop.f32.mrb[63].mxu1 }
 0x6b2   :  { %v3134_v26 = vmax.f32 %v3128_v17, %v3133_v42 }
 0x6b4   :  { %v3135_v9 = vpack.c.bf16 %v3134_v26, %v3134_v26  ;;  %v108_v26 = vld [vmem:[%s8090_s3] sm:$0xf]  ;;  %s6151_s3 = smov 7  }
 0x6b6   :  { %5224 = vmatmul.mubr.bf16.vlgmr.msra.gmra.mrb[64].mxu1 %v3135_v9 }
 0x6b7   :  { %5228 = vmatpush3.bf16.msra.mxu1 %v5723_v59  ;;  %5243 = vmatprep.mubr.msk.bf16.mxu1 %vm6132_vm9, %v6131_v13 }
 0x6b8   :  { %5229 = vmatprep.subr.bf16.mxu1 %v6131_v13 }
 0x6bb   :  { %5230 = vmatpush3.bf16.msra.mxu1 %v5724_v34 }
 0x6bc   :  { %5231 = vmatprep.subr.bf16.mxu1 %v6131_v13 }
 0x6bf   :  { %5232 = vmatpush3.bf16.msra.mxu1 %v5725_v44 }
 0x6c0   :  { %5233 = vmatprep.subr.bf16.mxu1 %v6131_v13 }
 0x6c3   :  { %5234 = vmatpush3.bf16.msra.mxu1 %v5726_v43 }
 0x6c4   :  { %5235 = vmatprep.subr.bf16.mxu1 %v6131_v13 }
 0x6c7   :  { %5236 = vmatpush3.bf16.msra.mxu1 %v5727_v15 }
 0x6c8   :  { %5237 = vmatprep.subr.bf16.mxu1 %v6131_v13 }
 0x6cb   :  { %5238 = vmatpush3.bf16.msra.mxu1 %v5728_v61 }
 0x6cc   :  { %5239 = vmatprep.subr.bf16.mxu1 %v6131_v13 }
 0x6cf   :  { %5240 = vmatpush3.bf16.msra.mxu1 %v5729_v0 }
 0x6d0   :  { %5241 = vmatprep.subr.bf16.mxu1 %v6131_v13 }
 0x6d3   :  { %5242 = vmatpush3.bf16.msra.mxu1 %v5730_v50 }
 0x6d4   :  { %4804 = vmatprep.subr.msk.bf16.mxu1 %vm2767_vm8, %v4803_v51 }
 0x789   :  { %v3235_v29 = vpop.f32.mrb[64].mxu1 }
 0x78a   :  { %v3236_v16 = vadd.f32 %v3235_v29, %v3152_v25  ;;  %v5225_v19 = vpop.f32.mrb[65].mxu1 }
 0x78b   :  { %v3238_v37 = vpop.f32.mrb[66].mxu1 }
 0x78c   :  { %v3241_v54 = vmul.f32 0.01, %v3236_v16  ;;  %v5226_v40 = vpop.f32.mrb[67].mxu1 }
 0x78d   :  { %v107_v40 = vld [vmem:[%s8089_s2] sm:$0xf]  ;;  %s6140_s2 = smov 126  }
 0x78e   :  { %v3242_v52 = vmax.f32 %v3236_v16, %v3241_v54 }
 0x790   :  { %v3243_v6 = vpack.c.bf16 %v3242_v52, %v3242_v52 }
 0x792   :  { %5244 = vmatmul.mubr.bf16.vlgmr.msra.gmra.mrb[68].mxu1 %v3243_v6 }
 0x793   :  { %3702 = vmatpush1.bf16.msra.mxu1 %v3696_v57  ;;  %3733 = vmatprep.mubr.bf16.mxu1 %v6130_v12 }
 0x79a   :  { %4805 = vmatmul.mubr.msk.bf16.vlgmr.msra.gmra.mrb[72].mxu1 %vm1029_vm4, %v7664_v49 }
 0x79b   :  { %3943 = vmatprep.mubr.bf16.mxu1 %v6130_v12 }
 0x865   :  { %v3343_v48 = vpop.f32.mrb[68].mxu1 }
 0x866   :  { %v7831_v33 = vadd.f32 %v3343_v48, %v3260_v24  ;;  %v5245_v46 = vpop.f32.mrb[69].mxu1 }
 0x867   :  { %v3346_v4 = vpop.f32.mrb[70].mxu1 }
 0x868   :  { %3358 = vrot.lane.b32.xlu1 %v7831_v33, %s6133_s15  ;;  %3354 = vrot.lane.b32.xlu0 %v7831_v33, %s6134_s16  ;;  %v5246_v49 = vpop.f32.mrb[71].mxu1 }
 0x86c   :  { %3362 = vrot.lane.b32.xlu0 %v7831_v33, %s6135_s5 }
 0x86d   :  { %v3735_v62 = vpop.f32.mrb[72].mxu1 }
 0x86e   :  { %v7840_v23 = vadd.f32 %v7780_v11, %v3735_v62  ;;  %v3737_v60 = vpop.f32.mrb[73].mxu1 }
 0x86f   :  { %v7843_v20 = vadd.f32 %v7782_v1, %v3737_v60  ;;  %v3739_v39 = vpop.f32.mrb[74].mxu1 }
 0x870   :  { %v3740_v3 = vpop.f32.mrb[75].mxu1 }
 0x8da   :  { %v7845_v22 = vpop.permute.xlu0 %3354  ;;  %v7849_v21 = vpop.permute.xlu1 %3358 }
 0x8db   :  { %v3357_v56 = vmax.f32 %v7831_v33, %v7845_v22 }
 0x8dd   :  { %v3361_v38 = vmax.f32 %v3357_v56, %v7849_v21 }
 0x8de   :  { %v7852_v45 = vpop.permute.xlu0 %3362 }
 0x8df   :  { %v7855_v11 = vmax.f32 %v3361_v38, %v7852_v45 }
 0x8e1   :  { %3376 = vrot.lane.b32.xlu0 %v7855_v11, %s6136_s17  ;;  %3370 = vrot.lane.b32.xlu1 %v7855_v11, %s6137_s18  ;;  %v3366_v14 = vsub.f32 %v7831_v33, %v7855_v11 }
 0x8e3   :  { %v3367_v18 = vmul.f32 1.442695, %v3366_v14 }
 0x8e5   :  { %3382 = vrot.lane.b32.xlu1 %v7855_v11, %s6138_s19 }
 0x953   :  { %v3377_v1 = vpop.permute.xlu0 %3376  ;;  %v3371_v7 = vpop.permute.xlu1 %3370 }
 0x954   :  { %v3379_v35 = vsub.f32 %v7831_v33, %v3377_v1  ;;  %v3373_v10 = vsub.f32 %v7831_v33, %v3371_v7 }
 0x956   :  { %v3380_v27 = vmul.f32 1.442695, %v3379_v35  ;;  %v3374_v36 = vmul.f32 1.442695, %v3373_v10  ;;  %v3891_v10 = vld [vmem:[#allocation6 + $0x3f0] sm:$0x11] }
 0x957   :  { %v3383_v63 = vpop.permute.xlu1 %3382 }
 0x958   :  { %5999 = vpow2.f32 %v3380_v27  ;;  %v3385_v8 = vsub.f32 %v7831_v33, %v3383_v63  ;;  %v4824_v27 = vcombine.high %v3891_v10, %v3891_v10 }
 0x959   :  { %6001 = vpow2.f32 %v3374_v36  ;;  %v4823_v36 = vcombine.low %v3891_v10, %v3891_v10  ;;  %v5753_v10 = vld [vmem:[#allocation6 + $0x460] ss:$8 sps:$4 sm:$0xff]  }
 0x95a   :  { %v3386_v55 = vmul.f32 1.442695, %v3385_v8 }
 0x95c   :  { %6003 = vpow2.f32 %v3386_v55 }
 0x95d   :  { %6005 = vpow2.f32 %v3367_v18 }
 0x95e   :  { %6007 = vtanh.f32 %v7831_v33 }
 0x962   :  { %v6000_v30 = vpop.eup %5999 }
 0x963   :  { %v6002_v31 = vpop.eup %6001  ;;  %3394 = vrot.lane.b32.xlu1 %v6000_v30, %s6133_s15 }
 0x964   :  { %3389 = vrot.lane.b32.xlu0 %v6002_v31, %s6134_s16 }
 0x966   :  { %v6004_v32 = vpop.eup %6003 }
 0x967   :  { %v6006_v17 = vpop.eup %6005 }
 0x968   :  { %3399 = vrot.lane.b32.xlu0 %v6004_v32, %s6135_s5  ;;  %v6008_v0 = vpop.eup %6007 }
 0x969   :  { %v3350_v50 = vadd.f32 1.0, %v6008_v0 }
 0x96b   :  { %v3351_v28 = vmul.f32 11.0, %v3350_v50 }
 0x96d   :  { %v7882_v51 = vadd.f32 -20.0, %v3351_v28 }
 0x96f   :  { %v3416_v25 = vmul.f32 1.442695, %v7882_v51  ;;  %v3495_v48 = vsub.f32 0.0, %v7882_v51 }
 0x971   :  { %6009 = vpow2.f32 %v3416_v25  ;;  %v3496_v4 = vmul.f32 1.442695, %v3495_v48 }
 0x973   :  { %6011 = vpow2.f32 %v3496_v4  ;;  %v5737_v4 = vld [vmem:[#allocation6 + $0x404] ss:$8 sps:$4 sm:$0xff]  }
 0x97b   :  { %v6010_v29 = vpop.eup %6009 }
 0x97d   :  { %v6012_v35 = vpop.eup %6011 }
 0x9d5   :  { %v3395_v42 = vpop.permute.xlu1 %3394 }
 0x9d6   :  { %v3390_v58 = vpop.permute.xlu0 %3389 }
 0x9d7   :  { %v3392_v53 = vadd.f32 %v6006_v17, %v3390_v58 }
 0x9d9   :  { %v3397_v47 = vadd.f32 %v3395_v42, %v3392_v53 }
 0x9da   :  { %v3400_v59 = vpop.permute.xlu0 %3399 }
 0x9db   :  { %v7874_v9 = vadd.f32 %v3400_v59, %v3397_v47 }
 0x9dd   :  { %v3403_v34 = vmul.f32 %v7874_v9, %v108_v26 }
 0x9df   :  { %vm3442_vm13 = vcmp.ge.f32.partialorder %v3403_v34, %v3392_v53  ;;  %vm3443_vm14 = vcmp.lt.f32.partialorder %v3403_v34, %v3397_v47  ;;  %vm3420_vm15 = vcmp.ge.f32.partialorder %v3403_v34, %v6006_v17  ;;  %vm3421_vm0 = vcmp.lt.f32.partialorder %v3403_v34, %v3392_v53 }
 0x9e0   :  { %vm3444_vm2 = vmand %vm3442_vm13, %vm3443_vm14  ;;  %vm3464_vm7 = vcmp.ge.f32.partialorder %v3403_v34, %v3397_v47  ;;  %vm3404_vm10 = vcmp.ge.f32.partialorder %v3403_v34, 0.0  ;;  %vm3405_vm11 = vcmp.lt.f32.partialorder %v3403_v34, %v6006_v17  ;;  %vm3904_vm13 = vcmask 1040384  }
 0x9e1   :  { %v4800_v44 = vsel %vm3444_vm2, 1.0, %v6131_v13  ;;  %vm3422_vm6 = vmand %vm3420_vm15, %vm3421_vm0  ;;  %v4801_v15 = vsel %vm3464_vm7, 1.0, %v6131_v13  ;;  %4825 = vmatprep.subr.msk.bf16.mxu1 %vm3904_vm13, %v4824_v27  ;;  %v3906_v63 = vsel %vm3904_vm13, %v4823_v36, 0  ;;  %vm3508_vm14 = vcmask 11264   ;;  %v5756_v36 = vld [vmem:[#allocation6 + $0x470] ss:$8 sps:$4 sm:$0xff]  }
 0x9e2   :  { %3449 = vperm.xlu0 %5637, %v4800_v44   ;;  %v4799_v43 = vsel %vm3422_vm6, 1.0, %v6131_v13  ;;  %vm3406_vm12 = vmand %vm3404_vm10, %vm3405_vm11  ;;  %3912 = vmatpush1.bf16.msra.mxu1 %v3906_v63  ;;  %v109_v44 = vld [vmem:[%s8091_s4] sm:$0xf]  ;;  %vm4664_vm15 = vcmask 56320   ;;  %vm4668_vm0 = vcmask 125952  }
 0x9e3   :  { %3427 = vperm.xlu1 %5636, %v4799_v43   ;;  %v4798_v61 = vsel %vm3406_vm12, 1.0, %v6131_v13  ;;  %4827 = vmatprep.subr.msk.bf16.mxu1 %vm3904_vm13, %v4824_v27  ;;  %v3958_v28 = vpack.c.bf16 %v109_v44, %v109_v44  ;;  %v5755_v27 = vld [vmem:[#allocation6 + $0x464] ss:$8 sps:$4 sm:$0xff]  }
 0x9e7   :  { %3469 = vperm.xlu1 %5636, %v4801_v15  }
 0x9eb   :  { %3411 = vperm.xlu1 %5636, %v4798_v61  }
 0xa61   :  { %v3450_v16 = vpop.permute.xlu0 %3449 }
 0xa62   :  { %v3458_v19 = vmul.f32 %v6010_v29, %v3450_v16  ;;  %v3428_v37 = vpop.permute.xlu1 %3427  ;;  %v3452_v6 = vmul.f32 %v3450_v16, %v7831_v33 }
 0xa63   :  { %v3436_v54 = vmul.f32 %v6010_v29, %v3428_v37  ;;  %v3430_v57 = vmul.f32 %v3428_v37, %v7831_v33 }
 0xa64   :  { %3460 = vrot.lane.b32.xlu1 %v3458_v19, %s6133_s15 }
 0xa65   :  { %3438 = vrot.lane.b32.xlu0 %v3436_v54, %s6134_s16 }
 0xa66   :  { %v3470_v2 = vpop.permute.xlu1 %3469 }
 0xa67   :  { %v3478_v52 = vmul.f32 %v6010_v29, %v3470_v2  ;;  %v3472_v24 = vmul.f32 %v3470_v2, %v7831_v33 }
 0xa68   :  { %3485 = vrot.lane.b32.xlu1 %v107_v40, %s6139_s22 }
 0xa69   :  { %3480 = vrot.lane.b32.xlu0 %v3478_v52, %s6135_s5 }
 0xa6a   :  { %v3412_v46 = vpop.permute.xlu1 %3411 }
 0xa6b   :  { %v3418_v49 = vmul.f32 %v6010_v29, %v3412_v46  ;;  %v3414_v55 = vmul.f32 %v3412_v46, %v7831_v33  ;;  %v5735_v46 = vld [vmem:[#allocation6 + $0x400] ss:$8 sps:$4 sm:$0xff]  }
 0xa6c   :  { %3454 = vrot.lane.b32.xlu1 %v3452_v6, %s6133_s15  ;;  %5248 = vmatpush3.bf16.msra.mxu0 %v5735_v46 }
 0xa6d   :  { %3432 = vrot.lane.b32.xlu0 %v3430_v57, %s6134_s16  ;;  %5249 = vmatprep.subr.bf16.mxu0 %v6131_v13 }
 0xa71   :  { %3474 = vrot.lane.b32.xlu0 %v3472_v24, %s6135_s5 }
 0xad6   :  { %v3461_v62 = vpop.permute.xlu1 %3460 }
 0xad7   :  { %v3439_v60 = vpop.permute.xlu0 %3438 }
 0xad8   :  { %v3441_v39 = vadd.f32 %v3439_v60, %v3418_v49  ;;  %v5738_v49 = vld [vmem:[#allocation6 + $0x410] ss:$8 sps:$4 sm:$0xff]   ;;  %v5741_v60 = vld [vmem:[#allocation6 + $0x420] ss:$8 sps:$4 sm:$0xff]  }
 0xad9   :  { %5250 = vmatpush3.bf16.msra.mxu0 %v5738_v49 }
 0xada   :  { %v3463_v3 = vadd.f32 %v3461_v62, %v3441_v39  ;;  %v3486_v1 = vpop.permute.xlu1 %3485  ;;  %v5740_v62 = vld [vmem:[#allocation6 + $0x414] ss:$8 sps:$4 sm:$0xff]   ;;  %5251 = vmatprep.subr.bf16.mxu0 %v6131_v13  ;;  %v5743_v39 = vld [vmem:[#allocation6 + $0x424] ss:$8 sps:$4 sm:$0xff]  }
 0xadb   :  { %v3481_v56 = vpop.permute.xlu0 %3480 }
 0xadc   :  { %v3483_v38 = vadd.f32 %v3481_v56, %v3463_v3  ;;  %v5744_v3 = vld [vmem:[#allocation6 + $0x430] ss:$8 sps:$4 sm:$0xff]   ;;  %v5746_v56 = vld [vmem:[#allocation6 + $0x434] ss:$8 sps:$4 sm:$0xff]  }
 0xadd   :  { %5252 = vmatpush3.bf16.msra.mxu0 %v5741_v60 }
 0xade   :  { %v3488_v7 = vmul.f32 %v3486_v1, %v3483_v38  ;;  %v3455_v31 = vpop.permute.xlu1 %3454  ;;  %5253 = vmatprep.subr.bf16.mxu0 %v6131_v13  ;;  %v5747_v38 = vld [vmem:[#allocation6 + $0x440] ss:$8 sps:$4 sm:$0xff]   ;;  %v5749_v1 = vld [vmem:[#allocation6 + $0x444] ss:$8 sps:$4 sm:$0xff]  }
 0xadf   :  { %v3433_v8 = vpop.permute.xlu0 %3432 }
 0xae0   :  { %3490 = vrot.lane.b32.xlu1 %v3488_v7, %s6140_s2  ;;  %v3435_v30 = vadd.f32 %v3433_v8, %v3414_v55  ;;  %v5750_v7 = vld [vmem:[#allocation6 + $0x450] ss:$8 sps:$4 sm:$0xff]  }
 0xae1   :  { %5254 = vmatpush3.bf16.msra.mxu0 %v5744_v3 }
 0xae2   :  { %v3457_v32 = vadd.f32 %v3455_v31, %v3435_v30  ;;  %5255 = vmatprep.subr.bf16.mxu0 %v6131_v13 }
 0xae3   :  { %v3475_v14 = vpop.permute.xlu0 %3474 }
 0xae4   :  { %3524 = vrot.lane.b32.xlu1 %v6012_v35, %s6141_s23  ;;  %v7900_v18 = vadd.f32 %v3475_v14, %v3457_v32 }
 0xae5   :  { %5256 = vmatpush3.bf16.msra.mxu0 %v5747_v38 }
 0xae6   :  { %5257 = vmatprep.subr.bf16.mxu0 %v6131_v13 }
 0xae8   :  { %3570 = vrot.lane.b32.xlu1 %v6012_v35, %s6142_s24 }
 0xae9   :  { %5258 = vmatpush3.bf16.msra.mxu0 %v5750_v7 }
 0xaea   :  { %5259 = vmatprep.subr.bf16.mxu0 %v6131_v13 }
 0xaed   :  { %5260 = vmatpush3.bf16.msra.mxu0 %v5753_v10 }
 0xaee   :  { %5261 = vmatprep.subr.bf16.mxu0 %v6131_v13 }
 0xaf1   :  { %5262 = vmatpush3.bf16.msra.mxu0 %v5756_v36 }
 0xaf2   :  { %5287 = vmatprep.subr.bf16.mxu0 %v6131_v13 }
 0xb52   :  { %v3491_v17 = vpop.permute.xlu1 %3490 }
 0xb53   :  { %v3493_v58 = vadd.f32 %v3491_v17, %v7900_v18 }
 0xb55   :  { %6013 = vtanh.f32 %v3493_v58  ;;  %v3523_v53 = vsub.f32 %v3493_v58, %v7845_v22  ;;  %v3546_v43 = vsub.f32 %v3493_v58, %v7849_v21  ;;  %v3569_v0 = vsub.f32 %v3493_v58, %v7852_v45 }
 0xb56   :  { %v3525_v42 = vpop.permute.xlu1 %3524  ;;  %v3494_v16 = vsub.f32 %v3493_v58, %v7831_v33 }
 0xb57   :  { %v3527_v47 = vmul.f32 %v3525_v42, %v3523_v53 }
 0xb59   :  { %v3528_v26 = vmul.f32 %v3527_v47, %v3527_v47 }
 0xb5a   :  { %v3571_v15 = vpop.permute.xlu1 %3570 }
 0xb5b   :  { %3530 = vrot.lane.b32.xlu1 %v3528_v26, %s6143_s25 }
 0xb5f   :  { %v7905_v59 = vpop.eup %6013 }
 0xb60   :  { %v3892_v34 = vpack.c.bf16 %v7905_v59, %v7905_v59 }
 0xb62   :  { %3894 = vrot.lane.b32.xlu0 %v3892_v34, %s6143_s25 }
 0xb66   :  { %3547 = vrot.lane.b32.xlu0 %v6012_v35, %s6144_s26 }
 0xb6a   :  { %3499 = vrot.lane.b32.xlu0 %v6012_v35, %s6140_s2  ;;  %v5752_v35 = vld [vmem:[#allocation6 + $0x454] ss:$8 sps:$4 sm:$0xff]  }
 0xb6e   :  { %3537 = vrot.lane.b32.xlu0 %v7882_v51, %s6145_s27 }
 0xb72   :  { %3560 = vrot.lane.b32.xlu0 %v7882_v51, %s6146_s28 }
 0xb76   :  { %3583 = vrot.lane.b32.xlu0 %v7882_v51, %s6147_s1 }
 0xb7a   :  { %3514 = vrot.lane.b32.xlu0 %v7882_v51, %s6148_s29  ;;  %v3573_v51 = vmul.f32 %v3571_v15, %v3569_v0 }
 0xbcd   :  { %v3531_v2 = vpop.permute.xlu1 %3530 }
 0xbce   :  { %v3533_v6 = vsel %vm3508_vm14, %v3531_v2, 0.0 }
 0xbd4   :  { %v3895_v22 = vpop.permute.xlu0 %3894 }
 0xbd5   :  { %4826 = vmatmul.mubr.msk.bf16.vlgmr.msra.gmra.mrb[76].mxu1 %vm882_vm1, %v3895_v22  ;;  %v4822_v22 = vld [vmem:[%s8094_s7 + $0x10] ss:$8 sm:$0x3] }
 0xbd6   :  { %3963 = vmatpush1.bf16.msra.mxu1 %v3906_v63  ;;  %3994 = vmatprep.mubr.bf16.mxu1 %v6130_v12  ;;  %v3574_v12 = vmul.f32 %v3573_v51, %v3573_v51  ;;  %v5758_v63 = vld [vmem:[#allocation6 + $0x474] ss:$8 sps:$4 sm:$0xff]   ;;  %v3882_v44 = vrot.slane %v4822_v22, %v7614_v5 }
 0xbd7   :  { %5267 = vmatprep.subr.bf16.mxu1 %v6131_v13 }
 0xbd8   :  { %v3548_v61 = vpop.permute.xlu0 %3547  ;;  %v3889_v15 = vadd.f32 %v3882_v44, %v7840_v23  ;;  %v5780_v44 = vld [vmem:[#allocation6 + $0x4f0] ss:$8 sps:$4 sm:$0xff]  }
 0xbd9   :  { %v3550_v50 = vmul.f32 %v3548_v61, %v3546_v43  ;;  %v3886_v43 = vrot.slane %v4822_v22, %v7619_v41  ;;  %v5779_v22 = vld [vmem:[#allocation6 + $0x4e4] ss:$8 sps:$4 sm:$0xff]  }
 0xbdb   :  { %v3551_v25 = vmul.f32 %v3550_v50, %v3550_v50  ;;  %v3890_v0 = vadd.f32 %v3886_v43, %v7843_v20  ;;  %v5782_v43 = vld [vmem:[#allocation6 + $0x4f4] ss:$8 sps:$4 sm:$0xff]  }
 0xbdc   :  { %v3500_v29 = vpop.permute.xlu0 %3499 }
 0xbdd   :  { %4828 = vmatmul.mubr.msk.bf16.vlgmr.msra.gmra.mrb[80].mxu1 %vm882_vm1, %v3958_v28  ;;  %3553 = vrot.lane.b32.xlu1 %v3551_v25, %s6143_s25  ;;  %v3502_v21 = vmul.f32 %v3500_v29, %v3494_v16 }
 0xbde   :  { %5283 = vmatprep.mubr.msk.bf16.mxu1 %vm6132_vm9, %v6131_v13  ;;  %5268 = vmatpush3.bf16.msra.mxu1 %v5737_v4 }
 0xbdf   :  { %v3503_v37 = vmul.f32 %v3502_v21, %v3502_v21  ;;  %5269 = vmatprep.subr.bf16.mxu1 %v6131_v13 }
 0xbe0   :  { %v3538_v19 = vpop.permute.xlu0 %3537 }
 0xbe1   :  { %3576 = vrot.lane.b32.xlu1 %v3574_v12, %s6143_s25  ;;  %v3540_v45 = vsel %vm3508_vm14, %v3538_v19, 0.0 }
 0xbe2   :  { %3541 = vadd.xlane.f32.xlu0 %v3540_v45  ;;  %5270 = vmatpush3.bf16.msra.mxu1 %v5740_v62 }
 0xbe3   :  { %5271 = vmatprep.subr.bf16.mxu1 %v6131_v13 }
 0xbe4   :  { %v3561_v54 = vpop.permute.xlu0 %3560 }
 0xbe5   :  { %3505 = vrot.lane.b32.xlu1 %v3503_v37, %s6143_s25  ;;  %v3563_v40 = vsel %vm3508_vm14, %v3561_v54, 0.0 }
 0xbe6   :  { %5272 = vmatpush3.bf16.msra.mxu1 %v5743_v39 }
 0xbe7   :  { %5273 = vmatprep.subr.bf16.mxu1 %v6131_v13 }
 0xbe8   :  { %v3584_v52 = vpop.permute.xlu0 %3583 }
 0xbe9   :  { %v3586_v57 = vsel %vm3508_vm14, %v3584_v52, 0.0 }
 0xbea   :  { %5274 = vmatpush3.bf16.msra.mxu1 %v5746_v56 }
 0xbeb   :  { %5275 = vmatprep.subr.bf16.mxu1 %v6131_v13 }
 0xbec   :  { %v3515_v24 = vpop.permute.xlu0 %3514 }
 0xbed   :  { %v3517_v48 = vsel %vm3508_vm14, %v3515_v24, 0.0 }
 0xbee   :  { %5276 = vmatpush3.bf16.msra.mxu1 %v5749_v1 }
 0xbef   :  { %5277 = vmatprep.subr.bf16.mxu1 %v6131_v13 }
 0xbf2   :  { %5278 = vmatpush3.bf16.msra.mxu1 %v5752_v35 }
 0xbf3   :  { %5279 = vmatprep.subr.bf16.mxu1 %v6131_v13 }
 0xbf6   :  { %5280 = vmatpush3.bf16.msra.mxu1 %v5755_v27 }
 0xbf7   :  { %5281 = vmatprep.subr.bf16.mxu1 %v6131_v13 }
 0xbfa   :  { %5282 = vmatpush3.bf16.msra.mxu1 %v5758_v63  ;;  %v5759_v63 = vld [vmem:[#allocation6 + $0x480] ss:$8 sps:$4 sm:$0xff]  }
 0xbfb   :  { %5307 = vmatprep.subr.bf16.mxu1 %v6131_v13 }
 0xc09   :  { %3564 = vadd.xlane.f32.xlu1 %v3563_v40 }
 0xc0d   :  { %3534 = vadd.xlane.f32.xlu1 %v3533_v6 }
 0xc11   :  { %3587 = vadd.xlane.f32.xlu1 %v3586_v57 }
 0xc15   :  { %3518 = vadd.xlane.f32.xlu1 %v3517_v48 }
 0xc4f   :  { %v3554_v8 = vpop.permute.xlu1 %3553 }
 0xc50   :  { %v3556_v55 = vsel %vm3508_vm14, %v3554_v8, 0.0  ;;  %v5761_v8 = vld [vmem:[#allocation6 + $0x484] ss:$8 sps:$4 sm:$0xff]  }
 0xc51   :  { %3557 = vadd.xlane.f32.xlu0 %v3556_v55  ;;  %v5762_v55 = vld [vmem:[#allocation6 + $0x490] ss:$8 sps:$4 sm:$0xff]  }
 0xc53   :  { %v3577_v30 = vpop.permute.xlu1 %3576 }
 0xc54   :  { %v3579_v31 = vsel %vm3508_vm14, %v3577_v30, 0.0  ;;  %v5764_v30 = vld [vmem:[#allocation6 + $0x494] ss:$8 sps:$4 sm:$0xff]  }
 0xc55   :  { %3580 = vadd.xlane.f32.xlu0 %v3579_v31  ;;  %v5765_v31 = vld [vmem:[#allocation6 + $0x4a0] ss:$8 sps:$4 sm:$0xff]  }
 0xc57   :  { %v3506_v32 = vpop.permute.xlu1 %3505 }
 0xc58   :  { %v3509_v14 = vsel %vm3508_vm14, %v3506_v32, 0.0  ;;  %v5767_v32 = vld [vmem:[#allocation6 + $0x4a4] ss:$8 sps:$4 sm:$0xff]  }
 0xc59   :  { %3510 = vadd.xlane.f32.xlu0 %v3509_v14  ;;  %v5768_v14 = vld [vmem:[#allocation6 + $0x4b0] ss:$8 sps:$4 sm:$0xff]  }
 0xc6f   :  { %v3542_v58 = vpop.xlane.xlu0 %3541 }
 0xc70   :  { %v3543_v42 = vadd.f32 1.837877, %v3542_v58  ;;  %v5771_v58 = vld [vmem:[#allocation6 + $0x4c0] ss:$8 sps:$4 sm:$0xff]  }
 0xc96   :  { %v3565_v17 = vpop.xlane.xlu1 %3564 }
 0xc97   :  { %v3566_v39 = vadd.f32 1.837877, %v3565_v17  ;;  %v5770_v17 = vld [vmem:[#allocation6 + $0x4b4] ss:$8 sps:$4 sm:$0xff]  }
 0xc9a   :  { %v3535_v53 = vpop.xlane.xlu1 %3534 }
 0xc9b   :  { %v3536_v47 = vmul.f32 -0.5, %v3535_v53  ;;  %v5773_v53 = vld [vmem:[#allocation6 + $0x4c4] ss:$8 sps:$4 sm:$0xff]  }
 0xc9d   :  { %v3544_v26 = vsub.f32 %v3536_v47, %v3543_v42  ;;  %v5774_v42 = vld [vmem:[#allocation6 + $0x4d0] ss:$8 sps:$4 sm:$0xff]   ;;  %v5776_v47 = vld [vmem:[#allocation6 + $0x4d4] ss:$8 sps:$4 sm:$0xff]  }
 0xc9e   :  { %v3588_v56 = vpop.xlane.xlu1 %3587 }
 0xc9f   :  { %v7955_v34 = vadd.f32 %v3544_v26, %v7831_v33  ;;  %v3589_v7 = vadd.f32 1.837877, %v3588_v56  ;;  %v5777_v26 = vld [vmem:[#allocation6 + $0x4e0] ss:$8 sps:$4 sm:$0xff]  }
 0xca1   :  { %3593 = vrot.lane.b32.xlu0 %v7955_v34, %s6134_s16 }
 0xca8   :  { %v3945_v61 = vpop.f32.mrb[76].mxu1 }
 0xca9   :  { %v3952_v50 = vadd.f32 %v3945_v61, %v3889_v15  ;;  %v3947_v28 = vpop.f32.mrb[77].mxu1 }
 0xcaa   :  { %v3953_v51 = vadd.f32 %v3947_v28, %v3890_v0  ;;  %v3949_v25 = vpop.f32.mrb[78].mxu1 }
 0xcab   :  { %v3950_v29 = vpop.f32.mrb[79].mxu1  ;;  %v3954_v37 = vmul.f32 0.01, %v3952_v50 }
 0xcac   :  { %v3955_v2 = vmul.f32 0.01, %v3953_v51 }
 0xcad   :  { %v3956_v57 = vmax.f32 %v3952_v50, %v3954_v37  ;;  %v3519_v50 = vpop.xlane.xlu1 %3518 }
 0xcae   :  { %v3957_v20 = vmax.f32 %v3953_v51, %v3955_v2  ;;  %v3520_v25 = vadd.f32 1.837877, %v3519_v50  ;;  %v5798_v50 = vld [vmem:[#allocation6 + $0x550] ss:$8 sps:$4 sm:$0xff]  }
 0xcb0   :  { %v3996_v16 = vpop.f32.mrb[80].mxu1 }
 0xcb1   :  { %v4003_v12 = vadd.f32 %v3996_v16, %v3889_v15  ;;  %v3998_v21 = vpop.f32.mrb[81].mxu1  ;;  %v3654_v15 = vmul.f32 %v7905_v59, %v7905_v59 }
 0xcb2   :  { %v4004_v19 = vadd.f32 %v3998_v21, %v3890_v0  ;;  %v4000_v45 = vpop.f32.mrb[82].mxu1 }
 0xcb3   :  { %v4005_v54 = vmul.f32 0.01, %v4003_v12  ;;  %v4001_v40 = vpop.f32.mrb[83].mxu1  ;;  %v3655_v0 = vsub.f32 1.0, %v3654_v15  ;;  %v5795_v15 = vld [vmem:[#allocation6 + $0x540] ss:$8 sps:$4 sm:$0xff]  }
 0xcb4   :  { %v4006_v52 = vmul.f32 0.01, %v4004_v19 }
 0xcb5   :  { %v4007_v6 = vmax.f32 %v4003_v12, %v4005_v54  ;;  %v3656_v51 = vmax.f32 %v3655_v0, 0.0 }
 0xcb6   :  { %v4008_v23 = vmax.f32 %v4004_v19, %v4006_v52 }
 0xcb7   :  { %v4011_v24 = vrot.slane %v4007_v6, 4  ;;  %v3657_v16 = vmin.f32 %v3656_v51, 1.0  ;;  %v4845_v6 = vld [vmem:[%s8094_s7 + $0x11] ss:$8 sm:$0x3] }
 0xcb8   :  { %v4012_v48 = vrot.slane %v4008_v23, 4  ;;  %v4201_v23 = vrot.slane %v4845_v6, %v7614_v5  ;;  %v5801_v51 = vld [vmem:[#allocation6 + $0x560] ss:$8 sps:$4 sm:$0xff]  }
 0xcb9   :  { %v4015_v46 = vsel %vm2767_vm8, %v3956_v57, %v4011_v24  ;;  %v3658_v45 = vadd.f32 1e-06, %v3657_v16  ;;  %v4205_v57 = vrot.slane %v4845_v6, %v7619_v41  ;;  %v5806_v16 = vld [vmem:[#allocation6 + $0x574] ss:$8 sps:$4 sm:$0xff]  }
 0xcba   :  { %v4016_v4 = vsel %vm2767_vm8, %v3957_v20, %v4012_v48  ;;  %v4033_v49 = vpack.c.bf16 %v4015_v46, %v4015_v46  ;;  %vm4659_vm8 = vcmask 31744  }
 0xcbb   :  { %v4034_v62 = vpack.c.bf16 %v4016_v4, %v4016_v4  ;;  %6015 = vlog2.f32 %v3658_v45 }
 0xcbc   :  { %5264 = vmatmul.mubr.bf16.vlgmr.msra.gmra.mrb[148].mxu0 %v4033_v49 }
 0xcbd   :  { %5284 = vmatmul.mubr.bf16.vlgmr.msra.gmra.mrb[84].mxu1 %v4034_v62  ;;  %5303 = vmatprep.mubr.msk.bf16.mxu0 %vm6132_vm9, %v6131_v13 }
 0xcbe   :  { %5323 = vmatprep.mubr.msk.bf16.mxu1 %vm6132_vm9, %v6131_v13  ;;  %5288 = vmatpush3.bf16.msra.mxu0 %v5759_v63 }
 0xcbf   :  { %5308 = vmatpush3.bf16.msra.mxu1 %v5761_v8  ;;  %5289 = vmatprep.subr.bf16.mxu0 %v6131_v13 }
 0xcc0   :  { %5309 = vmatprep.subr.bf16.mxu1 %v6131_v13 }
 0xcc2   :  { %5290 = vmatpush3.bf16.msra.mxu0 %v5762_v55 }
 0xcc3   :  { %5310 = vmatpush3.bf16.msra.mxu1 %v5764_v30  ;;  %5291 = vmatprep.subr.bf16.mxu0 %v6131_v13  ;;  %v5783_v30 = vld [vmem:[#allocation6 + $0x500] ss:$8 sps:$4 sm:$0xff]  }
 0xcc4   :  { %5311 = vmatprep.subr.bf16.mxu1 %v6131_v13 }
 0xcc5   :  { %v6016_v52 = vpop.eup %6015 }
 0xcc6   :  { %5292 = vmatpush3.bf16.msra.mxu0 %v5765_v31 }
 0xcc7   :  { %5312 = vmatpush3.bf16.msra.mxu1 %v5767_v32  ;;  %5293 = vmatprep.subr.bf16.mxu0 %v6131_v13 }
 0xcc8   :  { %5313 = vmatprep.subr.bf16.mxu1 %v6131_v13 }
 0xcca   :  { %5294 = vmatpush3.bf16.msra.mxu0 %v5768_v14  ;;  %v5785_v14 = vld [vmem:[#allocation6 + $0x504] ss:$8 sps:$4 sm:$0xff]  }
 0xccb   :  { %5314 = vmatpush3.bf16.msra.mxu1 %v5770_v17  ;;  %5295 = vmatprep.subr.bf16.mxu0 %v6131_v13 }
 0xccc   :  { %5315 = vmatprep.subr.bf16.mxu1 %v6131_v13 }
 0xcce   :  { %5296 = vmatpush3.bf16.msra.mxu0 %v5771_v58  ;;  %v5786_v58 = vld [vmem:[#allocation6 + $0x510] ss:$8 sps:$4 sm:$0xff]  }
 0xccf   :  { %5316 = vmatpush3.bf16.msra.mxu1 %v5773_v53  ;;  %5297 = vmatprep.subr.bf16.mxu0 %v6131_v13 }
 0xcd0   :  { %5317 = vmatprep.subr.bf16.mxu1 %v6131_v13 }
 0xcd2   :  { %5298 = vmatpush3.bf16.msra.mxu0 %v5774_v42 }
 0xcd3   :  { %5318 = vmatpush3.bf16.msra.mxu1 %v5776_v47  ;;  %5299 = vmatprep.subr.bf16.mxu0 %v6131_v13 }
 0xcd4   :  { %5319 = vmatprep.subr.bf16.mxu1 %v6131_v13 }
 0xcd6   :  { %5300 = vmatpush3.bf16.msra.mxu0 %v5777_v26  ;;  %v5791_v26 = vld [vmem:[#allocation6 + $0x524] ss:$8 sps:$4 sm:$0xff]  }
 0xcd7   :  { %5320 = vmatpush3.bf16.msra.mxu1 %v5779_v22  ;;  %5301 = vmatprep.subr.bf16.mxu0 %v6131_v13 }
 0xcd8   :  { %5321 = vmatprep.subr.bf16.mxu1 %v6131_v13 }
 0xcda   :  { %5302 = vmatpush3.bf16.msra.mxu0 %v5780_v44  ;;  %v5792_v44 = vld [vmem:[#allocation6 + $0x530] ss:$8 sps:$4 sm:$0xff]  }
 0xcdb   :  { %5322 = vmatpush3.bf16.msra.mxu1 %v5782_v43  ;;  %5327 = vmatprep.subr.bf16.mxu0 %v6131_v13 }
 0xcdc   :  { %5347 = vmatprep.subr.bf16.mxu1 %v6131_v13 }
 0xcde   :  { %v3558_v60 = vpop.xlane.xlu0 %3557 }
 0xcdf   :  { %v3559_v3 = vmul.f32 -0.5, %v3558_v60 }
 0xce1   :  { %v3567_v38 = vsub.f32 %v3559_v3, %v3566_v39 }
 0xce2   :  { %v3581_v1 = vpop.xlane.xlu0 %3580 }
 0xce3   :  { %v3582_v35 = vmul.f32 -0.5, %v3581_v1  ;;  %v7973_v10 = vadd.f32 %v3567_v38, %v7831_v33 }
 0xce5   :  { %v3590_v27 = vsub.f32 %v3582_v35, %v3589_v7  ;;  %3598 = vrot.lane.b32.xlu1 %v7973_v10, %s6133_s15 }
 0xce6   :  { %v3511_v61 = vpop.xlane.xlu0 %3510 }
 0xce7   :  { %v7978_v36 = vadd.f32 %v3590_v27, %v7831_v33  ;;  %v3512_v28 = vmul.f32 -0.5, %v3511_v61  ;;  %v5797_v61 = vld [vmem:[#allocation6 + $0x544] ss:$8 sps:$4 sm:$0xff]  }
 0xce9   :  { %3603 = vrot.lane.b32.xlu1 %v7978_v36, %s6135_s5  ;;  %v3521_v29 = vsub.f32 %v3512_v28, %v3520_v25  ;;  %v5800_v28 = vld [vmem:[#allocation6 + $0x554] ss:$8 sps:$4 sm:$0xff]   ;;  %v5803_v25 = vld [vmem:[#allocation6 + $0x564] ss:$8 sps:$4 sm:$0xff]  }
 0xceb   :  { %v8001_v21 = vadd.f32 %v3521_v29, %v7831_v33  ;;  %v3660_v33 = vmul.f32 0.6931472, %v6016_v52  ;;  %v5804_v29 = vld [vmem:[#allocation6 + $0x570] ss:$8 sps:$4 sm:$0xff]  }
 0xd13   :  { %v3594_v12 = vpop.permute.xlu0 %3593 }
 0xd14   :  { %v3596_v37 = vmax.f32 %v8001_v21, %v3594_v12 }
 0xd57   :  { %v3599_v19 = vpop.permute.xlu1 %3598 }
 0xd58   :  { %v3601_v54 = vmax.f32 %v3596_v37, %v3599_v19  ;;  %v4862_v37 = vld [vmem:[%s8094_s7 + $0x12] ss:$8 sm:$0x3] }
 0xd5b   :  { %v3604_v40 = vpop.permute.xlu1 %3603 }
 0xd5c   :  { %v8004_v2 = vmax.f32 %v3601_v54, %v3604_v40  ;;  %v4402_v40 = vrot.slane %v4862_v37, %v7619_v41 }
 0xd5e   :  { %3612 = vrot.lane.b32.xlu0 %v8004_v2, %s6137_s18  ;;  %v3607_v54 = vsub.f32 %v8001_v21, %v8004_v2 }
 0xd62   :  { %3623 = vrot.lane.b32.xlu0 %v8004_v2, %s6136_s17 }
 0xd66   :  { %3634 = vrot.lane.b32.xlu0 %v8004_v2, %s6138_s19  ;;  %s6150_s19 = smov 1  }
 0xd6a   :  { %3662 = vrot.lane.b32.xlu0 %v3660_v33, %s6143_s25  ;;  %v3608_v33 = vmul.f32 1.442695, %v3607_v54 }
 0xd8f   :  { %v4117_v24 = vpop.f32.mrb[148].mxu0 }
 0xd90   :  { %v4208_v20 = vadd.f32 %v4201_v23, %v4117_v24  ;;  %v5265_v48 = vpop.f32.mrb[149].mxu0  ;;  %v4189_v46 = vpop.f32.mrb[84].mxu1 }
 0xd91   :  { %v4209_v4 = vadd.f32 %v4205_v57, %v4189_v46  ;;  %v4120_v49 = vpop.f32.mrb[150].mxu0  ;;  %v5285_v62 = vpop.f32.mrb[85].mxu1 }
 0xd92   :  { %v4210_v60 = vmul.f32 0.01, %v4208_v20  ;;  %v5266_v39 = vpop.f32.mrb[151].mxu0  ;;  %v4192_v3 = vpop.f32.mrb[86].mxu1 }
 0xd93   :  { %v4211_v56 = vmul.f32 0.01, %v4209_v4  ;;  %v5286_v38 = vpop.f32.mrb[87].mxu1 }
 0xd94   :  { %v4212_v1 = vmax.f32 %v4208_v20, %v4210_v60 }
 0xd95   :  { %v4213_v7 = vmax.f32 %v4209_v4, %v4211_v56 }
 0xd96   :  { %v4230_v35 = vpack.c.bf16 %v4212_v1, %v4212_v1 }
 0xd97   :  { %v4231_v27 = vpack.c.bf16 %v4213_v7, %v4213_v7 }
 0xd98   :  { %5304 = vmatmul.mubr.bf16.vlgmr.msra.gmra.mrb[152].mxu0 %v4230_v35 }
 0xd99   :  { %5324 = vmatmul.mubr.bf16.vlgmr.msra.gmra.mrb[88].mxu1 %v4231_v27  ;;  %5343 = vmatprep.mubr.msk.bf16.mxu0 %vm6132_vm9, %v6131_v13 }
 0xd9a   :  { %5363 = vmatprep.mubr.msk.bf16.mxu1 %vm6132_vm9, %v6131_v13  ;;  %5328 = vmatpush3.bf16.msra.mxu0 %v5783_v30  ;;  %vm4661_vm9 = vcmask 39936  }
 0xd9b   :  { %5329 = vmatprep.subr.bf16.mxu0 %v6131_v13  ;;  %5348 = vmatpush3.bf16.msra.mxu1 %v5785_v14 }
 0xd9c   :  { %5349 = vmatprep.subr.bf16.mxu1 %v6131_v13 }
 0xd9e   :  { %5330 = vmatpush3.bf16.msra.mxu0 %v5786_v58 }
 0xd9f   :  { %5331 = vmatprep.subr.bf16.mxu0 %v6131_v13 }
 0xdd0   :  { %v3613_v63 = vpop.permute.xlu0 %3612 }
 0xdd1   :  { %v3615_v8 = vsub.f32 %v7955_v34, %v3613_v63  ;;  %v5788_v34 = vld [vmem:[#allocation6 + $0x514] ss:$8 sps:$4 sm:$0xff]  }
 0xdd2   :  { %5350 = vmatpush3.bf16.msra.mxu1 %v5788_v34 }
 0xdd3   :  { %v3616_v55 = vmul.f32 1.442695, %v3615_v8  ;;  %5351 = vmatprep.subr.bf16.mxu1 %v6131_v13 }
 0xdd4   :  { %v3624_v31 = vpop.permute.xlu0 %3623 }
 0xdd5   :  { %6017 = vpow2.f32 %v3616_v55  ;;  %v3626_v32 = vsub.f32 %v7973_v10, %v3624_v31  ;;  %v5789_v10 = vld [vmem:[#allocation6 + $0x520] ss:$8 sps:$4 sm:$0xff]  }
 0xdd6   :  { %5332 = vmatpush3.bf16.msra.mxu0 %v5789_v10  ;;  %5352 = vmatpush3.bf16.msra.mxu1 %v5791_v26 }
 0xdd7   :  { %v3627_v17 = vmul.f32 1.442695, %v3626_v32  ;;  %5333 = vmatprep.subr.bf16.mxu0 %v6131_v13  ;;  %5353 = vmatprep.subr.bf16.mxu1 %v6131_v13 }
 0xdd8   :  { %v3635_v53 = vpop.permute.xlu0 %3634 }
 0xdd9   :  { %6019 = vpow2.f32 %v3627_v17  ;;  %v3637_v42 = vsub.f32 %v7978_v36, %v3635_v53  ;;  %v5794_v36 = vld [vmem:[#allocation6 + $0x534] ss:$8 sps:$4 sm:$0xff]  }
 0xdda   :  { %5334 = vmatpush3.bf16.msra.mxu0 %v5792_v44  ;;  %5354 = vmatpush3.bf16.msra.mxu1 %v5794_v36 }
 0xddb   :  { %v3638_v47 = vmul.f32 1.442695, %v3637_v42  ;;  %5335 = vmatprep.subr.bf16.mxu0 %v6131_v13  ;;  %5355 = vmatprep.subr.bf16.mxu1 %v6131_v13  ;;  %v4879_v42 = vld [vmem:[%s8094_s7 + $0x13] ss:$8 sm:$0x3] }
 0xddc   :  { %v3663_v12 = vpop.permute.xlu0 %3662  ;;  %v4595_v34 = vrot.slane %v4879_v42, %v7614_v5 }
 0xddd   :  { %6021 = vpow2.f32 %v3638_v47  ;;  %v3665_v19 = vsel %vm3508_vm14, %v3663_v12, 0.0 }
 0xdde   :  { %5336 = vmatpush3.bf16.msra.mxu0 %v5795_v15  ;;  %5356 = vmatpush3.bf16.msra.mxu1 %v5797_v61  ;;  %6023 = vtanh.f32 %v7900_v18 }
 0xddf   :  { %v6018_v22 = vpop.eup %6017  ;;  %5337 = vmatprep.subr.bf16.mxu0 %v6131_v13  ;;  %5357 = vmatprep.subr.bf16.mxu1 %v6131_v13  ;;  %6025 = vpow2.f32 %v3608_v33 }
 0xde0   :  { %3619 = vrot.lane.b32.xlu1 %v6018_v22, %s6134_s16 }
 0xde2   :  { %5338 = vmatpush3.bf16.msra.mxu0 %v5798_v50  ;;  %5358 = vmatpush3.bf16.msra.mxu1 %v5800_v28 }
 0xde3   :  { %v6020_v43 = vpop.eup %6019  ;;  %5339 = vmatprep.subr.bf16.mxu0 %v6131_v13  ;;  %5359 = vmatprep.subr.bf16.mxu1 %v6131_v13 }
 0xde4   :  { %3630 = vrot.lane.b32.xlu1 %v6020_v43, %s6133_s15 }
 0xde6   :  { %5340 = vmatpush3.bf16.msra.mxu0 %v5801_v51  ;;  %5360 = vmatpush3.bf16.msra.mxu1 %v5803_v25 }
 0xde7   :  { %v6022_v0 = vpop.eup %6021  ;;  %5341 = vmatprep.subr.bf16.mxu0 %v6131_v13  ;;  %5361 = vmatprep.subr.bf16.mxu1 %v6131_v13  ;;  %v4398_v13 = vrot.slane %v4862_v37, %v7614_v5 }
 0xde8   :  { %3641 = vrot.lane.b32.xlu1 %v6022_v0, %s6135_s5  ;;  %v6024_v45 = vpop.eup %6023 }
 0xde9   :  { %v6026_v1 = vpop.eup %6025 }
 0xdea   :  { %5342 = vmatpush3.bf16.msra.mxu0 %v5804_v29  ;;  %5362 = vmatpush3.bf16.msra.mxu1 %v5806_v16 }
 0xe0c   :  { %3666 = vadd.xlane.f32.xlu1 %v3665_v19  ;;  %v4623_v19 = vld [vmem:[%s8094_s7 + $0x14] ss:$0 sm:$0xff] }
 0xe1d   :  { %4631 = vrot.lane.b32.xlu1 %v6024_v45, %s6143_s25 }
 0xe52   :  { %v3620_v60 = vpop.permute.xlu1 %3619 }
 0xe53   :  { %v3622_v7 = vadd.f32 %v6026_v1, %v3620_v60 }
 0xe56   :  { %v3631_v38 = vpop.permute.xlu1 %3630 }
 0xe57   :  { %v3633_v27 = vadd.f32 %v3631_v38, %v3622_v7 }
 0xe5a   :  { %v3642_v35 = vpop.permute.xlu1 %3641 }
 0xe5b   :  { %v3644_v63 = vadd.f32 %v3642_v35, %v3633_v27 }
 0xe5d   :  { %6027 = vlog2.f32 %v3644_v63 }
 0xe5e   :  { %6029 = vlog2.f32 %v7874_v9  ;;  %v4599_v9 = vrot.slane %v4879_v42, %v7619_v41 }
 0xe67   :  { %v6028_v8 = vpop.eup %6027 }
 0xe68   :  { %v6030_v55 = vpop.eup %6029  ;;  %v3646_v30 = vmul.f32 0.6931472, %v6028_v8 }
 0xe69   :  { %v3649_v31 = vmul.f32 0.6931472, %v6030_v55 }
 0xe6a   :  { %v3647_v32 = vadd.f32 %v3646_v30, %v8004_v2  ;;  %v4880_v2 = vld [vmem:[%s8094_s7 + $0x15] ss:$8 sm:$0x3]  ;;  %s6152_s7 = smov [#allocation7]  }
 0xe6b   :  { %v4314_v52 = vpop.f32.mrb[152].mxu0  ;;  %v3650_v14 = vadd.f32 %v3649_v31, %v7855_v11  ;;  %v4614_v0 = vrot.slane %v4880_v2, %v7614_v5  ;;  %v4618_v16 = vrot.slane %v4880_v2, %v7619_v41  ;;  %s4676_s0 = sshll.u32 %s6152_s7, 4  ;;  %s4677_s0 = int_to_ptr.vmem [resolvable:$true] %s4676_s0 }
 0xe6c   :  { %v4405_v6 = vadd.f32 %v4398_v13, %v4314_v52  ;;  %v5305_v23 = vpop.f32.mrb[153].mxu0  ;;  %v4386_v57 = vpop.f32.mrb[88].mxu1  ;;  %p6102_p0 = scmp.lt.s32.totalorder %s4677_s0, %s4677_s0 }
 0xe6d   :  { %v4406_v18 = vadd.f32 %v4402_v40, %v4386_v57  ;;  %v4317_v24 = vpop.f32.mrb[154].mxu0  ;;  %v5325_v20 = vpop.f32.mrb[89].mxu1  ;;  %v3651_v17 = vsub.f32 %v3647_v32, %v3650_v14 }
 0xe6e   :  { %v4407_v48 = vmul.f32 0.01, %v4405_v6  ;;  %v5306_v46 = vpop.f32.mrb[155].mxu0  ;;  %v4389_v4 = vpop.f32.mrb[90].mxu1 }
 0xe6f   :  { %v4408_v49 = vmul.f32 0.01, %v4406_v18  ;;  %v5326_v62 = vpop.f32.mrb[91].mxu1 }
 0xe70   :  { %v4409_v21 = vmax.f32 %v4405_v6, %v4407_v48 }
 0xe71   :  { %v4410_v39 = vmax.f32 %v4406_v18, %v4408_v49 }
 0xe72   :  { %v4427_v3 = vpack.c.bf16 %v4409_v21, %v4409_v21 }
 0xe73   :  { %v4428_v56 = vpack.c.bf16 %v4410_v39, %v4410_v39 }
 0xe74   :  { %5344 = vmatmul.mubr.bf16.vlgmr.msra.gmra.mrb[156].mxu0 %v4427_v3 }
 0xe75   :  { %5364 = vmatmul.mubr.bf16.vlgmr.msra.gmra.mrb[92].mxu1 %v4428_v56 }
 0xe99   :  { %v3667_v58 = vpop.xlane.xlu1 %3666 }
 0xe9a   :  { %v3668_v53 = vsub.f32 %v3651_v17, %v3667_v58 }
 0xe9c   :  { %4639 = vrot.lane.b32.xlu1 %v3668_v53, %s6149_s14 }
 0xe9d   :  { %v4632_v41 = vpop.permute.xlu1 %4631 }
 0xf0e   :  { %v4640_v52 = vpop.permute.xlu1 %4639 }
 0xf47   :  { %v4511_v47 = vpop.f32.mrb[156].mxu0 }
 0xf48   :  { %v4602_v10 = vadd.f32 %v4595_v34, %v4511_v47  ;;  %v5345_v11 = vpop.f32.mrb[157].mxu0  ;;  %v4583_v26 = vpop.f32.mrb[92].mxu1 }
 0xf49   :  { %v4603_v22 = vadd.f32 %v4599_v9, %v4583_v26  ;;  %v4514_v44 = vpop.f32.mrb[158].mxu0  ;;  %v5365_v36 = vpop.f32.mrb[93].mxu1 }
 0xf4a   :  { %v4604_v43 = vmul.f32 0.01, %v4602_v10  ;;  %v5346_v15 = vpop.f32.mrb[159].mxu0  ;;  %v4586_v61 = vpop.f32.mrb[94].mxu1 }
 0xf4b   :  { %v4605_v50 = vmul.f32 0.01, %v4603_v22  ;;  %v5366_v28 = vpop.f32.mrb[95].mxu1 }
 0xf4c   :  { %v4606_v51 = vmax.f32 %v4602_v10, %v4604_v43 }
 0xf4d   :  { %v4607_v25 = vmax.f32 %v4603_v22, %v4605_v50 }
 0xf4e   :  { %v4621_v29 = vmul.f32 %v4614_v0, %v4606_v51 }
 0xf4f   :  { %v4622_v12 = vmul.f32 %v4618_v16, %v4607_v25 }
 0xf50   :  { %4624 = vadd.xlane.f32.xlu0 %v4621_v29 }
 0xf54   :  { %4627 = vadd.xlane.f32.xlu0 %v4622_v12 }
 0xf6a   :  { %4635 = vrot.lane.b32.xlu0 %v7905_v59, %s6150_s19 }
 0xfdd   :  { %v4625_v45 = vpop.xlane.xlu0 %4624 }
 0xfde   :  { %v4626_v37 = vadd.f32 %v4625_v45, %v4623_v19 }
 0xfe0   :  { %v4643_v5 = vrot.slane %v4626_v37, 4 }
 0xfe1   :  { %v4628_v54 = vpop.xlane.xlu0 %4627 }
 0xfe2   :  { %v4629_v13 = vadd.f32 %v4628_v54, %v4623_v19  ;;  %4644 = vrot.lane.b32.xlu1 %v4643_v5, %s6137_s18 }
 0xfe4   :  { %v4648_v40 = vrot.slane %v4629_v13, 4 }
 0xfe5   :  { %v4636_v59 = vpop.permute.xlu0 %4635 }
 0xfe6   :  { %4652 = vrot.lane.b32.xlu1 %v4626_v37, %s6151_s3  ;;  %4649 = vrot.lane.b32.xlu0 %v4648_v40, %s6137_s18  ;;  %v4658_v33 = vsel %vm882_vm1, %v4632_v41, %v4636_v59  ;;  %s6097_s18 = scalar_lea.vmem %s4677_s0, 64 }
 0xfe7   :  { %v4660_v23 = vsel %vm4659_vm8, %v4658_v33, %v4640_v52  ;;  %p6098_p13 = scmp.ne.s32.totalorder %s4677_s0, %s6097_s18  ;;  %p6103_p1 = scmp.lt.s32.totalorder %s6097_s18, %s6097_s18 }
 0xfe9   :  { %p6104_p2 = por %p6103_p1, %p6102_p0 }
 0xfea   :  { %4655 = vrot.lane.b32.xlu0 %v4629_v13, %s6151_s3 }
 0xfeb   :  { %p6105_p3 = pnand %p6104_p2, %p6098_p13 }
0x1054   :  { %v4645_v6 = vpop.permute.xlu1 %4644 }
0x1055   :  { %v4662_v57 = vsel %vm4661_vm9, %v4660_v23, %v4645_v6 }
0x1058   :  { %v4650_v18 = vpop.permute.xlu0 %4649  ;;  %v4653_v24 = vpop.permute.xlu1 %4652 }
0x1059   :  { %v4663_v20 = vsel %vm980_vm3, %v4662_v57, %v4650_v18 }
0x105a   :  { %v4665_v48 = vsel %vm4664_vm15, %v4663_v20, %v4653_v24 }
0x105c   :  { %v4656_v46 = vpop.permute.xlu0 %4655 }
0x105d   :  { %v4666_v4 = vsel %vm1029_vm4, %v4665_v48, %v4656_v46 }
0x105e   :  { %v4667_v49 = vsel %vm1078_vm5, %v4666_v4, 0.0 }
0x105f   :  { %4669 = vst.msk [vmem:[#allocation7] sm:$0xf] %vm4668_vm0, %v4667_v49 }
0x1060   :  { %6108 = shalt.err (!%p6105_p3)
}
0x1061   :  { %s6109_s23 = scalar_lea.hbm %s8095_s8, 64 }
0x1062   :  { %p6110_p4 = scmp.ne.s32.totalorder %s8095_s8, %s6109_s23  ;;  %p6113_p5 = scmp.lt.u32.totalorder %s6109_s23, %s8095_s8 }
0x1064   :  { %p6115_p6 = pnand %p6113_p5, %p6110_p4 }
0x1066   :  { %6118 = shalt.err (!%p6115_p6)
}
0x1067   :  { %4679 = dma.vmem_to_hbm [thread:$0]  %s4677_s0, 64, %s8095_s8, [#allocation4]  }
0x1068   :  { %6123 = dma.done.wait [#allocation4], 64  }
0x1069   :  { %6124 = vsyncadd [#allocation4], 4294967232 }
0x106a   :  { %4683 = vsyncpa [#allocation3], 1 }
0x106b   :  { %4684 = vsyncpa [#allocation4], 1 }
0x106c   :  { %4685 = vsyncpa [#allocation5], 1 }

</bundles_post_ra>
